<compile_context>
chip_gen: v7x
topology: tpu7x:2x2x1
jax: 0.10.0
libtpu: 0.0.40
codegen_flags: <defaults>
</compile_context>

<pallas_src>
import functools
import math

import jax
import jax.numpy as jnp
from jax import lax
from jax.experimental import pallas as pl
from jax.experimental.pallas import tpu as pltpu

# bf16 matmul operands with f32 accumulation (set to jnp.float32 for bit-exact f32 matmuls).
MATMUL_DTYPE = jnp.bfloat16
ACC_DTYPE = jnp.float32
LN_EPS = 1e-5
NEG_INF = -1e9            # finite large-negative additive mask (avoids -inf - -inf NaNs)
VMEM_LIMIT_BYTES = 32 * 1024 * 1024


def _round_up(x, m):
    return ((x + m - 1) // m) * m


# ----------------------------- BlockSpec helpers -----------------------------

def _stacked(*tail):
    """Per-layer weight slab: leading layer dim squeezed, selected by the layer grid index."""
    tail = tuple(tail)
    zeros = (0,) * len(tail)
    return pl.BlockSpec((None,) + tail, lambda l: (l,) + zeros)


def _const(*shape):
    """Full-array block with a constant index map (fetched once, resident across the grid)."""
    shape = tuple(shape)
    zeros = (0,) * len(shape)
    return pl.BlockSpec(shape, lambda l: zeros)


# ----------------------------- in-kernel helpers -----------------------------

def _mm(a, b):
    """2-D MXU matmul: bf16 operands, f32 accumulation."""
    return jnp.dot(a.astype(MATMUL_DTYPE), b.astype(MATMUL_DTYPE),
                   preferred_element_type=ACC_DTYPE)


def _layer_norm(x, g, b, eps=LN_EPS):
    mu = jnp.mean(x, axis=-1, keepdims=True)
    var = jnp.mean((x - mu) ** 2, axis=-1, keepdims=True)
    return (x - mu) * lax.rsqrt(var + eps) * g + b


def _mha(x_q, x_kv, wqkv, bqkv, wo, bo, bias, num_heads):
    """PyTorch nn.MultiheadAttention semantics; heads AND batch folded into one einsum batch dim.

    x_q: (N, Lq, E) f32, x_kv: (N, Lk, E) f32
    wqkv: (3H, E, dh) f32 (q rows [0:H] already pre-scaled by 1/sqrt(dh)); bqkv: (3H, 1, dh)
    wo:   (H, dh, E);  bo: (1, E)
    bias: additive f32 mask broadcastable to (N*H, Lq, Lk), or None
    """
    N, Lq, E = x_q.shape
    Lk = x_kv.shape[1]
    H = num_heads
    dh = E // H
    B = N * H

    # hoisted bf16 casts (once per tensor, not per head / per projection)
    xq = jnp.broadcast_to(x_q.astype(MATMUL_DTYPE)[:, None], (N, H, Lq, E)).reshape(B, Lq, E)
    xk = jnp.broadcast_to(x_kv.astype(MATMUL_DTYPE)[:, None], (N, H, Lk, E)).reshape(B, Lk, E)
    w = wqkv.astype(MATMUL_DTYPE)                         # (3H, E, dh)

    def proj(xb, wh, bh):
        wb = jnp.broadcast_to(wh[None], (N, H, E, dh)).reshape(B, E, dh)
        bb = jnp.broadcast_to(bh[None], (N, H, 1, dh)).reshape(B, 1, dh)
        return jnp.einsum('ble,bed->bld', xb, wb,
                          preferred_element_type=ACC_DTYPE) + bb       # (B, L, dh) f32

    q = proj(xq, w[0:H], bqkv[0:H])                       # scale already folded into w/b
    k = proj(xk, w[H:2 * H], bqkv[H:2 * H])
    v = proj(xk, w[2 * H:3 * H], bqkv[2 * H:3 * H])

    s = jnp.einsum('bqd,bkd->bqk', q.astype(MATMUL_DTYPE), k.astype(MATMUL_DTYPE),
                   preferred_element_type=ACC_DTYPE)      # (B, Lq, Lk) f32
    if bias is not None:
        s = s + bias
    m = jnp.max(s, axis=-1, keepdims=True)
    p = jnp.exp(s - m)
    p = p * pl.reciprocal(jnp.sum(p, axis=-1, keepdims=True), approx=True)   # EUP divide

    o = jnp.einsum('bqk,bkd->bqd', p.astype(MATMUL_DTYPE), v.astype(MATMUL_DTYPE),
                   preferred_element_type=ACC_DTYPE)      # (B, Lq, dh)
    wob = jnp.broadcast_to(wo.astype(MATMUL_DTYPE)[None], (N, H, dh, E)).reshape(B, dh, E)
    ctx = jnp.einsum('bqd,bde->bqe', o.astype(MATMUL_DTYPE), wob,
                     preferred_element_type=ACC_DTYPE)    # (B, Lq, E)
    # summing per-head slabs == concat(heads) @ Wo
    return ctx.reshape(N, H, Lq, E).sum(axis=1) + bo      # (N, Lq, E)


# ----------------------------- fused stack kernels -----------------------------

def _encoder_stack_kernel(x_ref, kpm_ref, pe_ref,
                          wqkv_ref, bqkv_ref, wo_ref, vec_ref,
                          w1_ref, b1_ref, w2_ref, enorm_ref,
                          mem_ref, x_scr, *, num_heads):
    layer = pl.program_id(0)

    @pl.when(layer == 0)
    def _():
        # fused positional-encoding add (pe broadcast over batch)
        x_scr[...] = x_ref[...] + pe_ref[...]

    x = x_scr[...]                                        # (N, S, E) f32
    N, S, E = x.shape
    H = num_heads

    vec = vec_ref[...]                                    # (6, E): [bo, g1, b1, b2_ffn, g2, b2]
    kpm = kpm_ref[...]                                    # (N, 1, S) additive key-padding bias
    kb = jnp.broadcast_to(kpm[:, None], (N, H, 1, S)).reshape(N * H, 1, S)

    a = _mha(x, x, wqkv_ref[...], bqkv_ref[...], wo_ref[...], vec[0:1], kb, H)
    x = _layer_norm(x + a, vec[1:2], vec[2:3])

    x2 = x.reshape(N * S, E)
    h = jnp.maximum(_mm(x2, w1_ref[...]) + b1_ref[...], 0.0)      # relu in f32
    f = _mm(h, w2_ref[...]) + vec[3:4]
    x = _layer_norm(x + f.reshape(N, S, E), vec[4:5], vec[5:6])
    x_scr[...] = x

    @pl.when(layer == pl.num_programs(0) - 1)
    def _():
        en = enorm_ref[...]                               # (2, E): final encoder LayerNorm
        mem_ref[...] = _layer_norm(x, en[0:1], en[1:2])


def _decoder_stack_kernel(x_ref, mem_in_ref, pe_ref,
                          sa_wqkv_ref, sa_bqkv_ref, sa_wo_ref,
                          ca_wqkv_ref, ca_bqkv_ref, ca_wo_ref,
                          w1_ref, b1_ref, w2_ref, vec_ref,
                          dnorm_ref, fcw_ref, fcb_ref,
                          logits_ref, x_scr, *, num_heads):
    layer = pl.program_id(0)

    @pl.when(layer == 0)
    def _():
        x_scr[...] = x_ref[...] + pe_ref[...]

    x = x_scr[...]                                        # (N, T, E)
    mem = mem_in_ref[...]                                 # (N, S, E)
    N, T, E = x.shape
    H = num_heads

    vec = vec_ref[...]                                    # (9, E)

    # causal (subsequent) mask generated in-kernel, never materialized in HBM
    row = lax.broadcasted_iota(jnp.int32, (T, T), 0)
    col = lax.broadcasted_iota(jnp.int32, (T, T), 1)
    causal = jnp.where(col > row, jnp.float32(NEG_INF), jnp.float32(0.0))[None]   # (1, T, T)

    a = _mha(x, x, sa_wqkv_ref[...], sa_bqkv_ref[...], sa_wo_ref[...], vec[0:1], causal, H)
    x = _layer_norm(x + a, vec[1:2], vec[2:3])

    # cross-attention: memory_key_padding_mask=None in the PyTorch model -> no bias
    c = _mha(x, mem, ca_wqkv_ref[...], ca_bqkv_ref[...], ca_wo_ref[...], vec[3:4], None, H)
    x = _layer_norm(x + c, vec[4:5], vec[5:6])

    x2 = x.reshape(N * T, E)
    h = jnp.maximum(_mm(x2, w1_ref[...]) + b1_ref[...], 0.0)
    f = _mm(h, w2_ref[...]) + vec[6:7]
    x = _layer_norm(x + f.reshape(N, T, E), vec[7:8], vec[8:9])
    x_scr[...] = x

    @pl.when(layer == pl.num_programs(0) - 1)
    def _():
        # fused final decoder LayerNorm + fc_linear into the (lane-padded) vocab dim
        dn = dnorm_ref[...]                               # (2, E)
        xn = _layer_norm(x.reshape(N * T, E), dn[0:1], dn[1:2])
        vp = fcw_ref.shape[1]
        logits_ref[...] = (_mm(xn, fcw_ref[...]) + fcb_ref[...]).reshape(N, T, vp)


# ----------------------------- kernel wrappers -----------------------------

def pallas_encoder_stack(enc, enorm, src_emb, kpm, pe_s, num_heads):
    N, S, E = src_emb.shape
    n_layers = enc["wqkv"].shape[0]
    H = num_heads
    dh = E // H
    F = enc["w1"].shape[-1]
    return pl.pallas_call(
        functools.partial(_encoder_stack_kernel, num_heads=H),
        out_shape=jax.ShapeDtypeStruct((N, S, E), jnp.float32),
        grid=(n_layers,),
        in_specs=[
            _const(N, S, E), _const(N, 1, S), _const(1, S, E),
            _stacked(3 * H, E, dh), _stacked(3 * H, 1, dh), _stacked(H, dh, E),
            _stacked(6, E),
            _stacked(E, F), _stacked(1, F), _stacked(F, E),
            _const(2, E),
        ],
        out_specs=_const(N, S, E),
        scratch_shapes=[pltpu.VMEM((N, S, E), jnp.float32)],
        compiler_params=pltpu.CompilerParams(
            dimension_semantics=("arbitrary",),          # loop-carried through VMEM scratch
            vmem_limit_bytes=VMEM_LIMIT_BYTES),
    )(src_emb, kpm, pe_s,
      enc["wqkv"], enc["bqkv"], enc["wo"], enc["vec"],
      enc["w1"], enc["b1"], enc["w2"], enorm)


def pallas_decoder_stack(dec, dnorm, fc_w, fc_b, tgt_emb, mem, pe_t, num_heads):
    N, T, E = tgt_emb.shape
    S = mem.shape[1]
    n_layers = dec["sa_wqkv"].shape[0]
    H = num_heads
    dh = E // H
    F = dec["w1"].shape[-1]
    Vp = fc_w.shape[1]
    return pl.pallas_call(
        functools.partial(_decoder_stack_kernel, num_heads=H),
        out_shape=jax.ShapeDtypeStruct((N, T, Vp), jnp.float32),
        grid=(n_layers,),
        in_specs=[
            _const(N, T, E), _const(N, S, E), _const(1, T, E),
            _stacked(3 * H, E, dh), _stacked(3 * H, 1, dh), _stacked(H, dh, E),
            _stacked(3 * H, E, dh), _stacked(3 * H, 1, dh), _stacked(H, dh, E),
            _stacked(E, F), _stacked(1, F), _stacked(F, E), _stacked(9, E),
            _const(2, E), _const(E, Vp), _const(1, Vp),
        ],
        out_specs=_const(N, T, Vp),
        scratch_shapes=[pltpu.VMEM((N, T, E), jnp.float32)],
        compiler_params=pltpu.CompilerParams(
            dimension_semantics=("arbitrary",),
            vmem_limit_bytes=VMEM_LIMIT_BYTES),
    )(tgt_emb, mem, pe_t,
      dec["sa_wqkv"], dec["sa_bqkv"], dec["sa_wo"],
      dec["ca_wqkv"], dec["ca_bqkv"], dec["ca_wo"],
      dec["w1"], dec["b1"], dec["w2"], dec["vec"],
      dnorm, fc_w, fc_b)


# ----------------------------- params / model -----------------------------

def make_positional_encoding(max_len, d_model):
    # Module semantics: PositionalEncoding(max_len=input_vocab_size); requires S, T <= max_len.
    position = jnp.arange(max_len, dtype=jnp.float32)[:, None]
    div_term = jnp.exp(jnp.arange(0, d_model, 2, dtype=jnp.float32)
                       * (-math.log(10000.0) / d_model))
    pe = jnp.zeros((max_len, d_model), jnp.float32)
    pe = pe.at[:, 0::2].set(jnp.sin(position * div_term))
    pe = pe.at[:, 1::2].set(jnp.cos(position * div_term))
    return pe                                             # (max_len, d_model)


def init_params(key, in_vocab, out_vocab, d_model, num_heads, n_enc, n_dec, d_ff):
    E, F, H = d_model, d_ff, num_heads
    dh = E // H
    scale = 1.0 / math.sqrt(dh)
    keys = iter(jax.random.split(key, 512))

    def w(shape, s=0.02):
        return (s * jax.random.normal(next(keys), shape)).astype(jnp.float32)

    def mha_p():
        # per-head packed, pre-transposed projections: q_h = x @ wqkv[h] + bqkv[h]
        # 1/sqrt(dh) folded into the Q weights/bias (applied in f32 weight space).
        wq, bq = w((H, E, dh)) * scale, w((H, 1, dh)) * scale
        wk, bk = w((H, E, dh)), w((H, 1, dh))
        wv, bv = w((H, E, dh)), w((H, 1, dh))
        return (jnp.concatenate([wq, wk, wv], axis=0),    # (3H, E, dh)
                jnp.concatenate([bq, bk, bv], axis=0),    # (3H, 1, dh)
                w((H, dh, E)),                            # out-proj per-head slabs
                w((1, E)))                                # out-proj bias -> vec slab

    def ln_vec():
        return jnp.ones((1, E), jnp.float32), jnp.zeros((1, E), jnp.float32)

    enc_layers = []
    for _ in range(n_enc):
        wqkv, bqkv, wo, bo = mha_p()
        g1, be1 = ln_vec()
        w1, b1 = w((E, F)), w((1, F))
        w2, b2 = w((F, E)), w((1, E))
        g2, be2 = ln_vec()
        vec = jnp.concatenate([bo, g1, be1, b2, g2, be2], axis=0)     # (6, E)
        enc_layers.append(dict(wqkv=wqkv, bqkv=bqkv, wo=wo, vec=vec, w1=w1, b1=b1, w2=w2))
    enc = {k: jnp.stack([lyr[k] for lyr in enc_layers]) for k in enc_layers[0]}

    dec_layers = []
    for _ in range(n_dec):
        sa_wqkv, sa_bqkv, sa_wo, sa_bo = mha_p()
        g1, be1 = ln_vec()
        ca_wqkv, ca_bqkv, ca_wo, ca_bo = mha_p()
        g2, be2 = ln_vec()
        w1, b1 = w((E, F)), w((1, F))
        w2, b2 = w((F, E)), w((1, E))
        g3, be3 = ln_vec()
        vec = jnp.concatenate([sa_bo, g1, be1, ca_bo, g2, be2, b2, g3, be3], axis=0)  # (9, E)
        dec_layers.append(dict(sa_wqkv=sa_wqkv, sa_bqkv=sa_bqkv, sa_wo=sa_wo,
                               ca_wqkv=ca_wqkv, ca_bqkv=ca_bqkv, ca_wo=ca_wo,
                               vec=vec, w1=w1, b1=b1, w2=w2))
    dec = {k: jnp.stack([lyr[k] for lyr in dec_layers]) for k in dec_layers[0]}

    def norm_slab():
        return jnp.concatenate([jnp.ones((1, E), jnp.float32),
                                jnp.zeros((1, E), jnp.float32)], axis=0)   # (2, E)

    # fc_linear padded to a lane-dense vocab (multiple of 128); sliced back in the wrapper.
    v_pad = _round_up(out_vocab, 128)
    fc_w = jnp.zeros((E, v_pad), jnp.float32).at[:, :out_vocab].set(w((E, out_vocab)))
    fc_b = jnp.zeros((1, v_pad), jnp.float32).at[:, :out_vocab].set(w((1, out_vocab)))

    return dict(
        in_emb=w((in_vocab, E), 1.0),
        out_emb=w((out_vocab, E), 1.0),
        pe=make_positional_encoding(in_vocab, E),
        enc=enc, enc_norm=norm_slab(),
        dec=dec, dec_norm=norm_slab(),
        fc_w=fc_w, fc_b=fc_b,
    )


def transformer_trans_model_forward(params, source, target, *, num_heads, pad_idx, out_vocab):
    """source: (S, N) int32 ids; target: (T, N) int32 ids -> logits (T, N, out_vocab)."""
    S, _ = source.shape
    T = target.shape[0]
    pe = params["pe"]

    # TODO(synk): embedding gather stays in XLA (jnp.take); no clean single-kernel Pallas gather here.
    # batch-major (N, L, E) activations: features/heads stay packed along the lane dim.
    src_emb = jnp.take(params["in_emb"], source.T, axis=0)            # (N, S, E)
    tgt_emb = jnp.take(params["out_emb"], target.T, axis=0)           # (N, T, E)

    # src key-padding additive bias (N, 1, S); finite large-negative, broadcast in-kernel
    kpm = jnp.where(source.T == pad_idx, jnp.float32(NEG_INF),
                    jnp.float32(0.0))[:, None, :]

    mem = pallas_encoder_stack(params["enc"], params["enc_norm"], src_emb, kpm,
                               pe[:S][None], num_heads)               # (N, S, E)
    logits_p = pallas_decoder_stack(params["dec"], params["dec_norm"],
                                    params["fc_w"], params["fc_b"],
                                    tgt_emb, mem, pe[:T][None], num_heads)   # (N, T, Vpad)
    logits = logits_p[..., :out_vocab]                                # strip vocab lane padding
    return jnp.transpose(logits, (1, 0, 2))                           # (T, N, V) time-major


# ----------------------------- main -----------------------------

if __name__ == "__main__":
    INPUT_VOCAB = 50
    OUTPUT_VOCAB = 60
    D_MODEL = 32
    NUM_HEADS = 4
    NUM_ENC_LAYERS = 2
    NUM_DEC_LAYERS = 2
    D_FF = 64
    PAD_IDX = 1
    S, T, N = 8, 8, 2

    root = jax.random.PRNGKey(0)
    k_src, k_tgt, k_par = jax.random.split(root, 3)

    source = jax.random.randint(k_src, (S, N), 2, INPUT_VOCAB, dtype=jnp.int32)
    target = jax.random.randint(k_tgt, (T, N), 2, OUTPUT_VOCAB, dtype=jnp.int32)
    source = source.at[-2:, 1].set(PAD_IDX)   # exercise the src_key_padding_mask path

    params = init_params(k_par, INPUT_VOCAB, OUTPUT_VOCAB, D_MODEL, NUM_HEADS,
                         NUM_ENC_LAYERS, NUM_DEC_LAYERS, D_FF)

    fwd = jax.jit(functools.partial(transformer_trans_model_forward,
                                    num_heads=NUM_HEADS, pad_idx=PAD_IDX,
                                    out_vocab=OUTPUT_VOCAB))
    logits = jax.block_until_ready(fwd(params, source, target))

    assert logits.shape == (T, N, OUTPUT_VOCAB), logits.shape
    assert bool(jnp.all(jnp.isfinite(logits)))
    print("KERNEL_OK")
</pallas_src>

<mosaic_0001>
module attributes {stable_mosaic.version = 11 : i64} {
  func.func @_encoder_stack_kernel(%arg0: i32, %arg1: memref<2x8x32xf32, #tpu.memory_space<vmem>>, %arg2: memref<2x1x8xf32, #tpu.memory_space<vmem>>, %arg3: memref<1x8x32xf32, #tpu.memory_space<vmem>>, %arg4: memref<1x12x32x8xf32, #tpu.memory_space<vmem>>, %arg5: memref<1x12x1x8xf32, #tpu.memory_space<vmem>>, %arg6: memref<1x4x8x32xf32, #tpu.memory_space<vmem>>, %arg7: memref<1x6x32xf32, #tpu.memory_space<vmem>>, %arg8: memref<1x32x64xf32, #tpu.memory_space<vmem>>, %arg9: memref<1x1x64xf32, #tpu.memory_space<vmem>>, %arg10: memref<1x64x32xf32, #tpu.memory_space<vmem>>, %arg11: memref<2x32xf32, #tpu.memory_space<vmem>>, %arg12: memref<2x8x32xf32, #tpu.memory_space<vmem>>, %arg13: memref<2x8x32xf32, #tpu.memory_space<vmem>>) attributes {dimension_semantics = [#tpu.dimension_semantics<arbitrary>], iteration_bounds = array<i64: 2>, scalar_prefetch = 0 : i64, scratch_operands = 1 : i64, tpu.core_type = #tpu.core_type<tc>, window_params = [{pipeline_mode = #tpu.pipeline_mode<synchronous>, transform_indices = @transform_0, window_bounds = array<i64: 2, 8, 32>}, {pipeline_mode = #tpu.pipeline_mode<synchronous>, transform_indices = @transform_1, window_bounds = array<i64: 2, 1, 8>}, {pipeline_mode = #tpu.pipeline_mode<synchronous>, transform_indices = @transform_2, window_bounds = array<i64: 1, 8, 32>}, {transform_indices = @transform_3, window_bounds = array<i64: 1, 12, 32, 8>}, {transform_indices = @transform_4, window_bounds = array<i64: 1, 12, 1, 8>}, {transform_indices = @transform_5, window_bounds = array<i64: 1, 4, 8, 32>}, {transform_indices = @transform_6, window_bounds = array<i64: 1, 6, 32>}, {transform_indices = @transform_7, window_bounds = array<i64: 1, 32, 64>}, {transform_indices = @transform_8, window_bounds = array<i64: 1, 1, 64>}, {transform_indices = @transform_9, window_bounds = array<i64: 1, 64, 32>}, {pipeline_mode = #tpu.pipeline_mode<synchronous>, transform_indices = @transform_10, window_bounds = array<i64: 2, 32>}, {pipeline_mode = #tpu.pipeline_mode<synchronous>, transform_indices = @transform_11, window_bounds = array<i64: 2, 8, 32>}]} {
    %c0_i32 = arith.constant 0 : i32
    %0 = arith.cmpi eq, %arg0, %c0_i32 : i32
    %1 = arith.extui %0 : i1 to i32
    %c0_i32_0 = arith.constant 0 : i32
    %2 = arith.cmpi ne, %1, %c0_i32_0 : i32
    scf.if %2 {
      %c0_55 = arith.constant 0 : index
      %c0_56 = arith.constant 0 : index
      %c0_57 = arith.constant 0 : index
      %177 = vector.load %arg1[%c0_55, %c0_56, %c0_57] : memref<2x8x32xf32, #tpu.memory_space<vmem>>, vector<2x8x32xf32>
      %c0_58 = arith.constant 0 : index
      %c0_59 = arith.constant 0 : index
      %c0_60 = arith.constant 0 : index
      %178 = vector.load %arg3[%c0_58, %c0_59, %c0_60] : memref<1x8x32xf32, #tpu.memory_space<vmem>>, vector<1x8x32xf32>
      %179 = vector.broadcast %178 : vector<1x8x32xf32> to vector<2x8x32xf32>
      %180 = arith.addf %177, %179 : vector<2x8x32xf32>
      %c0_61 = arith.constant 0 : index
      %c0_62 = arith.constant 0 : index
      %c0_63 = arith.constant 0 : index
      %181 = vector.load %arg13[%c0_61, %c0_62, %c0_63] : memref<2x8x32xf32, #tpu.memory_space<vmem>>, vector<2x8x32xf32>
      tpu.vector_store %arg13[%c0_61, %c0_62, %c0_63], %180 {strides = array<i32>} : memref<2x8x32xf32, #tpu.memory_space<vmem>>, vector<2x8x32xf32>,
    } else {
    }
    %c0 = arith.constant 0 : index
    %c0_1 = arith.constant 0 : index
    %c0_2 = arith.constant 0 : index
    %3 = vector.load %arg13[%c0, %c0_1, %c0_2] : memref<2x8x32xf32, #tpu.memory_space<vmem>>, vector<2x8x32xf32>
    %c0_3 = arith.constant 0 : index
    %c0_4 = arith.constant 0 : index
    %c0_5 = arith.constant 0 : index
    %4 = vector.load %arg7[%c0_3, %c0_4, %c0_5] : memref<1x6x32xf32, #tpu.memory_space<vmem>>, vector<1x6x32xf32>
    %5 = vector.shape_cast %4 : vector<1x6x32xf32> to vector<6x32xf32>
    %c0_6 = arith.constant 0 : index
    %c0_7 = arith.constant 0 : index
    %c0_8 = arith.constant 0 : index
    %6 = vector.load %arg2[%c0_6, %c0_7, %c0_8] : memref<2x1x8xf32, #tpu.memory_space<vmem>>, vector<2x1x8xf32>
    %7 = vector.shape_cast %6 : vector<2x1x8xf32> to vector<2x1x1x8xf32>
    %8 = vector.shape_cast %7 : vector<2x1x1x8xf32> to vector<2x1x1x8xf32>
    %9 = vector.broadcast %8 : vector<2x1x1x8xf32> to vector<2x4x1x8xf32>
    %10 = vector.shape_cast %9 : vector<2x4x1x8xf32> to vector<8x1x8xf32>
    %c0_9 = arith.constant 0 : index
    %c0_10 = arith.constant 0 : index
    %c0_11 = arith.constant 0 : index
    %c0_12 = arith.constant 0 : index
    %11 = vector.load %arg4[%c0_9, %c0_10, %c0_11, %c0_12] : memref<1x12x32x8xf32, #tpu.memory_space<vmem>>, vector<1x12x32x8xf32>
    %12 = vector.shape_cast %11 : vector<1x12x32x8xf32> to vector<12x32x8xf32>
    %c0_13 = arith.constant 0 : index
    %c0_14 = arith.constant 0 : index
    %c0_15 = arith.constant 0 : index
    %c0_16 = arith.constant 0 : index
    %13 = vector.load %arg5[%c0_13, %c0_14, %c0_15, %c0_16] : memref<1x12x1x8xf32, #tpu.memory_space<vmem>>, vector<1x12x1x8xf32>
    %14 = vector.shape_cast %13 : vector<1x12x1x8xf32> to vector<12x1x8xf32>
    %c0_17 = arith.constant 0 : index
    %c0_18 = arith.constant 0 : index
    %c0_19 = arith.constant 0 : index
    %c0_20 = arith.constant 0 : index
    %15 = vector.load %arg6[%c0_17, %c0_18, %c0_19, %c0_20] : memref<1x4x8x32xf32, #tpu.memory_space<vmem>>, vector<1x4x8x32xf32>
    %16 = vector.shape_cast %15 : vector<1x4x8x32xf32> to vector<4x8x32xf32>
    %17 = vector.extract_strided_slice %5 {offsets = [0, 0], sizes = [1, 32], strides = [1, 1]} : vector<6x32xf32> to vector<1x32xf32>
    %18 = arith.truncf %3 : vector<2x8x32xf32> to vector<2x8x32xbf16>
    %19 = vector.shape_cast %18 : vector<2x8x32xbf16> to vector<2x1x8x32xbf16>
    %20 = vector.shape_cast %19 : vector<2x1x8x32xbf16> to vector<2x1x8x32xbf16>
    %21 = vector.broadcast %20 : vector<2x1x8x32xbf16> to vector<2x4x8x32xbf16>
    %22 = vector.shape_cast %21 : vector<2x4x8x32xbf16> to vector<8x8x32xbf16>
    %23 = arith.truncf %3 : vector<2x8x32xf32> to vector<2x8x32xbf16>
    %24 = vector.shape_cast %23 : vector<2x8x32xbf16> to vector<2x1x8x32xbf16>
    %25 = vector.shape_cast %24 : vector<2x1x8x32xbf16> to vector<2x1x8x32xbf16>
    %26 = vector.broadcast %25 : vector<2x1x8x32xbf16> to vector<2x4x8x32xbf16>
    %27 = vector.shape_cast %26 : vector<2x4x8x32xbf16> to vector<8x8x32xbf16>
    %28 = arith.truncf %12 : vector<12x32x8xf32> to vector<12x32x8xbf16>
    %29 = vector.extract_strided_slice %28 {offsets = [0, 0, 0], sizes = [4, 32, 8], strides = [1, 1, 1]} : vector<12x32x8xbf16> to vector<4x32x8xbf16>
    %30 = vector.extract_strided_slice %14 {offsets = [0, 0, 0], sizes = [4, 1, 8], strides = [1, 1, 1]} : vector<12x1x8xf32> to vector<4x1x8xf32>
    %31 = vector.shape_cast %29 : vector<4x32x8xbf16> to vector<1x4x32x8xbf16>
    %32 = vector.shape_cast %31 : vector<1x4x32x8xbf16> to vector<1x4x32x8xbf16>
    %33 = vector.broadcast %32 : vector<1x4x32x8xbf16> to vector<2x4x32x8xbf16>
    %34 = vector.shape_cast %33 : vector<2x4x32x8xbf16> to vector<8x32x8xbf16>
    %35 = vector.shape_cast %30 : vector<4x1x8xf32> to vector<1x4x1x8xf32>
    %36 = vector.shape_cast %35 : vector<1x4x1x8xf32> to vector<1x4x1x8xf32>
    %37 = vector.broadcast %36 : vector<1x4x1x8xf32> to vector<2x4x1x8xf32>
    %38 = vector.shape_cast %37 : vector<2x4x1x8xf32> to vector<8x1x8xf32>
    "tpu.trace_start"() <{level = 10 : i32, message = "ble,bed->bld"}> : () -> ()
    %cst = arith.constant dense<0.000000e+00> : vector<8x8x8xf32>
    %39 = tpu.matmul %22, %34, %cst {dimension_numbers = #tpu.dot_dimension_numbers<[2], [1], [1], [2], [0, 0, 0, 1, 1, 2], [0], [0]>} : vector<8x8x32xbf16>, vector<8x32x8xbf16>, vector<8x8x8xf32> -> vector<8x8x8xf32>
    "tpu.trace_stop"() : () -> ()
    %40 = vector.broadcast %38 : vector<8x1x8xf32> to vector<8x8x8xf32>
    %41 = arith.addf %39, %40 : vector<8x8x8xf32>
    %42 = vector.extract_strided_slice %28 {offsets = [4, 0, 0], sizes = [4, 32, 8], strides = [1, 1, 1]} : vector<12x32x8xbf16> to vector<4x32x8xbf16>
    %43 = vector.extract_strided_slice %14 {offsets = [4, 0, 0], sizes = [4, 1, 8], strides = [1, 1, 1]} : vector<12x1x8xf32> to vector<4x1x8xf32>
    %44 = vector.shape_cast %42 : vector<4x32x8xbf16> to vector<1x4x32x8xbf16>
    %45 = vector.shape_cast %44 : vector<1x4x32x8xbf16> to vector<1x4x32x8xbf16>
    %46 = vector.broadcast %45 : vector<1x4x32x8xbf16> to vector<2x4x32x8xbf16>
    %47 = vector.shape_cast %46 : vector<2x4x32x8xbf16> to vector<8x32x8xbf16>
    %48 = vector.shape_cast %43 : vector<4x1x8xf32> to vector<1x4x1x8xf32>
    %49 = vector.shape_cast %48 : vector<1x4x1x8xf32> to vector<1x4x1x8xf32>
    %50 = vector.broadcast %49 : vector<1x4x1x8xf32> to vector<2x4x1x8xf32>
    %51 = vector.shape_cast %50 : vector<2x4x1x8xf32> to vector<8x1x8xf32>
    "tpu.trace_start"() <{level = 10 : i32, message = "ble,bed->bld"}> : () -> ()
    %cst_21 = arith.constant dense<0.000000e+00> : vector<8x8x8xf32>
    %52 = tpu.matmul %27, %47, %cst_21 {dimension_numbers = #tpu.dot_dimension_numbers<[2], [1], [1], [2], [0, 0, 0, 1, 1, 2], [0], [0]>} : vector<8x8x32xbf16>, vector<8x32x8xbf16>, vector<8x8x8xf32> -> vector<8x8x8xf32>
    "tpu.trace_stop"() : () -> ()
    %53 = vector.broadcast %51 : vector<8x1x8xf32> to vector<8x8x8xf32>
    %54 = arith.addf %52, %53 : vector<8x8x8xf32>
    %55 = vector.extract_strided_slice %28 {offsets = [8, 0, 0], sizes = [4, 32, 8], strides = [1, 1, 1]} : vector<12x32x8xbf16> to vector<4x32x8xbf16>
    %56 = vector.extract_strided_slice %14 {offsets = [8, 0, 0], sizes = [4, 1, 8], strides = [1, 1, 1]} : vector<12x1x8xf32> to vector<4x1x8xf32>
    %57 = vector.shape_cast %55 : vector<4x32x8xbf16> to vector<1x4x32x8xbf16>
    %58 = vector.shape_cast %57 : vector<1x4x32x8xbf16> to vector<1x4x32x8xbf16>
    %59 = vector.broadcast %58 : vector<1x4x32x8xbf16> to vector<2x4x32x8xbf16>
    %60 = vector.shape_cast %59 : vector<2x4x32x8xbf16> to vector<8x32x8xbf16>
    %61 = vector.shape_cast %56 : vector<4x1x8xf32> to vector<1x4x1x8xf32>
    %62 = vector.shape_cast %61 : vector<1x4x1x8xf32> to vector<1x4x1x8xf32>
    %63 = vector.broadcast %62 : vector<1x4x1x8xf32> to vector<2x4x1x8xf32>
    %64 = vector.shape_cast %63 : vector<2x4x1x8xf32> to vector<8x1x8xf32>
    "tpu.trace_start"() <{level = 10 : i32, message = "ble,bed->bld"}> : () -> ()
    %cst_22 = arith.constant dense<0.000000e+00> : vector<8x8x8xf32>
    %65 = tpu.matmul %27, %60, %cst_22 {dimension_numbers = #tpu.dot_dimension_numbers<[2], [1], [1], [2], [0, 0, 0, 1, 1, 2], [0], [0]>} : vector<8x8x32xbf16>, vector<8x32x8xbf16>, vector<8x8x8xf32> -> vector<8x8x8xf32>
    "tpu.trace_stop"() : () -> ()
    %66 = vector.broadcast %64 : vector<8x1x8xf32> to vector<8x8x8xf32>
    %67 = arith.addf %65, %66 : vector<8x8x8xf32>
    %68 = arith.truncf %41 : vector<8x8x8xf32> to vector<8x8x8xbf16>
    %69 = arith.truncf %54 : vector<8x8x8xf32> to vector<8x8x8xbf16>
    "tpu.trace_start"() <{level = 10 : i32, message = "bqd,bkd->bqk"}> : () -> ()
    %cst_23 = arith.constant dense<0.000000e+00> : vector<8x8x8xf32>
    %70 = tpu.matmul %68, %69, %cst_23 {dimension_numbers = #tpu.dot_dimension_numbers<[2], [2], [1], [1], [0, 0, 0, 1, 1, 1], [0], [0]>} : vector<8x8x8xbf16>, vector<8x8x8xbf16>, vector<8x8x8xf32> -> vector<8x8x8xf32>
    "tpu.trace_stop"() : () -> ()
    %71 = vector.broadcast %10 : vector<8x1x8xf32> to vector<8x8x8xf32>
    %72 = arith.addf %70, %71 : vector<8x8x8xf32>
    %cst_24 = arith.constant dense<0xFF800000> : vector<8x8xf32>
    %73 = vector.multi_reduction <maximumf>, %72, %cst_24 [2] : vector<8x8x8xf32> to vector<8x8xf32>
    %74 = vector.shape_cast %73 : vector<8x8xf32> to vector<8x8x1xf32>
    %75 = vector.broadcast %74 : vector<8x8x1xf32> to vector<8x8x8xf32>
    %76 = arith.subf %72, %75 : vector<8x8x8xf32>
    %77 = math.exp %76 : vector<8x8x8xf32>
    %cst_25 = arith.constant dense<0.000000e+00> : vector<8x8xf32>
    %78 = vector.multi_reduction <add>, %77, %cst_25 [2] : vector<8x8x8xf32> to vector<8x8xf32>
    %79 = vector.shape_cast %78 : vector<8x8xf32> to vector<8x8x1xf32>
    %80 = tpu.reciprocal %79 {approx = true} : vector<8x8x1xf32> -> vector<8x8x1xf32>
    %81 = vector.broadcast %80 : vector<8x8x1xf32> to vector<8x8x8xf32>
    %82 = arith.mulf %77, %81 : vector<8x8x8xf32>
    %83 = arith.truncf %82 : vector<8x8x8xf32> to vector<8x8x8xbf16>
    %84 = arith.truncf %67 : vector<8x8x8xf32> to vector<8x8x8xbf16>
    "tpu.trace_start"() <{level = 10 : i32, message = "bqk,bkd->bqd"}> : () -> ()
    %cst_26 = arith.constant dense<0.000000e+00> : vector<8x8x8xf32>
    %85 = tpu.matmul %83, %84, %cst_26 {dimension_numbers = #tpu.dot_dimension_numbers<[2], [1], [1], [2], [0, 0, 0, 1, 1, 2], [0], [0]>} : vector<8x8x8xbf16>, vector<8x8x8xbf16>, vector<8x8x8xf32> -> vector<8x8x8xf32>
    "tpu.trace_stop"() : () -> ()
    %86 = arith.truncf %16 : vector<4x8x32xf32> to vector<4x8x32xbf16>
    %87 = vector.shape_cast %86 : vector<4x8x32xbf16> to vector<1x4x8x32xbf16>
    %88 = vector.shape_cast %87 : vector<1x4x8x32xbf16> to vector<1x4x8x32xbf16>
    %89 = vector.broadcast %88 : vector<1x4x8x32xbf16> to vector<2x4x8x32xbf16>
    %90 = vector.shape_cast %89 : vector<2x4x8x32xbf16> to vector<8x8x32xbf16>
    %91 = arith.truncf %85 : vector<8x8x8xf32> to vector<8x8x8xbf16>
    "tpu.trace_start"() <{level = 10 : i32, message = "bqd,bde->bqe"}> : () -> ()
    %cst_27 = arith.constant dense<0.000000e+00> : vector<8x8x32xf32>
    %92 = tpu.matmul %91, %90, %cst_27 {dimension_numbers = #tpu.dot_dimension_numbers<[2], [1], [1], [2], [0, 0, 0, 1, 1, 2], [0], [0]>} : vector<8x8x8xbf16>, vector<8x8x32xbf16>, vector<8x8x32xf32> -> vector<8x8x32xf32>
    "tpu.trace_stop"() : () -> ()
    %93 = vector.shape_cast %92 : vector<8x8x32xf32> to vector<2x4x8x32xf32>
    %cst_28 = arith.constant dense<0.000000e+00> : vector<2x8x32xf32>
    %94 = vector.multi_reduction <add>, %93, %cst_28 [1] : vector<2x4x8x32xf32> to vector<2x8x32xf32>
    %95 = vector.shape_cast %17 : vector<1x32xf32> to vector<1x1x32xf32>
    %96 = vector.broadcast %95 : vector<1x1x32xf32> to vector<2x8x32xf32>
    %97 = arith.addf %94, %96 : vector<2x8x32xf32>
    %98 = arith.addf %3, %97 : vector<2x8x32xf32>
    %99 = vector.extract_strided_slice %5 {offsets = [1, 0], sizes = [1, 32], strides = [1, 1]} : vector<6x32xf32> to vector<1x32xf32>
    %100 = vector.extract_strided_slice %5 {offsets = [2, 0], sizes = [1, 32], strides = [1, 1]} : vector<6x32xf32> to vector<1x32xf32>
    %cst_29 = arith.constant dense<0.000000e+00> : vector<2x8xf32>
    %101 = vector.multi_reduction <add>, %98, %cst_29 [2] : vector<2x8x32xf32> to vector<2x8xf32>
    %102 = vector.shape_cast %101 : vector<2x8xf32> to vector<2x8x1xf32>
    %cst_30 = arith.constant 3.200000e+01 : f32
    %103 = vector.broadcast %cst_30 : f32 to vector<2x8x1xf32>
    %104 = arith.divf %102, %103 : vector<2x8x1xf32>
    %105 = vector.broadcast %104 : vector<2x8x1xf32> to vector<2x8x32xf32>
    %106 = arith.subf %98, %105 : vector<2x8x32xf32>
    %107 = arith.mulf %106, %106 : vector<2x8x32xf32>
    %cst_31 = arith.constant dense<0.000000e+00> : vector<2x8xf32>
    %108 = vector.multi_reduction <add>, %107, %cst_31 [2] : vector<2x8x32xf32> to vector<2x8xf32>
    %109 = vector.shape_cast %108 : vector<2x8xf32> to vector<2x8x1xf32>
    %cst_32 = arith.constant 3.200000e+01 : f32
    %110 = vector.broadcast %cst_32 : f32 to vector<2x8x1xf32>
    %111 = arith.divf %109, %110 : vector<2x8x1xf32>
    %112 = vector.broadcast %104 : vector<2x8x1xf32> to vector<2x8x32xf32>
    %113 = arith.subf %98, %112 : vector<2x8x32xf32>
    %cst_33 = arith.constant 9.99999974E-6 : f32
    %114 = vector.broadcast %cst_33 : f32 to vector<2x8x1xf32>
    %115 = arith.addf %111, %114 : vector<2x8x1xf32>
    %116 = math.rsqrt %115 : vector<2x8x1xf32>
    %117 = vector.broadcast %116 : vector<2x8x1xf32> to vector<2x8x32xf32>
    %118 = arith.mulf %113, %117 : vector<2x8x32xf32>
    %119 = vector.shape_cast %99 : vector<1x32xf32> to vector<1x1x32xf32>
    %120 = vector.broadcast %119 : vector<1x1x32xf32> to vector<2x8x32xf32>
    %121 = arith.mulf %118, %120 : vector<2x8x32xf32>
    %122 = vector.shape_cast %100 : vector<1x32xf32> to vector<1x1x32xf32>
    %123 = vector.broadcast %122 : vector<1x1x32xf32> to vector<2x8x32xf32>
    %124 = arith.addf %121, %123 : vector<2x8x32xf32>
    %125 = vector.shape_cast %124 : vector<2x8x32xf32> to vector<16x32xf32>
    %c0_34 = arith.constant 0 : index
    %c0_35 = arith.constant 0 : index
    %c0_36 = arith.constant 0 : index
    %126 = vector.load %arg8[%c0_34, %c0_35, %c0_36] : memref<1x32x64xf32, #tpu.memory_space<vmem>>, vector<1x32x64xf32>
    %127 = vector.shape_cast %126 : vector<1x32x64xf32> to vector<32x64xf32>
    %128 = arith.truncf %125 : vector<16x32xf32> to vector<16x32xbf16>
    %129 = arith.truncf %127 : vector<32x64xf32> to vector<32x64xbf16>
    %cst_37 = arith.constant dense<0.000000e+00> : vector<16x64xf32>
    %130 = tpu.matmul %128, %129, %cst_37 {dimension_numbers = #tpu.dot_dimension_numbers<[1], [0], [0], [1], [0, 0, 1, 1], [], []>} : vector<16x32xbf16>, vector<32x64xbf16>, vector<16x64xf32> -> vector<16x64xf32>
    %c0_38 = arith.constant 0 : index
    %c0_39 = arith.constant 0 : index
    %c0_40 = arith.constant 0 : index
    %131 = vector.load %arg9[%c0_38, %c0_39, %c0_40] : memref<1x1x64xf32, #tpu.memory_space<vmem>>, vector<1x1x64xf32>
    %132 = vector.shape_cast %131 : vector<1x1x64xf32> to vector<1x64xf32>
    %133 = vector.broadcast %132 : vector<1x64xf32> to vector<16x64xf32>
    %134 = arith.addf %130, %133 : vector<16x64xf32>
    %cst_41 = arith.constant 0.000000e+00 : f32
    %135 = vector.broadcast %cst_41 : f32 to vector<16x64xf32>
    %136 = arith.maximumf %134, %135 : vector<16x64xf32>
    %c0_42 = arith.constant 0 : index
    %c0_43 = arith.constant 0 : index
    %c0_44 = arith.constant 0 : index
    %137 = vector.load %arg10[%c0_42, %c0_43, %c0_44] : memref<1x64x32xf32, #tpu.memory_space<vmem>>, vector<1x64x32xf32>
    %138 = vector.shape_cast %137 : vector<1x64x32xf32> to vector<64x32xf32>
    %139 = arith.truncf %136 : vector<16x64xf32> to vector<16x64xbf16>
    %140 = arith.truncf %138 : vector<64x32xf32> to vector<64x32xbf16>
    %cst_45 = arith.constant dense<0.000000e+00> : vector<16x32xf32>
    %141 = tpu.matmul %139, %140, %cst_45 {dimension_numbers = #tpu.dot_dimension_numbers<[1], [0], [0], [1], [0, 0, 1, 1], [], []>} : vector<16x64xbf16>, vector<64x32xbf16>, vector<16x32xf32> -> vector<16x32xf32>
    %142 = vector.extract_strided_slice %5 {offsets = [3, 0], sizes = [1, 32], strides = [1, 1]} : vector<6x32xf32> to vector<1x32xf32>
    %143 = vector.broadcast %142 : vector<1x32xf32> to vector<16x32xf32>
    %144 = arith.addf %141, %143 : vector<16x32xf32>
    %145 = vector.shape_cast %144 : vector<16x32xf32> to vector<2x8x32xf32>
    %146 = arith.addf %124, %145 : vector<2x8x32xf32>
    %147 = vector.extract_strided_slice %5 {offsets = [4, 0], sizes = [1, 32], strides = [1, 1]} : vector<6x32xf32> to vector<1x32xf32>
    %148 = vector.extract_strided_slice %5 {offsets = [5, 0], sizes = [1, 32], strides = [1, 1]} : vector<6x32xf32> to vector<1x32xf32>
    %cst_46 = arith.constant dense<0.000000e+00> : vector<2x8xf32>
    %149 = vector.multi_reduction <add>, %146, %cst_46 [2] : vector<2x8x32xf32> to vector<2x8xf32>
    %150 = vector.shape_cast %149 : vector<2x8xf32> to vector<2x8x1xf32>
    %cst_47 = arith.constant 3.200000e+01 : f32
    %151 = vector.broadcast %cst_47 : f32 to vector<2x8x1xf32>
    %152 = arith.divf %150, %151 : vector<2x8x1xf32>
    %153 = vector.broadcast %152 : vector<2x8x1xf32> to vector<2x8x32xf32>
    %154 = arith.subf %146, %153 : vector<2x8x32xf32>
    %155 = arith.mulf %154, %154 : vector<2x8x32xf32>
    %cst_48 = arith.constant dense<0.000000e+00> : vector<2x8xf32>
    %156 = vector.multi_reduction <add>, %155, %cst_48 [2] : vector<2x8x32xf32> to vector<2x8xf32>
    %157 = vector.shape_cast %156 : vector<2x8xf32> to vector<2x8x1xf32>
    %cst_49 = arith.constant 3.200000e+01 : f32
    %158 = vector.broadcast %cst_49 : f32 to vector<2x8x1xf32>
    %159 = arith.divf %157, %158 : vector<2x8x1xf32>
    %160 = vector.broadcast %152 : vector<2x8x1xf32> to vector<2x8x32xf32>
    %161 = arith.subf %146, %160 : vector<2x8x32xf32>
    %cst_50 = arith.constant 9.99999974E-6 : f32
    %162 = vector.broadcast %cst_50 : f32 to vector<2x8x1xf32>
    %163 = arith.addf %159, %162 : vector<2x8x1xf32>
    %164 = math.rsqrt %163 : vector<2x8x1xf32>
    %165 = vector.broadcast %164 : vector<2x8x1xf32> to vector<2x8x32xf32>
    %166 = arith.mulf %161, %165 : vector<2x8x32xf32>
    %167 = vector.shape_cast %147 : vector<1x32xf32> to vector<1x1x32xf32>
    %168 = vector.broadcast %167 : vector<1x1x32xf32> to vector<2x8x32xf32>
    %169 = arith.mulf %166, %168 : vector<2x8x32xf32>
    %170 = vector.shape_cast %148 : vector<1x32xf32> to vector<1x1x32xf32>
    %171 = vector.broadcast %170 : vector<1x1x32xf32> to vector<2x8x32xf32>
    %172 = arith.addf %169, %171 : vector<2x8x32xf32>
    %c0_51 = arith.constant 0 : index
    %c0_52 = arith.constant 0 : index
    %c0_53 = arith.constant 0 : index
    %173 = vector.load %arg13[%c0_51, %c0_52, %c0_53] : memref<2x8x32xf32, #tpu.memory_space<vmem>>, vector<2x8x32xf32>
    tpu.vector_store %arg13[%c0_51, %c0_52, %c0_53], %172 {strides = array<i32>} : memref<2x8x32xf32, #tpu.memory_space<vmem>>, vector<2x8x32xf32>,
    %c1_i32 = arith.constant 1 : i32
    %174 = arith.cmpi eq, %arg0, %c1_i32 : i32
    %175 = arith.extui %174 : i1 to i32
    %c0_i32_54 = arith.constant 0 : i32
    %176 = arith.cmpi ne, %175, %c0_i32_54 : i32
    scf.if %176 {
      %c0_55 = arith.constant 0 : index
      %c0_56 = arith.constant 0 : index
      %177 = vector.load %arg11[%c0_55, %c0_56] : memref<2x32xf32, #tpu.memory_space<vmem>>, vector<2x32xf32>
      %178 = vector.extract_strided_slice %177 {offsets = [0, 0], sizes = [1, 32], strides = [1, 1]} : vector<2x32xf32> to vector<1x32xf32>
      %179 = vector.extract_strided_slice %177 {offsets = [1, 0], sizes = [1, 32], strides = [1, 1]} : vector<2x32xf32> to vector<1x32xf32>
      %cst_57 = arith.constant dense<0.000000e+00> : vector<2x8xf32>
      %180 = vector.multi_reduction <add>, %172, %cst_57 [2] : vector<2x8x32xf32> to vector<2x8xf32>
      %181 = vector.shape_cast %180 : vector<2x8xf32> to vector<2x8x1xf32>
      %cst_58 = arith.constant 3.200000e+01 : f32
      %182 = vector.broadcast %cst_58 : f32 to vector<2x8x1xf32>
      %183 = arith.divf %181, %182 : vector<2x8x1xf32>
      %184 = vector.broadcast %183 : vector<2x8x1xf32> to vector<2x8x32xf32>
      %185 = arith.subf %172, %184 : vector<2x8x32xf32>
      %186 = arith.mulf %185, %185 : vector<2x8x32xf32>
      %cst_59 = arith.constant dense<0.000000e+00> : vector<2x8xf32>
      %187 = vector.multi_reduction <add>, %186, %cst_59 [2] : vector<2x8x32xf32> to vector<2x8xf32>
      %188 = vector.shape_cast %187 : vector<2x8xf32> to vector<2x8x1xf32>
      %cst_60 = arith.constant 3.200000e+01 : f32
      %189 = vector.broadcast %cst_60 : f32 to vector<2x8x1xf32>
      %190 = arith.divf %188, %189 : vector<2x8x1xf32>
      %191 = vector.broadcast %183 : vector<2x8x1xf32> to vector<2x8x32xf32>
      %192 = arith.subf %172, %191 : vector<2x8x32xf32>
      %cst_61 = arith.constant 9.99999974E-6 : f32
      %193 = vector.broadcast %cst_61 : f32 to vector<2x8x1xf32>
      %194 = arith.addf %190, %193 : vector<2x8x1xf32>
      %195 = math.rsqrt %194 : vector<2x8x1xf32>
      %196 = vector.broadcast %195 : vector<2x8x1xf32> to vector<2x8x32xf32>
      %197 = arith.mulf %192, %196 : vector<2x8x32xf32>
      %198 = vector.shape_cast %178 : vector<1x32xf32> to vector<1x1x32xf32>
      %199 = vector.broadcast %198 : vector<1x1x32xf32> to vector<2x8x32xf32>
      %200 = arith.mulf %197, %199 : vector<2x8x32xf32>
      %201 = vector.shape_cast %179 : vector<1x32xf32> to vector<1x1x32xf32>
      %202 = vector.broadcast %201 : vector<1x1x32xf32> to vector<2x8x32xf32>
      %203 = arith.addf %200, %202 : vector<2x8x32xf32>
      %c0_62 = arith.constant 0 : index
      %c0_63 = arith.constant 0 : index
      %c0_64 = arith.constant 0 : index
      %204 = vector.load %arg12[%c0_62, %c0_63, %c0_64] : memref<2x8x32xf32, #tpu.memory_space<vmem>>, vector<2x8x32xf32>
      tpu.vector_store %arg12[%c0_62, %c0_63, %c0_64], %203 {strides = array<i32>} : memref<2x8x32xf32, #tpu.memory_space<vmem>>, vector<2x8x32xf32>,
    } else {
    }
    return
  }
  func.func @transform_0(%arg0: i32) -> (i32, i32, i32) {
    %c0_i32 = arith.constant 0 : i32
    %c0_i32_0 = arith.constant 0 : i32
    %c0_i32_1 = arith.constant 0 : i32
    %c0_i32_2 = arith.constant 0 : i32
    return %c0_i32, %c0_i32_0, %c0_i32_1 : i32, i32, i32
  }
  func.func @transform_1(%arg0: i32) -> (i32, i32, i32) {
    %c0_i32 = arith.constant 0 : i32
    %c0_i32_0 = arith.constant 0 : i32
    %c0_i32_1 = arith.constant 0 : i32
    %c0_i32_2 = arith.constant 0 : i32
    return %c0_i32, %c0_i32_0, %c0_i32_1 : i32, i32, i32
  }
  func.func @transform_2(%arg0: i32) -> (i32, i32, i32) {
    %c0_i32 = arith.constant 0 : i32
    %c0_i32_0 = arith.constant 0 : i32
    %c0_i32_1 = arith.constant 0 : i32
    %c0_i32_2 = arith.constant 0 : i32
    return %c0_i32, %c0_i32_0, %c0_i32_1 : i32, i32, i32
  }
  func.func @transform_3(%arg0: i32) -> (i32, i32, i32, i32) {
    %c0_i32 = arith.constant 0 : i32
    %c0_i32_0 = arith.constant 0 : i32
    %c0_i32_1 = arith.constant 0 : i32
    %c0_i32_2 = arith.constant 0 : i32
    return %arg0, %c0_i32, %c0_i32_0, %c0_i32_1 : i32, i32, i32, i32
  }
  func.func @transform_4(%arg0: i32) -> (i32, i32, i32, i32) {
    %c0_i32 = arith.constant 0 : i32
    %c0_i32_0 = arith.constant 0 : i32
    %c0_i32_1 = arith.constant 0 : i32
    %c0_i32_2 = arith.constant 0 : i32
    return %arg0, %c0_i32, %c0_i32_0, %c0_i32_1 : i32, i32, i32, i32
  }
  func.func @transform_5(%arg0: i32) -> (i32, i32, i32, i32) {
    %c0_i32 = arith.constant 0 : i32
    %c0_i32_0 = arith.constant 0 : i32
    %c0_i32_1 = arith.constant 0 : i32
    %c0_i32_2 = arith.constant 0 : i32
    return %arg0, %c0_i32, %c0_i32_0, %c0_i32_1 : i32, i32, i32, i32
  }
  func.func @transform_6(%arg0: i32) -> (i32, i32, i32) {
    %c0_i32 = arith.constant 0 : i32
    %c0_i32_0 = arith.constant 0 : i32
    %c0_i32_1 = arith.constant 0 : i32
    return %arg0, %c0_i32, %c0_i32_0 : i32, i32, i32
  }
  func.func @transform_7(%arg0: i32) -> (i32, i32, i32) {
    %c0_i32 = arith.constant 0 : i32
    %c0_i32_0 = arith.constant 0 : i32
    %c0_i32_1 = arith.constant 0 : i32
    return %arg0, %c0_i32, %c0_i32_0 : i32, i32, i32
  }
  func.func @transform_8(%arg0: i32) -> (i32, i32, i32) {
    %c0_i32 = arith.constant 0 : i32
    %c0_i32_0 = arith.constant 0 : i32
    %c0_i32_1 = arith.constant 0 : i32
    return %arg0, %c0_i32, %c0_i32_0 : i32, i32, i32
  }
  func.func @transform_9(%arg0: i32) -> (i32, i32, i32) {
    %c0_i32 = arith.constant 0 : i32
    %c0_i32_0 = arith.constant 0 : i32
    %c0_i32_1 = arith.constant 0 : i32
    return %arg0, %c0_i32, %c0_i32_0 : i32, i32, i32
  }
  func.func @transform_10(%arg0: i32) -> (i32, i32) {
    %c0_i32 = arith.constant 0 : i32
    %c0_i32_0 = arith.constant 0 : i32
    %c0_i32_1 = arith.constant 0 : i32
    return %c0_i32, %c0_i32_0 : i32, i32
  }
  func.func @transform_11(%arg0: i32) -> (i32, i32, i32) {
    %c0_i32 = arith.constant 0 : i32
    %c0_i32_0 = arith.constant 0 : i32
    %c0_i32_1 = arith.constant 0 : i32
    %c0_i32_2 = arith.constant 0 : i32
    return %c0_i32, %c0_i32_0, %c0_i32_1 : i32, i32, i32
  }
}

module attributes {stable_mosaic.version = 11 : i64} {
  func.func @_decoder_stack_kernel(%arg0: i32, %arg1: memref<2x8x32xf32, #tpu.memory_space<vmem>>, %arg2: memref<2x8x32xf32, #tpu.memory_space<vmem>>, %arg3: memref<1x8x32xf32, #tpu.memory_space<vmem>>, %arg4: memref<1x12x32x8xf32, #tpu.memory_space<vmem>>, %arg5: memref<1x12x1x8xf32, #tpu.memory_space<vmem>>, %arg6: memref<1x4x8x32xf32, #tpu.memory_space<vmem>>, %arg7: memref<1x12x32x8xf32, #tpu.memory_space<vmem>>, %arg8: memref<1x12x1x8xf32, #tpu.memory_space<vmem>>, %arg9: memref<1x4x8x32xf32, #tpu.memory_space<vmem>>, %arg10: memref<1x32x64xf32, #tpu.memory_space<vmem>>, %arg11: memref<1x1x64xf32, #tpu.memory_space<vmem>>, %arg12: memref<1x64x32xf32, #tpu.memory_space<vmem>>, %arg13: memref<1x9x32xf32, #tpu.memory_space<vmem>>, %arg14: memref<2x32xf32, #tpu.memory_space<vmem>>, %arg15: memref<32x128xf32, #tpu.memory_space<vmem>>, %arg16: memref<1x128xf32, #tpu.memory_space<vmem>>, %arg17: memref<2x8x128xf32, #tpu.memory_space<vmem>>, %arg18: memref<2x8x32xf32, #tpu.memory_space<vmem>>) attributes {dimension_semantics = [#tpu.dimension_semantics<arbitrary>], iteration_bounds = array<i64: 2>, scalar_prefetch = 0 : i64, scratch_operands = 1 : i64, tpu.core_type = #tpu.core_type<tc>, window_params = [{pipeline_mode = #tpu.pipeline_mode<synchronous>, transform_indices = @transform_0, window_bounds = array<i64: 2, 8, 32>}, {pipeline_mode = #tpu.pipeline_mode<synchronous>, transform_indices = @transform_1, window_bounds = array<i64: 2, 8, 32>}, {pipeline_mode = #tpu.pipeline_mode<synchronous>, transform_indices = @transform_2, window_bounds = array<i64: 1, 8, 32>}, {transform_indices = @transform_3, window_bounds = array<i64: 1, 12, 32, 8>}, {transform_indices = @transform_4, window_bounds = array<i64: 1, 12, 1, 8>}, {transform_indices = @transform_5, window_bounds = array<i64: 1, 4, 8, 32>}, {transform_indices = @transform_6, window_bounds = array<i64: 1, 12, 32, 8>}, {transform_indices = @transform_7, window_bounds = array<i64: 1, 12, 1, 8>}, {transform_indices = @transform_8, window_bounds = array<i64: 1, 4, 8, 32>}, {transform_indices = @transform_9, window_bounds = array<i64: 1, 32, 64>}, {transform_indices = @transform_10, window_bounds = array<i64: 1, 1, 64>}, {transform_indices = @transform_11, window_bounds = array<i64: 1, 64, 32>}, {transform_indices = @transform_12, window_bounds = array<i64: 1, 9, 32>}, {pipeline_mode = #tpu.pipeline_mode<synchronous>, transform_indices = @transform_13, window_bounds = array<i64: 2, 32>}, {pipeline_mode = #tpu.pipeline_mode<synchronous>, transform_indices = @transform_14, window_bounds = array<i64: 32, 128>}, {pipeline_mode = #tpu.pipeline_mode<synchronous>, transform_indices = @transform_15, window_bounds = array<i64: 1, 128>}, {pipeline_mode = #tpu.pipeline_mode<synchronous>, transform_indices = @transform_16, window_bounds = array<i64: 2, 8, 128>}]} {
    %c0_i32 = arith.constant 0 : i32
    %0 = arith.cmpi eq, %arg0, %c0_i32 : i32
    %1 = arith.extui %0 : i1 to i32
    %c0_i32_0 = arith.constant 0 : i32
    %2 = arith.cmpi ne, %1, %c0_i32_0 : i32
    scf.if %2 {
      %c0_83 = arith.constant 0 : index
      %c0_84 = arith.constant 0 : index
      %c0_85 = arith.constant 0 : index
      %292 = vector.load %arg1[%c0_83, %c0_84, %c0_85] : memref<2x8x32xf32, #tpu.memory_space<vmem>>, vector<2x8x32xf32>
      %c0_86 = arith.constant 0 : index
      %c0_87 = arith.constant 0 : index
      %c0_88 = arith.constant 0 : index
      %293 = vector.load %arg3[%c0_86, %c0_87, %c0_88] : memref<1x8x32xf32, #tpu.memory_space<vmem>>, vector<1x8x32xf32>
      %294 = vector.broadcast %293 : vector<1x8x32xf32> to vector<2x8x32xf32>
      %295 = arith.addf %292, %294 : vector<2x8x32xf32>
      %c0_89 = arith.constant 0 : index
      %c0_90 = arith.constant 0 : index
      %c0_91 = arith.constant 0 : index
      %296 = vector.load %arg18[%c0_89, %c0_90, %c0_91] : memref<2x8x32xf32, #tpu.memory_space<vmem>>, vector<2x8x32xf32>
      tpu.vector_store %arg18[%c0_89, %c0_90, %c0_91], %295 {strides = array<i32>} : memref<2x8x32xf32, #tpu.memory_space<vmem>>, vector<2x8x32xf32>,
    } else {
    }
    %c0 = arith.constant 0 : index
    %c0_1 = arith.constant 0 : index
    %c0_2 = arith.constant 0 : index
    %3 = vector.load %arg18[%c0, %c0_1, %c0_2] : memref<2x8x32xf32, #tpu.memory_space<vmem>>, vector<2x8x32xf32>
    %c0_3 = arith.constant 0 : index
    %c0_4 = arith.constant 0 : index
    %c0_5 = arith.constant 0 : index
    %4 = vector.load %arg2[%c0_3, %c0_4, %c0_5] : memref<2x8x32xf32, #tpu.memory_space<vmem>>, vector<2x8x32xf32>
    %c0_6 = arith.constant 0 : index
    %c0_7 = arith.constant 0 : index
    %c0_8 = arith.constant 0 : index
    %5 = vector.load %arg13[%c0_6, %c0_7, %c0_8] : memref<1x9x32xf32, #tpu.memory_space<vmem>>, vector<1x9x32xf32>
    %6 = vector.shape_cast %5 : vector<1x9x32xf32> to vector<9x32xf32>
    %7 = tpu.iota {dimensions = array<i32: 0>} : vector<8x8xi32>
    %8 = tpu.iota {dimensions = array<i32: 1>} : vector<8x8xi32>
    %9 = arith.cmpi sgt, %8, %7 : vector<8x8xi32>
    %cst = arith.constant -1.000000e+09 : f32
    %cst_9 = arith.constant 0.000000e+00 : f32
    %10 = vector.broadcast %cst : f32 to vector<8x8xf32>
    %11 = vector.broadcast %cst_9 : f32 to vector<8x8xf32>
    %12 = arith.select %9, %10, %11 : vector<8x8xi1>, vector<8x8xf32>
    %13 = vector.shape_cast %12 : vector<8x8xf32> to vector<1x8x8xf32>
    %c0_10 = arith.constant 0 : index
    %c0_11 = arith.constant 0 : index
    %c0_12 = arith.constant 0 : index
    %c0_13 = arith.constant 0 : index
    %14 = vector.load %arg4[%c0_10, %c0_11, %c0_12, %c0_13] : memref<1x12x32x8xf32, #tpu.memory_space<vmem>>, vector<1x12x32x8xf32>
    %15 = vector.shape_cast %14 : vector<1x12x32x8xf32> to vector<12x32x8xf32>
    %c0_14 = arith.constant 0 : index
    %c0_15 = arith.constant 0 : index
    %c0_16 = arith.constant 0 : index
    %c0_17 = arith.constant 0 : index
    %16 = vector.load %arg5[%c0_14, %c0_15, %c0_16, %c0_17] : memref<1x12x1x8xf32, #tpu.memory_space<vmem>>, vector<1x12x1x8xf32>
    %17 = vector.shape_cast %16 : vector<1x12x1x8xf32> to vector<12x1x8xf32>
    %c0_18 = arith.constant 0 : index
    %c0_19 = arith.constant 0 : index
    %c0_20 = arith.constant 0 : index
    %c0_21 = arith.constant 0 : index
    %18 = vector.load %arg6[%c0_18, %c0_19, %c0_20, %c0_21] : memref<1x4x8x32xf32, #tpu.memory_space<vmem>>, vector<1x4x8x32xf32>
    %19 = vector.shape_cast %18 : vector<1x4x8x32xf32> to vector<4x8x32xf32>
    %20 = vector.extract_strided_slice %6 {offsets = [0, 0], sizes = [1, 32], strides = [1, 1]} : vector<9x32xf32> to vector<1x32xf32>
    %21 = arith.truncf %3 : vector<2x8x32xf32> to vector<2x8x32xbf16>
    %22 = vector.shape_cast %21 : vector<2x8x32xbf16> to vector<2x1x8x32xbf16>
    %23 = vector.shape_cast %22 : vector<2x1x8x32xbf16> to vector<2x1x8x32xbf16>
    %24 = vector.broadcast %23 : vector<2x1x8x32xbf16> to vector<2x4x8x32xbf16>
    %25 = vector.shape_cast %24 : vector<2x4x8x32xbf16> to vector<8x8x32xbf16>
    %26 = arith.truncf %3 : vector<2x8x32xf32> to vector<2x8x32xbf16>
    %27 = vector.shape_cast %26 : vector<2x8x32xbf16> to vector<2x1x8x32xbf16>
    %28 = vector.shape_cast %27 : vector<2x1x8x32xbf16> to vector<2x1x8x32xbf16>
    %29 = vector.broadcast %28 : vector<2x1x8x32xbf16> to vector<2x4x8x32xbf16>
    %30 = vector.shape_cast %29 : vector<2x4x8x32xbf16> to vector<8x8x32xbf16>
    %31 = arith.truncf %15 : vector<12x32x8xf32> to vector<12x32x8xbf16>
    %32 = vector.extract_strided_slice %31 {offsets = [0, 0, 0], sizes = [4, 32, 8], strides = [1, 1, 1]} : vector<12x32x8xbf16> to vector<4x32x8xbf16>
    %33 = vector.extract_strided_slice %17 {offsets = [0, 0, 0], sizes = [4, 1, 8], strides = [1, 1, 1]} : vector<12x1x8xf32> to vector<4x1x8xf32>
    %34 = vector.shape_cast %32 : vector<4x32x8xbf16> to vector<1x4x32x8xbf16>
    %35 = vector.shape_cast %34 : vector<1x4x32x8xbf16> to vector<1x4x32x8xbf16>
    %36 = vector.broadcast %35 : vector<1x4x32x8xbf16> to vector<2x4x32x8xbf16>
    %37 = vector.shape_cast %36 : vector<2x4x32x8xbf16> to vector<8x32x8xbf16>
    %38 = vector.shape_cast %33 : vector<4x1x8xf32> to vector<1x4x1x8xf32>
    %39 = vector.shape_cast %38 : vector<1x4x1x8xf32> to vector<1x4x1x8xf32>
    %40 = vector.broadcast %39 : vector<1x4x1x8xf32> to vector<2x4x1x8xf32>
    %41 = vector.shape_cast %40 : vector<2x4x1x8xf32> to vector<8x1x8xf32>
    "tpu.trace_start"() <{level = 10 : i32, message = "ble,bed->bld"}> : () -> ()
    %cst_22 = arith.constant dense<0.000000e+00> : vector<8x8x8xf32>
    %42 = tpu.matmul %25, %37, %cst_22 {dimension_numbers = #tpu.dot_dimension_numbers<[2], [1], [1], [2], [0, 0, 0, 1, 1, 2], [0], [0]>} : vector<8x8x32xbf16>, vector<8x32x8xbf16>, vector<8x8x8xf32> -> vector<8x8x8xf32>
    "tpu.trace_stop"() : () -> ()
    %43 = vector.broadcast %41 : vector<8x1x8xf32> to vector<8x8x8xf32>
    %44 = arith.addf %42, %43 : vector<8x8x8xf32>
    %45 = vector.extract_strided_slice %31 {offsets = [4, 0, 0], sizes = [4, 32, 8], strides = [1, 1, 1]} : vector<12x32x8xbf16> to vector<4x32x8xbf16>
    %46 = vector.extract_strided_slice %17 {offsets = [4, 0, 0], sizes = [4, 1, 8], strides = [1, 1, 1]} : vector<12x1x8xf32> to vector<4x1x8xf32>
    %47 = vector.shape_cast %45 : vector<4x32x8xbf16> to vector<1x4x32x8xbf16>
    %48 = vector.shape_cast %47 : vector<1x4x32x8xbf16> to vector<1x4x32x8xbf16>
    %49 = vector.broadcast %48 : vector<1x4x32x8xbf16> to vector<2x4x32x8xbf16>
    %50 = vector.shape_cast %49 : vector<2x4x32x8xbf16> to vector<8x32x8xbf16>
    %51 = vector.shape_cast %46 : vector<4x1x8xf32> to vector<1x4x1x8xf32>
    %52 = vector.shape_cast %51 : vector<1x4x1x8xf32> to vector<1x4x1x8xf32>
    %53 = vector.broadcast %52 : vector<1x4x1x8xf32> to vector<2x4x1x8xf32>
    %54 = vector.shape_cast %53 : vector<2x4x1x8xf32> to vector<8x1x8xf32>
    "tpu.trace_start"() <{level = 10 : i32, message = "ble,bed->bld"}> : () -> ()
    %cst_23 = arith.constant dense<0.000000e+00> : vector<8x8x8xf32>
    %55 = tpu.matmul %30, %50, %cst_23 {dimension_numbers = #tpu.dot_dimension_numbers<[2], [1], [1], [2], [0, 0, 0, 1, 1, 2], [0], [0]>} : vector<8x8x32xbf16>, vector<8x32x8xbf16>, vector<8x8x8xf32> -> vector<8x8x8xf32>
    "tpu.trace_stop"() : () -> ()
    %56 = vector.broadcast %54 : vector<8x1x8xf32> to vector<8x8x8xf32>
    %57 = arith.addf %55, %56 : vector<8x8x8xf32>
    %58 = vector.extract_strided_slice %31 {offsets = [8, 0, 0], sizes = [4, 32, 8], strides = [1, 1, 1]} : vector<12x32x8xbf16> to vector<4x32x8xbf16>
    %59 = vector.extract_strided_slice %17 {offsets = [8, 0, 0], sizes = [4, 1, 8], strides = [1, 1, 1]} : vector<12x1x8xf32> to vector<4x1x8xf32>
    %60 = vector.shape_cast %58 : vector<4x32x8xbf16> to vector<1x4x32x8xbf16>
    %61 = vector.shape_cast %60 : vector<1x4x32x8xbf16> to vector<1x4x32x8xbf16>
    %62 = vector.broadcast %61 : vector<1x4x32x8xbf16> to vector<2x4x32x8xbf16>
    %63 = vector.shape_cast %62 : vector<2x4x32x8xbf16> to vector<8x32x8xbf16>
    %64 = vector.shape_cast %59 : vector<4x1x8xf32> to vector<1x4x1x8xf32>
    %65 = vector.shape_cast %64 : vector<1x4x1x8xf32> to vector<1x4x1x8xf32>
    %66 = vector.broadcast %65 : vector<1x4x1x8xf32> to vector<2x4x1x8xf32>
    %67 = vector.shape_cast %66 : vector<2x4x1x8xf32> to vector<8x1x8xf32>
    "tpu.trace_start"() <{level = 10 : i32, message = "ble,bed->bld"}> : () -> ()
    %cst_24 = arith.constant dense<0.000000e+00> : vector<8x8x8xf32>
    %68 = tpu.matmul %30, %63, %cst_24 {dimension_numbers = #tpu.dot_dimension_numbers<[2], [1], [1], [2], [0, 0, 0, 1, 1, 2], [0], [0]>} : vector<8x8x32xbf16>, vector<8x32x8xbf16>, vector<8x8x8xf32> -> vector<8x8x8xf32>
    "tpu.trace_stop"() : () -> ()
    %69 = vector.broadcast %67 : vector<8x1x8xf32> to vector<8x8x8xf32>
    %70 = arith.addf %68, %69 : vector<8x8x8xf32>
    %71 = arith.truncf %44 : vector<8x8x8xf32> to vector<8x8x8xbf16>
    %72 = arith.truncf %57 : vector<8x8x8xf32> to vector<8x8x8xbf16>
    "tpu.trace_start"() <{level = 10 : i32, message = "bqd,bkd->bqk"}> : () -> ()
    %cst_25 = arith.constant dense<0.000000e+00> : vector<8x8x8xf32>
    %73 = tpu.matmul %71, %72, %cst_25 {dimension_numbers = #tpu.dot_dimension_numbers<[2], [2], [1], [1], [0, 0, 0, 1, 1, 1], [0], [0]>} : vector<8x8x8xbf16>, vector<8x8x8xbf16>, vector<8x8x8xf32> -> vector<8x8x8xf32>
    "tpu.trace_stop"() : () -> ()
    %74 = vector.broadcast %13 : vector<1x8x8xf32> to vector<8x8x8xf32>
    %75 = arith.addf %73, %74 : vector<8x8x8xf32>
    %cst_26 = arith.constant dense<0xFF800000> : vector<8x8xf32>
    %76 = vector.multi_reduction <maximumf>, %75, %cst_26 [2] : vector<8x8x8xf32> to vector<8x8xf32>
    %77 = vector.shape_cast %76 : vector<8x8xf32> to vector<8x8x1xf32>
    %78 = vector.broadcast %77 : vector<8x8x1xf32> to vector<8x8x8xf32>
    %79 = arith.subf %75, %78 : vector<8x8x8xf32>
    %80 = math.exp %79 : vector<8x8x8xf32>
    %cst_27 = arith.constant dense<0.000000e+00> : vector<8x8xf32>
    %81 = vector.multi_reduction <add>, %80, %cst_27 [2] : vector<8x8x8xf32> to vector<8x8xf32>
    %82 = vector.shape_cast %81 : vector<8x8xf32> to vector<8x8x1xf32>
    %83 = tpu.reciprocal %82 {approx = true} : vector<8x8x1xf32> -> vector<8x8x1xf32>
    %84 = vector.broadcast %83 : vector<8x8x1xf32> to vector<8x8x8xf32>
    %85 = arith.mulf %80, %84 : vector<8x8x8xf32>
    %86 = arith.truncf %85 : vector<8x8x8xf32> to vector<8x8x8xbf16>
    %87 = arith.truncf %70 : vector<8x8x8xf32> to vector<8x8x8xbf16>
    "tpu.trace_start"() <{level = 10 : i32, message = "bqk,bkd->bqd"}> : () -> ()
    %cst_28 = arith.constant dense<0.000000e+00> : vector<8x8x8xf32>
    %88 = tpu.matmul %86, %87, %cst_28 {dimension_numbers = #tpu.dot_dimension_numbers<[2], [1], [1], [2], [0, 0, 0, 1, 1, 2], [0], [0]>} : vector<8x8x8xbf16>, vector<8x8x8xbf16>, vector<8x8x8xf32> -> vector<8x8x8xf32>
    "tpu.trace_stop"() : () -> ()
    %89 = arith.truncf %19 : vector<4x8x32xf32> to vector<4x8x32xbf16>
    %90 = vector.shape_cast %89 : vector<4x8x32xbf16> to vector<1x4x8x32xbf16>
    %91 = vector.shape_cast %90 : vector<1x4x8x32xbf16> to vector<1x4x8x32xbf16>
    %92 = vector.broadcast %91 : vector<1x4x8x32xbf16> to vector<2x4x8x32xbf16>
    %93 = vector.shape_cast %92 : vector<2x4x8x32xbf16> to vector<8x8x32xbf16>
    %94 = arith.truncf %88 : vector<8x8x8xf32> to vector<8x8x8xbf16>
    "tpu.trace_start"() <{level = 10 : i32, message = "bqd,bde->bqe"}> : () -> ()
    %cst_29 = arith.constant dense<0.000000e+00> : vector<8x8x32xf32>
    %95 = tpu.matmul %94, %93, %cst_29 {dimension_numbers = #tpu.dot_dimension_numbers<[2], [1], [1], [2], [0, 0, 0, 1, 1, 2], [0], [0]>} : vector<8x8x8xbf16>, vector<8x8x32xbf16>, vector<8x8x32xf32> -> vector<8x8x32xf32>
    "tpu.trace_stop"() : () -> ()
    %96 = vector.shape_cast %95 : vector<8x8x32xf32> to vector<2x4x8x32xf32>
    %cst_30 = arith.constant dense<0.000000e+00> : vector<2x8x32xf32>
    %97 = vector.multi_reduction <add>, %96, %cst_30 [1] : vector<2x4x8x32xf32> to vector<2x8x32xf32>
    %98 = vector.shape_cast %20 : vector<1x32xf32> to vector<1x1x32xf32>
    %99 = vector.broadcast %98 : vector<1x1x32xf32> to vector<2x8x32xf32>
    %100 = arith.addf %97, %99 : vector<2x8x32xf32>
    %101 = arith.addf %3, %100 : vector<2x8x32xf32>
    %102 = vector.extract_strided_slice %6 {offsets = [1, 0], sizes = [1, 32], strides = [1, 1]} : vector<9x32xf32> to vector<1x32xf32>
    %103 = vector.extract_strided_slice %6 {offsets = [2, 0], sizes = [1, 32], strides = [1, 1]} : vector<9x32xf32> to vector<1x32xf32>
    %cst_31 = arith.constant dense<0.000000e+00> : vector<2x8xf32>
    %104 = vector.multi_reduction <add>, %101, %cst_31 [2] : vector<2x8x32xf32> to vector<2x8xf32>
    %105 = vector.shape_cast %104 : vector<2x8xf32> to vector<2x8x1xf32>
    %cst_32 = arith.constant 3.200000e+01 : f32
    %106 = vector.broadcast %cst_32 : f32 to vector<2x8x1xf32>
    %107 = arith.divf %105, %106 : vector<2x8x1xf32>
    %108 = vector.broadcast %107 : vector<2x8x1xf32> to vector<2x8x32xf32>
    %109 = arith.subf %101, %108 : vector<2x8x32xf32>
    %110 = arith.mulf %109, %109 : vector<2x8x32xf32>
    %cst_33 = arith.constant dense<0.000000e+00> : vector<2x8xf32>
    %111 = vector.multi_reduction <add>, %110, %cst_33 [2] : vector<2x8x32xf32> to vector<2x8xf32>
    %112 = vector.shape_cast %111 : vector<2x8xf32> to vector<2x8x1xf32>
    %cst_34 = arith.constant 3.200000e+01 : f32
    %113 = vector.broadcast %cst_34 : f32 to vector<2x8x1xf32>
    %114 = arith.divf %112, %113 : vector<2x8x1xf32>
    %115 = vector.broadcast %107 : vector<2x8x1xf32> to vector<2x8x32xf32>
    %116 = arith.subf %101, %115 : vector<2x8x32xf32>
    %cst_35 = arith.constant 9.99999974E-6 : f32
    %117 = vector.broadcast %cst_35 : f32 to vector<2x8x1xf32>
    %118 = arith.addf %114, %117 : vector<2x8x1xf32>
    %119 = math.rsqrt %118 : vector<2x8x1xf32>
    %120 = vector.broadcast %119 : vector<2x8x1xf32> to vector<2x8x32xf32>
    %121 = arith.mulf %116, %120 : vector<2x8x32xf32>
    %122 = vector.shape_cast %102 : vector<1x32xf32> to vector<1x1x32xf32>
    %123 = vector.broadcast %122 : vector<1x1x32xf32> to vector<2x8x32xf32>
    %124 = arith.mulf %121, %123 : vector<2x8x32xf32>
    %125 = vector.shape_cast %103 : vector<1x32xf32> to vector<1x1x32xf32>
    %126 = vector.broadcast %125 : vector<1x1x32xf32> to vector<2x8x32xf32>
    %127 = arith.addf %124, %126 : vector<2x8x32xf32>
    %c0_36 = arith.constant 0 : index
    %c0_37 = arith.constant 0 : index
    %c0_38 = arith.constant 0 : index
    %c0_39 = arith.constant 0 : index
    %128 = vector.load %arg7[%c0_36, %c0_37, %c0_38, %c0_39] : memref<1x12x32x8xf32, #tpu.memory_space<vmem>>, vector<1x12x32x8xf32>
    %129 = vector.shape_cast %128 : vector<1x12x32x8xf32> to vector<12x32x8xf32>
    %c0_40 = arith.constant 0 : index
    %c0_41 = arith.constant 0 : index
    %c0_42 = arith.constant 0 : index
    %c0_43 = arith.constant 0 : index
    %130 = vector.load %arg8[%c0_40, %c0_41, %c0_42, %c0_43] : memref<1x12x1x8xf32, #tpu.memory_space<vmem>>, vector<1x12x1x8xf32>
    %131 = vector.shape_cast %130 : vector<1x12x1x8xf32> to vector<12x1x8xf32>
    %c0_44 = arith.constant 0 : index
    %c0_45 = arith.constant 0 : index
    %c0_46 = arith.constant 0 : index
    %c0_47 = arith.constant 0 : index
    %132 = vector.load %arg9[%c0_44, %c0_45, %c0_46, %c0_47] : memref<1x4x8x32xf32, #tpu.memory_space<vmem>>, vector<1x4x8x32xf32>
    %133 = vector.shape_cast %132 : vector<1x4x8x32xf32> to vector<4x8x32xf32>
    %134 = vector.extract_strided_slice %6 {offsets = [3, 0], sizes = [1, 32], strides = [1, 1]} : vector<9x32xf32> to vector<1x32xf32>
    %135 = arith.truncf %127 : vector<2x8x32xf32> to vector<2x8x32xbf16>
    %136 = vector.shape_cast %135 : vector<2x8x32xbf16> to vector<2x1x8x32xbf16>
    %137 = vector.shape_cast %136 : vector<2x1x8x32xbf16> to vector<2x1x8x32xbf16>
    %138 = vector.broadcast %137 : vector<2x1x8x32xbf16> to vector<2x4x8x32xbf16>
    %139 = vector.shape_cast %138 : vector<2x4x8x32xbf16> to vector<8x8x32xbf16>
    %140 = arith.truncf %4 : vector<2x8x32xf32> to vector<2x8x32xbf16>
    %141 = vector.shape_cast %140 : vector<2x8x32xbf16> to vector<2x1x8x32xbf16>
    %142 = vector.shape_cast %141 : vector<2x1x8x32xbf16> to vector<2x1x8x32xbf16>
    %143 = vector.broadcast %142 : vector<2x1x8x32xbf16> to vector<2x4x8x32xbf16>
    %144 = vector.shape_cast %143 : vector<2x4x8x32xbf16> to vector<8x8x32xbf16>
    %145 = arith.truncf %129 : vector<12x32x8xf32> to vector<12x32x8xbf16>
    %146 = vector.extract_strided_slice %145 {offsets = [0, 0, 0], sizes = [4, 32, 8], strides = [1, 1, 1]} : vector<12x32x8xbf16> to vector<4x32x8xbf16>
    %147 = vector.extract_strided_slice %131 {offsets = [0, 0, 0], sizes = [4, 1, 8], strides = [1, 1, 1]} : vector<12x1x8xf32> to vector<4x1x8xf32>
    %148 = vector.shape_cast %146 : vector<4x32x8xbf16> to vector<1x4x32x8xbf16>
    %149 = vector.shape_cast %148 : vector<1x4x32x8xbf16> to vector<1x4x32x8xbf16>
    %150 = vector.broadcast %149 : vector<1x4x32x8xbf16> to vector<2x4x32x8xbf16>
    %151 = vector.shape_cast %150 : vector<2x4x32x8xbf16> to vector<8x32x8xbf16>
    %152 = vector.shape_cast %147 : vector<4x1x8xf32> to vector<1x4x1x8xf32>
    %153 = vector.shape_cast %152 : vector<1x4x1x8xf32> to vector<1x4x1x8xf32>
    %154 = vector.broadcast %153 : vector<1x4x1x8xf32> to vector<2x4x1x8xf32>
    %155 = vector.shape_cast %154 : vector<2x4x1x8xf32> to vector<8x1x8xf32>
    "tpu.trace_start"() <{level = 10 : i32, message = "ble,bed->bld"}> : () -> ()
    %cst_48 = arith.constant dense<0.000000e+00> : vector<8x8x8xf32>
    %156 = tpu.matmul %139, %151, %cst_48 {dimension_numbers = #tpu.dot_dimension_numbers<[2], [1], [1], [2], [0, 0, 0, 1, 1, 2], [0], [0]>} : vector<8x8x32xbf16>, vector<8x32x8xbf16>, vector<8x8x8xf32> -> vector<8x8x8xf32>
    "tpu.trace_stop"() : () -> ()
    %157 = vector.broadcast %155 : vector<8x1x8xf32> to vector<8x8x8xf32>
    %158 = arith.addf %156, %157 : vector<8x8x8xf32>
    %159 = vector.extract_strided_slice %145 {offsets = [4, 0, 0], sizes = [4, 32, 8], strides = [1, 1, 1]} : vector<12x32x8xbf16> to vector<4x32x8xbf16>
    %160 = vector.extract_strided_slice %131 {offsets = [4, 0, 0], sizes = [4, 1, 8], strides = [1, 1, 1]} : vector<12x1x8xf32> to vector<4x1x8xf32>
    %161 = vector.shape_cast %159 : vector<4x32x8xbf16> to vector<1x4x32x8xbf16>
    %162 = vector.shape_cast %161 : vector<1x4x32x8xbf16> to vector<1x4x32x8xbf16>
    %163 = vector.broadcast %162 : vector<1x4x32x8xbf16> to vector<2x4x32x8xbf16>
    %164 = vector.shape_cast %163 : vector<2x4x32x8xbf16> to vector<8x32x8xbf16>
    %165 = vector.shape_cast %160 : vector<4x1x8xf32> to vector<1x4x1x8xf32>
    %166 = vector.shape_cast %165 : vector<1x4x1x8xf32> to vector<1x4x1x8xf32>
    %167 = vector.broadcast %166 : vector<1x4x1x8xf32> to vector<2x4x1x8xf32>
    %168 = vector.shape_cast %167 : vector<2x4x1x8xf32> to vector<8x1x8xf32>
    "tpu.trace_start"() <{level = 10 : i32, message = "ble,bed->bld"}> : () -> ()
    %cst_49 = arith.constant dense<0.000000e+00> : vector<8x8x8xf32>
    %169 = tpu.matmul %144, %164, %cst_49 {dimension_numbers = #tpu.dot_dimension_numbers<[2], [1], [1], [2], [0, 0, 0, 1, 1, 2], [0], [0]>} : vector<8x8x32xbf16>, vector<8x32x8xbf16>, vector<8x8x8xf32> -> vector<8x8x8xf32>
    "tpu.trace_stop"() : () -> ()
    %170 = vector.broadcast %168 : vector<8x1x8xf32> to vector<8x8x8xf32>
    %171 = arith.addf %169, %170 : vector<8x8x8xf32>
    %172 = vector.extract_strided_slice %145 {offsets = [8, 0, 0], sizes = [4, 32, 8], strides = [1, 1, 1]} : vector<12x32x8xbf16> to vector<4x32x8xbf16>
    %173 = vector.extract_strided_slice %131 {offsets = [8, 0, 0], sizes = [4, 1, 8], strides = [1, 1, 1]} : vector<12x1x8xf32> to vector<4x1x8xf32>
    %174 = vector.shape_cast %172 : vector<4x32x8xbf16> to vector<1x4x32x8xbf16>
    %175 = vector.shape_cast %174 : vector<1x4x32x8xbf16> to vector<1x4x32x8xbf16>
    %176 = vector.broadcast %175 : vector<1x4x32x8xbf16> to vector<2x4x32x8xbf16>
    %177 = vector.shape_cast %176 : vector<2x4x32x8xbf16> to vector<8x32x8xbf16>
    %178 = vector.shape_cast %173 : vector<4x1x8xf32> to vector<1x4x1x8xf32>
    %179 = vector.shape_cast %178 : vector<1x4x1x8xf32> to vector<1x4x1x8xf32>
    %180 = vector.broadcast %179 : vector<1x4x1x8xf32> to vector<2x4x1x8xf32>
    %181 = vector.shape_cast %180 : vector<2x4x1x8xf32> to vector<8x1x8xf32>
    "tpu.trace_start"() <{level = 10 : i32, message = "ble,bed->bld"}> : () -> ()
    %cst_50 = arith.constant dense<0.000000e+00> : vector<8x8x8xf32>
    %182 = tpu.matmul %144, %177, %cst_50 {dimension_numbers = #tpu.dot_dimension_numbers<[2], [1], [1], [2], [0, 0, 0, 1, 1, 2], [0], [0]>} : vector<8x8x32xbf16>, vector<8x32x8xbf16>, vector<8x8x8xf32> -> vector<8x8x8xf32>
    "tpu.trace_stop"() : () -> ()
    %183 = vector.broadcast %181 : vector<8x1x8xf32> to vector<8x8x8xf32>
    %184 = arith.addf %182, %183 : vector<8x8x8xf32>
    %185 = arith.truncf %158 : vector<8x8x8xf32> to vector<8x8x8xbf16>
    %186 = arith.truncf %171 : vector<8x8x8xf32> to vector<8x8x8xbf16>
    "tpu.trace_start"() <{level = 10 : i32, message = "bqd,bkd->bqk"}> : () -> ()
    %cst_51 = arith.constant dense<0.000000e+00> : vector<8x8x8xf32>
    %187 = tpu.matmul %185, %186, %cst_51 {dimension_numbers = #tpu.dot_dimension_numbers<[2], [2], [1], [1], [0, 0, 0, 1, 1, 1], [0], [0]>} : vector<8x8x8xbf16>, vector<8x8x8xbf16>, vector<8x8x8xf32> -> vector<8x8x8xf32>
    "tpu.trace_stop"() : () -> ()
    %cst_52 = arith.constant dense<0xFF800000> : vector<8x8xf32>
    %188 = vector.multi_reduction <maximumf>, %187, %cst_52 [2] : vector<8x8x8xf32> to vector<8x8xf32>
    %189 = vector.shape_cast %188 : vector<8x8xf32> to vector<8x8x1xf32>
    %190 = vector.broadcast %189 : vector<8x8x1xf32> to vector<8x8x8xf32>
    %191 = arith.subf %187, %190 : vector<8x8x8xf32>
    %192 = math.exp %191 : vector<8x8x8xf32>
    %cst_53 = arith.constant dense<0.000000e+00> : vector<8x8xf32>
    %193 = vector.multi_reduction <add>, %192, %cst_53 [2] : vector<8x8x8xf32> to vector<8x8xf32>
    %194 = vector.shape_cast %193 : vector<8x8xf32> to vector<8x8x1xf32>
    %195 = tpu.reciprocal %194 {approx = true} : vector<8x8x1xf32> -> vector<8x8x1xf32>
    %196 = vector.broadcast %195 : vector<8x8x1xf32> to vector<8x8x8xf32>
    %197 = arith.mulf %192, %196 : vector<8x8x8xf32>
    %198 = arith.truncf %197 : vector<8x8x8xf32> to vector<8x8x8xbf16>
    %199 = arith.truncf %184 : vector<8x8x8xf32> to vector<8x8x8xbf16>
    "tpu.trace_start"() <{level = 10 : i32, message = "bqk,bkd->bqd"}> : () -> ()
    %cst_54 = arith.constant dense<0.000000e+00> : vector<8x8x8xf32>
    %200 = tpu.matmul %198, %199, %cst_54 {dimension_numbers = #tpu.dot_dimension_numbers<[2], [1], [1], [2], [0, 0, 0, 1, 1, 2], [0], [0]>} : vector<8x8x8xbf16>, vector<8x8x8xbf16>, vector<8x8x8xf32> -> vector<8x8x8xf32>
    "tpu.trace_stop"() : () -> ()
    %201 = arith.truncf %133 : vector<4x8x32xf32> to vector<4x8x32xbf16>
    %202 = vector.shape_cast %201 : vector<4x8x32xbf16> to vector<1x4x8x32xbf16>
    %203 = vector.shape_cast %202 : vector<1x4x8x32xbf16> to vector<1x4x8x32xbf16>
    %204 = vector.broadcast %203 : vector<1x4x8x32xbf16> to vector<2x4x8x32xbf16>
    %205 = vector.shape_cast %204 : vector<2x4x8x32xbf16> to vector<8x8x32xbf16>
    %206 = arith.truncf %200 : vector<8x8x8xf32> to vector<8x8x8xbf16>
    "tpu.trace_start"() <{level = 10 : i32, message = "bqd,bde->bqe"}> : () -> ()
    %cst_55 = arith.constant dense<0.000000e+00> : vector<8x8x32xf32>
    %207 = tpu.matmul %206, %205, %cst_55 {dimension_numbers = #tpu.dot_dimension_numbers<[2], [1], [1], [2], [0, 0, 0, 1, 1, 2], [0], [0]>} : vector<8x8x8xbf16>, vector<8x8x32xbf16>, vector<8x8x32xf32> -> vector<8x8x32xf32>
    "tpu.trace_stop"() : () -> ()
    %208 = vector.shape_cast %207 : vector<8x8x32xf32> to vector<2x4x8x32xf32>
    %cst_56 = arith.constant dense<0.000000e+00> : vector<2x8x32xf32>
    %209 = vector.multi_reduction <add>, %208, %cst_56 [1] : vector<2x4x8x32xf32> to vector<2x8x32xf32>
    %210 = vector.shape_cast %134 : vector<1x32xf32> to vector<1x1x32xf32>
    %211 = vector.broadcast %210 : vector<1x1x32xf32> to vector<2x8x32xf32>
    %212 = arith.addf %209, %211 : vector<2x8x32xf32>
    %213 = arith.addf %127, %212 : vector<2x8x32xf32>
    %214 = vector.extract_strided_slice %6 {offsets = [4, 0], sizes = [1, 32], strides = [1, 1]} : vector<9x32xf32> to vector<1x32xf32>
    %215 = vector.extract_strided_slice %6 {offsets = [5, 0], sizes = [1, 32], strides = [1, 1]} : vector<9x32xf32> to vector<1x32xf32>
    %cst_57 = arith.constant dense<0.000000e+00> : vector<2x8xf32>
    %216 = vector.multi_reduction <add>, %213, %cst_57 [2] : vector<2x8x32xf32> to vector<2x8xf32>
    %217 = vector.shape_cast %216 : vector<2x8xf32> to vector<2x8x1xf32>
    %cst_58 = arith.constant 3.200000e+01 : f32
    %218 = vector.broadcast %cst_58 : f32 to vector<2x8x1xf32>
    %219 = arith.divf %217, %218 : vector<2x8x1xf32>
    %220 = vector.broadcast %219 : vector<2x8x1xf32> to vector<2x8x32xf32>
    %221 = arith.subf %213, %220 : vector<2x8x32xf32>
    %222 = arith.mulf %221, %221 : vector<2x8x32xf32>
    %cst_59 = arith.constant dense<0.000000e+00> : vector<2x8xf32>
    %223 = vector.multi_reduction <add>, %222, %cst_59 [2] : vector<2x8x32xf32> to vector<2x8xf32>
    %224 = vector.shape_cast %223 : vector<2x8xf32> to vector<2x8x1xf32>
    %cst_60 = arith.constant 3.200000e+01 : f32
    %225 = vector.broadcast %cst_60 : f32 to vector<2x8x1xf32>
    %226 = arith.divf %224, %225 : vector<2x8x1xf32>
    %227 = vector.broadcast %219 : vector<2x8x1xf32> to vector<2x8x32xf32>
    %228 = arith.subf %213, %227 : vector<2x8x32xf32>
    %cst_61 = arith.constant 9.99999974E-6 : f32
    %229 = vector.broadcast %cst_61 : f32 to vector<2x8x1xf32>
    %230 = arith.addf %226, %229 : vector<2x8x1xf32>
    %231 = math.rsqrt %230 : vector<2x8x1xf32>
    %232 = vector.broadcast %231 : vector<2x8x1xf32> to vector<2x8x32xf32>
    %233 = arith.mulf %228, %232 : vector<2x8x32xf32>
    %234 = vector.shape_cast %214 : vector<1x32xf32> to vector<1x1x32xf32>
    %235 = vector.broadcast %234 : vector<1x1x32xf32> to vector<2x8x32xf32>
    %236 = arith.mulf %233, %235 : vector<2x8x32xf32>
    %237 = vector.shape_cast %215 : vector<1x32xf32> to vector<1x1x32xf32>
    %238 = vector.broadcast %237 : vector<1x1x32xf32> to vector<2x8x32xf32>
    %239 = arith.addf %236, %238 : vector<2x8x32xf32>
    %240 = vector.shape_cast %239 : vector<2x8x32xf32> to vector<16x32xf32>
    %c0_62 = arith.constant 0 : index
    %c0_63 = arith.constant 0 : index
    %c0_64 = arith.constant 0 : index
    %241 = vector.load %arg10[%c0_62, %c0_63, %c0_64] : memref<1x32x64xf32, #tpu.memory_space<vmem>>, vector<1x32x64xf32>
    %242 = vector.shape_cast %241 : vector<1x32x64xf32> to vector<32x64xf32>
    %243 = arith.truncf %240 : vector<16x32xf32> to vector<16x32xbf16>
    %244 = arith.truncf %242 : vector<32x64xf32> to vector<32x64xbf16>
    %cst_65 = arith.constant dense<0.000000e+00> : vector<16x64xf32>
    %245 = tpu.matmul %243, %244, %cst_65 {dimension_numbers = #tpu.dot_dimension_numbers<[1], [0], [0], [1], [0, 0, 1, 1], [], []>} : vector<16x32xbf16>, vector<32x64xbf16>, vector<16x64xf32> -> vector<16x64xf32>
    %c0_66 = arith.constant 0 : index
    %c0_67 = arith.constant 0 : index
    %c0_68 = arith.constant 0 : index
    %246 = vector.load %arg11[%c0_66, %c0_67, %c0_68] : memref<1x1x64xf32, #tpu.memory_space<vmem>>, vector<1x1x64xf32>
    %247 = vector.shape_cast %246 : vector<1x1x64xf32> to vector<1x64xf32>
    %248 = vector.broadcast %247 : vector<1x64xf32> to vector<16x64xf32>
    %249 = arith.addf %245, %248 : vector<16x64xf32>
    %cst_69 = arith.constant 0.000000e+00 : f32
    %250 = vector.broadcast %cst_69 : f32 to vector<16x64xf32>
    %251 = arith.maximumf %249, %250 : vector<16x64xf32>
    %c0_70 = arith.constant 0 : index
    %c0_71 = arith.constant 0 : index
    %c0_72 = arith.constant 0 : index
    %252 = vector.load %arg12[%c0_70, %c0_71, %c0_72] : memref<1x64x32xf32, #tpu.memory_space<vmem>>, vector<1x64x32xf32>
    %253 = vector.shape_cast %252 : vector<1x64x32xf32> to vector<64x32xf32>
    %254 = arith.truncf %251 : vector<16x64xf32> to vector<16x64xbf16>
    %255 = arith.truncf %253 : vector<64x32xf32> to vector<64x32xbf16>
    %cst_73 = arith.constant dense<0.000000e+00> : vector<16x32xf32>
    %256 = tpu.matmul %254, %255, %cst_73 {dimension_numbers = #tpu.dot_dimension_numbers<[1], [0], [0], [1], [0, 0, 1, 1], [], []>} : vector<16x64xbf16>, vector<64x32xbf16>, vector<16x32xf32> -> vector<16x32xf32>
    %257 = vector.extract_strided_slice %6 {offsets = [6, 0], sizes = [1, 32], strides = [1, 1]} : vector<9x32xf32> to vector<1x32xf32>
    %258 = vector.broadcast %257 : vector<1x32xf32> to vector<16x32xf32>
    %259 = arith.addf %256, %258 : vector<16x32xf32>
    %260 = vector.shape_cast %259 : vector<16x32xf32> to vector<2x8x32xf32>
    %261 = arith.addf %239, %260 : vector<2x8x32xf32>
    %262 = vector.extract_strided_slice %6 {offsets = [7, 0], sizes = [1, 32], strides = [1, 1]} : vector<9x32xf32> to vector<1x32xf32>
    %263 = vector.extract_strided_slice %6 {offsets = [8, 0], sizes = [1, 32], strides = [1, 1]} : vector<9x32xf32> to vector<1x32xf32>
    %cst_74 = arith.constant dense<0.000000e+00> : vector<2x8xf32>
    %264 = vector.multi_reduction <add>, %261, %cst_74 [2] : vector<2x8x32xf32> to vector<2x8xf32>
    %265 = vector.shape_cast %264 : vector<2x8xf32> to vector<2x8x1xf32>
    %cst_75 = arith.constant 3.200000e+01 : f32
    %266 = vector.broadcast %cst_75 : f32 to vector<2x8x1xf32>
    %267 = arith.divf %265, %266 : vector<2x8x1xf32>
    %268 = vector.broadcast %267 : vector<2x8x1xf32> to vector<2x8x32xf32>
    %269 = arith.subf %261, %268 : vector<2x8x32xf32>
    %270 = arith.mulf %269, %269 : vector<2x8x32xf32>
    %cst_76 = arith.constant dense<0.000000e+00> : vector<2x8xf32>
    %271 = vector.multi_reduction <add>, %270, %cst_76 [2] : vector<2x8x32xf32> to vector<2x8xf32>
    %272 = vector.shape_cast %271 : vector<2x8xf32> to vector<2x8x1xf32>
    %cst_77 = arith.constant 3.200000e+01 : f32
    %273 = vector.broadcast %cst_77 : f32 to vector<2x8x1xf32>
    %274 = arith.divf %272, %273 : vector<2x8x1xf32>
    %275 = vector.broadcast %267 : vector<2x8x1xf32> to vector<2x8x32xf32>
    %276 = arith.subf %261, %275 : vector<2x8x32xf32>
    %cst_78 = arith.constant 9.99999974E-6 : f32
    %277 = vector.broadcast %cst_78 : f32 to vector<2x8x1xf32>
    %278 = arith.addf %274, %277 : vector<2x8x1xf32>
    %279 = math.rsqrt %278 : vector<2x8x1xf32>
    %280 = vector.broadcast %279 : vector<2x8x1xf32> to vector<2x8x32xf32>
    %281 = arith.mulf %276, %280 : vector<2x8x32xf32>
    %282 = vector.shape_cast %262 : vector<1x32xf32> to vector<1x1x32xf32>
    %283 = vector.broadcast %282 : vector<1x1x32xf32> to vector<2x8x32xf32>
    %284 = arith.mulf %281, %283 : vector<2x8x32xf32>
    %285 = vector.shape_cast %263 : vector<1x32xf32> to vector<1x1x32xf32>
    %286 = vector.broadcast %285 : vector<1x1x32xf32> to vector<2x8x32xf32>
    %287 = arith.addf %284, %286 : vector<2x8x32xf32>
    %c0_79 = arith.constant 0 : index
    %c0_80 = arith.constant 0 : index
    %c0_81 = arith.constant 0 : index
    %288 = vector.load %arg18[%c0_79, %c0_80, %c0_81] : memref<2x8x32xf32, #tpu.memory_space<vmem>>, vector<2x8x32xf32>
    tpu.vector_store %arg18[%c0_79, %c0_80, %c0_81], %287 {strides = array<i32>} : memref<2x8x32xf32, #tpu.memory_space<vmem>>, vector<2x8x32xf32>,
    %c1_i32 = arith.constant 1 : i32
    %289 = arith.cmpi eq, %arg0, %c1_i32 : i32
    %290 = arith.extui %289 : i1 to i32
    %c0_i32_82 = arith.constant 0 : i32
    %291 = arith.cmpi ne, %290, %c0_i32_82 : i32
    scf.if %291 {
      %c0_83 = arith.constant 0 : index
      %c0_84 = arith.constant 0 : index
      %292 = vector.load %arg14[%c0_83, %c0_84] : memref<2x32xf32, #tpu.memory_space<vmem>>, vector<2x32xf32>
      %293 = vector.shape_cast %287 : vector<2x8x32xf32> to vector<16x32xf32>
      %294 = vector.extract_strided_slice %292 {offsets = [0, 0], sizes = [1, 32], strides = [1, 1]} : vector<2x32xf32> to vector<1x32xf32>
      %295 = vector.extract_strided_slice %292 {offsets = [1, 0], sizes = [1, 32], strides = [1, 1]} : vector<2x32xf32> to vector<1x32xf32>
      %cst_85 = arith.constant dense<0.000000e+00> : vector<16xf32>
      %296 = vector.multi_reduction <add>, %293, %cst_85 [1] : vector<16x32xf32> to vector<16xf32>
      %297 = vector.shape_cast %296 : vector<16xf32> to vector<16x1xf32>
      %cst_86 = arith.constant 3.200000e+01 : f32
      %298 = vector.broadcast %cst_86 : f32 to vector<16x1xf32>
      %299 = arith.divf %297, %298 : vector<16x1xf32>
      %300 = vector.broadcast %299 : vector<16x1xf32> to vector<16x32xf32>
      %301 = arith.subf %293, %300 : vector<16x32xf32>
      %302 = arith.mulf %301, %301 : vector<16x32xf32>
      %cst_87 = arith.constant dense<0.000000e+00> : vector<16xf32>
      %303 = vector.multi_reduction <add>, %302, %cst_87 [1] : vector<16x32xf32> to vector<16xf32>
      %304 = vector.shape_cast %303 : vector<16xf32> to vector<16x1xf32>
      %cst_88 = arith.constant 3.200000e+01 : f32
      %305 = vector.broadcast %cst_88 : f32 to vector<16x1xf32>
      %306 = arith.divf %304, %305 : vector<16x1xf32>
      %307 = vector.broadcast %299 : vector<16x1xf32> to vector<16x32xf32>
      %308 = arith.subf %293, %307 : vector<16x32xf32>
      %cst_89 = arith.constant 9.99999974E-6 : f32
      %309 = vector.broadcast %cst_89 : f32 to vector<16x1xf32>
      %310 = arith.addf %306, %309 : vector<16x1xf32>
      %311 = math.rsqrt %310 : vector<16x1xf32>
      %312 = vector.broadcast %311 : vector<16x1xf32> to vector<16x32xf32>
      %313 = arith.mulf %308, %312 : vector<16x32xf32>
      %314 = vector.broadcast %294 : vector<1x32xf32> to vector<16x32xf32>
      %315 = arith.mulf %313, %314 : vector<16x32xf32>
      %316 = vector.broadcast %295 : vector<1x32xf32> to vector<16x32xf32>
      %317 = arith.addf %315, %316 : vector<16x32xf32>
      %c0_90 = arith.constant 0 : index
      %c0_91 = arith.constant 0 : index
      %318 = vector.load %arg15[%c0_90, %c0_91] : memref<32x128xf32, #tpu.memory_space<vmem>>, vector<32x128xf32>
      %319 = arith.truncf %317 : vector<16x32xf32> to vector<16x32xbf16>
      %320 = arith.truncf %318 : vector<32x128xf32> to vector<32x128xbf16>
      %cst_92 = arith.constant dense<0.000000e+00> : vector<16x128xf32>
      %321 = tpu.matmul %319, %320, %cst_92 {dimension_numbers = #tpu.dot_dimension_numbers<[1], [0], [0], [1], [0, 0, 1, 1], [], []>} : vector<16x32xbf16>, vector<32x128xbf16>, vector<16x128xf32> -> vector<16x128xf32>
      %c0_93 = arith.constant 0 : index
      %c0_94 = arith.constant 0 : index
      %322 = vector.load %arg16[%c0_93, %c0_94] : memref<1x128xf32, #tpu.memory_space<vmem>>, vector<1x128xf32>
      %323 = vector.broadcast %322 : vector<1x128xf32> to vector<16x128xf32>
      %324 = arith.addf %321, %323 : vector<16x128xf32>
      %325 = vector.shape_cast %324 : vector<16x128xf32> to vector<2x8x128xf32>
      %c0_95 = arith.constant 0 : index
      %c0_96 = arith.constant 0 : index
      %c0_97 = arith.constant 0 : index
      %326 = vector.load %arg17[%c0_95, %c0_96, %c0_97] : memref<2x8x128xf32, #tpu.memory_space<vmem>>, vector<2x8x128xf32>
      tpu.vector_store %arg17[%c0_95, %c0_96, %c0_97], %325 {strides = array<i32>} : memref<2x8x128xf32, #tpu.memory_space<vmem>>, vector<2x8x128xf32>,
    } else {
    }
    return
  }
  func.func @transform_0(%arg0: i32) -> (i32, i32, i32) {
    %c0_i32 = arith.constant 0 : i32
    %c0_i32_0 = arith.constant 0 : i32
    %c0_i32_1 = arith.constant 0 : i32
    %c0_i32_2 = arith.constant 0 : i32
    return %c0_i32, %c0_i32_0, %c0_i32_1 : i32, i32, i32
  }
  func.func @transform_1(%arg0: i32) -> (i32, i32, i32) {
    %c0_i32 = arith.constant 0 : i32
    %c0_i32_0 = arith.constant 0 : i32
    %c0_i32_1 = arith.constant 0 : i32
    %c0_i32_2 = arith.constant 0 : i32
    return %c0_i32, %c0_i32_0, %c0_i32_1 : i32, i32, i32
  }
  func.func @transform_2(%arg0: i32) -> (i32, i32, i32) {
    %c0_i32 = arith.constant 0 : i32
    %c0_i32_0 = arith.constant 0 : i32
    %c0_i32_1 = arith.constant 0 : i32
    %c0_i32_2 = arith.constant 0 : i32
    return %c0_i32, %c0_i32_0, %c0_i32_1 : i32, i32, i32
  }
  func.func @transform_3(%arg0: i32) -> (i32, i32, i32, i32) {
    %c0_i32 = arith.constant 0 : i32
    %c0_i32_0 = arith.constant 0 : i32
    %c0_i32_1 = arith.constant 0 : i32
    %c0_i32_2 = arith.constant 0 : i32
    return %arg0, %c0_i32, %c0_i32_0, %c0_i32_1 : i32, i32, i32, i32
  }
  func.func @transform_4(%arg0: i32) -> (i32, i32, i32, i32) {
    %c0_i32 = arith.constant 0 : i32
    %c0_i32_0 = arith.constant 0 : i32
    %c0_i32_1 = arith.constant 0 : i32
    %c0_i32_2 = arith.constant 0 : i32
    return %arg0, %c0_i32, %c0_i32_0, %c0_i32_1 : i32, i32, i32, i32
  }
  func.func @transform_5(%arg0: i32) -> (i32, i32, i32, i32) {
    %c0_i32 = arith.constant 0 : i32
    %c0_i32_0 = arith.constant 0 : i32
    %c0_i32_1 = arith.constant 0 : i32
    %c0_i32_2 = arith.constant 0 : i32
    return %arg0, %c0_i32, %c0_i32_0, %c0_i32_1 : i32, i32, i32, i32
  }
  func.func @transform_6(%arg0: i32) -> (i32, i32, i32, i32) {
    %c0_i32 = arith.constant 0 : i32
    %c0_i32_0 = arith.constant 0 : i32
    %c0_i32_1 = arith.constant 0 : i32
    %c0_i32_2 = arith.constant 0 : i32
    return %arg0, %c0_i32, %c0_i32_0, %c0_i32_1 : i32, i32, i32, i32
  }
  func.func @transform_7(%arg0: i32) -> (i32, i32, i32, i32) {
    %c0_i32 = arith.constant 0 : i32
    %c0_i32_0 = arith.constant 0 : i32
    %c0_i32_1 = arith.constant 0 : i32
    %c0_i32_2 = arith.constant 0 : i32
    return %arg0, %c0_i32, %c0_i32_0, %c0_i32_1 : i32, i32, i32, i32
  }
  func.func @transform_8(%arg0: i32) -> (i32, i32, i32, i32) {
    %c0_i32 = arith.constant 0 : i32
    %c0_i32_0 = arith.constant 0 : i32
    %c0_i32_1 = arith.constant 0 : i32
    %c0_i32_2 = arith.constant 0 : i32
    return %arg0, %c0_i32, %c0_i32_0, %c0_i32_1 : i32, i32, i32, i32
  }
  func.func @transform_9(%arg0: i32) -> (i32, i32, i32) {
    %c0_i32 = arith.constant 0 : i32
    %c0_i32_0 = arith.constant 0 : i32
    %c0_i32_1 = arith.constant 0 : i32
    return %arg0, %c0_i32, %c0_i32_0 : i32, i32, i32
  }
  func.func @transform_10(%arg0: i32) -> (i32, i32, i32) {
    %c0_i32 = arith.constant 0 : i32
    %c0_i32_0 = arith.constant 0 : i32
    %c0_i32_1 = arith.constant 0 : i32
    return %arg0, %c0_i32, %c0_i32_0 : i32, i32, i32
  }
  func.func @transform_11(%arg0: i32) -> (i32, i32, i32) {
    %c0_i32 = arith.constant 0 : i32
    %c0_i32_0 = arith.constant 0 : i32
    %c0_i32_1 = arith.constant 0 : i32
    return %arg0, %c0_i32, %c0_i32_0 : i32, i32, i32
  }
  func.func @transform_12(%arg0: i32) -> (i32, i32, i32) {
    %c0_i32 = arith.constant 0 : i32
    %c0_i32_0 = arith.constant 0 : i32
    %c0_i32_1 = arith.constant 0 : i32
    return %arg0, %c0_i32, %c0_i32_0 : i32, i32, i32
  }
  func.func @transform_13(%arg0: i32) -> (i32, i32) {
    %c0_i32 = arith.constant 0 : i32
    %c0_i32_0 = arith.constant 0 : i32
    %c0_i32_1 = arith.constant 0 : i32
    return %c0_i32, %c0_i32_0 : i32, i32
  }
  func.func @transform_14(%arg0: i32) -> (i32, i32) {
    %c0_i32 = arith.constant 0 : i32
    %c0_i32_0 = arith.constant 0 : i32
    %c0_i32_1 = arith.constant 0 : i32
    return %c0_i32, %c0_i32_0 : i32, i32
  }
  func.func @transform_15(%arg0: i32) -> (i32, i32) {
    %c0_i32 = arith.constant 0 : i32
    %c0_i32_0 = arith.constant 0 : i32
    %c0_i32_1 = arith.constant 0 : i32
    return %c0_i32, %c0_i32_0 : i32, i32
  }
  func.func @transform_16(%arg0: i32) -> (i32, i32, i32) {
    %c0_i32 = arith.constant 0 : i32
    %c0_i32_0 = arith.constant 0 : i32
    %c0_i32_1 = arith.constant 0 : i32
    %c0_i32_2 = arith.constant 0 : i32
    return %c0_i32, %c0_i32_0, %c0_i32_1 : i32, i32, i32
  }
}

</mosaic_0001>

<bundles_post_ra>
// kernel: transformer_trans_model_forward.2
= control target key start
LH: loop header
LB: loop body
LE: loop exit
PB: predicated region body
PF: predicated region fallthrough
CT: control target
= control target key end

     0   :  { %s3928_s17 = smov 0   ;;  %s4485_s0 = inlined_call_operand.vmem [shape: f32[2,8,32], index: 0, kind: input, shape index: {}]   ;;  %s4486_s1 = inlined_call_operand.vmem [shape: f32[2,1,8], index: 1, kind: input, shape index: {}]   ;;  %s4487_s2 = inlined_call_operand.vmem [shape: f32[1,8,32], index: 2, kind: input, shape index: {}]   ;;  %s4488_s3 = inlined_call_operand.vmem [shape: f32[2,12,32,8], index: 3, kind: input, shape index: {}]   ;;  %s4489_s4 = inlined_call_operand.vmem [shape: f32[2,12,1,8], index: 4, kind: input, shape index: {}]   ;;  %s4490_s5 = inlined_call_operand.vmem [shape: f32[2,4,8,32], index: 5, kind: input, shape index: {}]   ;;  %s4491_s6 = inlined_call_operand.vmem [shape: f32[2,6,32], index: 6, kind: input, shape index: {}]   ;;  %s4492_s7 = inlined_call_operand.vmem [shape: f32[2,32,64], index: 7, kind: input, shape index: {}]   ;;  %s4493_s8 = inlined_call_operand.vmem [shape: f32[2,1,64], index: 8, kind: input, shape index: {}]   ;;  %s4494_s9 = inlined_call_operand.vmem [shape: f32[2,64,32], index: 9, kind: input, shape index: {}]   ;;  %s4495_s10 = inlined_call_operand.vmem [shape: f32[2,32], index: 10, kind: input, shape index: {}]   ;;  %s4496_s11 = inlined_call_operand.vmem [shape: f32[2,8,32], index: 11, kind: output, shape index: {}]  }
   0x1   :  { %4499 = sst [smem:[#allocation4_spill]] %s4488_s3 }
   0x2   :  { %4500 = sst [smem:[#allocation5_spill]] %s4490_s5 }
   0x3   :  { %4501 = sst [smem:[#allocation6_spill]] %s4496_s11 }
   0x4 LB: > { %4502 = sst [smem:[#allocation3_spill]] %s3864_s17  ;;  %s3934_s18 = sadd.s32 4294967295, %s3864_s17   ;;  %s3864_s17 = sphi %s3928_s17, %s21_s17  }
   0x5   : > { %p3235_p0 = scmp.ge.s32.totalorder %s3864_s17, 1  ;;  %p388_p1 = scmp.lt.s32.totalorder %s3864_s17, 3 }
   0x7   : > { %p389_p2 = pnand %p3235_p0, %p388_p1 }
   0x8   : > { %p449_p3 = scmp.lt.s32.totalorder (!%p389_p2), %s3934_s18, 1  ;;  %s4503_s5 = sld [smem:[#allocation5_spill]] (!%p389_p2) }
   0x9   : > { %392 = sbr.rel (%p389_p2) target bundleno = 2669 (0xa6d), region = 64  ;;  %s4504_s3 = sld [smem:[#allocation4_spill]] (!%p389_p2) }
   0xa   : > { %p3244_p4 = scmp.ne.s32.totalorder (!%p389_p2), %s3934_s18, 0 }
  0x10   : > { %s3940_s19 = scalar_select %p449_p3, %s3934_s18, 1 }
  0x11   : > { %v485_v0 = vld [vmem:[%s4485_s0] sm:$0xff] (!%p3244_p4)  ;;  %vm490_vm0 = vcmask (!%p3244_p4), 261120   ;;  %v486_v2 = vld [vmem:[%s4485_s0 + $0x8] sm:$0xff] (!%p3244_p4) }
  0x12   : > { %s3800_s20 = smul.u32 384, %s3940_s19  ;;  %s3313_s21 = sshll.u32 %s3940_s19, 5  ;;  %v487_v1 = vld [vmem:[%s4487_s2] sm:$0xff] (!%p3244_p4) }
  0x13   : > { %s3801_s22 = smul.u32 12, %s3940_s19  ;;  %s3948_s25 = scalar_lea.vmem %s4503_s5, %s3313_s21  ;;  %v488_v3 = vadd.f32 (!%p3244_p4), %v487_v1, %v485_v0  ;;  %v489_v4 = vadd.f32 (!%p3244_p4), %v487_v1, %v486_v2 }
  0x14   : > { %s3953_s28 = scalar_lea.vmem %s4504_s3, %s3800_s20  ;;  %s3239_s29 = sshll.u32 %s3940_s19, 3 }
  0x15   : > { %s3959_s13 = scalar_lea.vmem %s4489_s4, %s3801_s22  ;;  %s3964_s16 = scalar_lea.vmem %s4491_s6, %s3239_s29  ;;  %491 = vst.msk [vmem:[#allocation2] sm:$0xff] (!%p3244_p4), %vm490_vm0, %v488_v3  ;;  %492 = vst.msk [vmem:[#allocation2 + $0x8] sm:$0xff] (!%p3244_p4), %vm490_vm0, %v489_v4 }
  0x16   : > { %s3969_s24 = scalar_lea.vmem %s4492_s7, %s3313_s21  ;;  %s474_s20 = scalar_lea.vmem %s4493_s8, %s3940_s19 }
  0x17   : > { %s3315_s27 = sshll.u32 %s3940_s19, 6  ;;  %484 = sbr.rel (%p3244_p4) target bundleno = 30 (0x1e), region = 68 }
  0x18   : > { %s3979_s22 = scalar_lea.vmem %s4494_s9, %s3315_s27 }
  0x1e PF: > { %v498_v5 = vld [vmem:[%s3953_s28] sm:$0xff]  ;;  %v499_v6 = vld [vmem:[%s3953_s28 + $0x8] sm:$0xff]  ;;  %v3866_v8 = vmov 0.0   ;;  %v500_v11 = vld [vmem:[%s3953_s28 + $0x10] sm:$0xff]  ;;  %vm3867_vm1 = vmmov 0   ;;  %vm612_vm2 = vcmask 261120  }
  0x1f   : > { %v502_v7 = vld [vmem:[%s3953_s28 + $0x20] sm:$0xff]  ;;  %3444 = vmatprep.subr.bf16.mxu0 %v3866_v8  ;;  %3452 = vmatprep.subr.bf16.mxu1 %v3866_v8  ;;  %v564_v9 = vpack.c.bf16 %v499_v6, %v498_v5  ;;  %v503_v10 = vld [vmem:[%s3953_s28 + $0x28] sm:$0xff]  ;;  %v501_v12 = vld [vmem:[%s3953_s28 + $0x18] sm:$0xff]  ;;  %vm1655_vm3 = vcmask 64512   ;;  %vm2131_vm4 = vcmask 1043456   ;;  %vm3003_vm5 = vcmask 523264  }
  0x20   : > { %v566_v13 = vpack.c.bf16 %v503_v10, %v502_v7  ;;  %v504_v14 = vld [vmem:[%s3953_s28 + $0x30] sm:$0xff]  ;;  %v505_v15 = vld [vmem:[%s3953_s28 + $0x38] sm:$0xff]  ;;  %3448 = vmatprep.mubr.msk.bf16.mxu0 %vm3867_vm1, %v3866_v8  ;;  %3456 = vmatprep.mubr.msk.bf16.mxu1 %vm3867_vm1, %v3866_v8  ;;  %v565_v16 = vpack.c.bf16 %v501_v12, %v500_v11  ;;  %v493_v17 = vld [vmem:[#allocation2] sm:$0xff]  ;;  %p3310_p5 = scmp.ne.s32.totalorder %s3934_s18, 1 }
  0x21   : > { %3445 = vmatpush3.bf16.msra.mxu0 %v564_v9  ;;  %v567_v18 = vpack.c.bf16 %v505_v15, %v504_v14  ;;  %v506_v19 = vld [vmem:[%s3953_s28 + $0x40] sm:$0xff]  ;;  %v507_v20 = vld [vmem:[%s3953_s28 + $0x48] sm:$0xff]  ;;  %v4011_v23 = vpack.c.bf16 %v493_v17, %v493_v17  ;;  %v508_v26 = vld [vmem:[%s3953_s28 + $0x50] sm:$0xff]  ;;  %s4505_s23 = sld [smem:[#allocation6_spill]] (!%p3310_p5) }
  0x22   : > { %3453 = vmatpush3.bf16.msra.mxu1 %v566_v13  ;;  %3446 = vmatprep.subr.bf16.mxu0 %v3866_v8  ;;  %v510_v21 = vld [vmem:[%s3953_s28 + $0x60] sm:$0xff]  ;;  %v511_v22 = vld [vmem:[%s3953_s28 + $0x68] sm:$0xff]  ;;  %v568_v24 = vpack.c.bf16 %v507_v20, %v506_v19  ;;  %v509_v27 = vld [vmem:[%s3953_s28 + $0x58] sm:$0xff] }
  0x23   : > { %3454 = vmatprep.subr.bf16.mxu1 %v3866_v8  ;;  %v570_v25 = vpack.c.bf16 %v511_v22, %v510_v21  ;;  %v512_v28 = vld [vmem:[%s3953_s28 + $0x70] sm:$0xff]  ;;  %v513_v29 = vld [vmem:[%s3953_s28 + $0x78] sm:$0xff]  ;;  %v569_v30 = vpack.c.bf16 %v509_v27, %v508_v26  ;;  %v494_v32 = vld [vmem:[#allocation2 + $0x8] sm:$0xff] }
  0x24   : > { %v571_v31 = vpack.c.bf16 %v513_v29, %v512_v28  ;;  %v4041_v33 = vpack.c.bf16 %v494_v32, %v494_v32  ;;  %v514_v34 = vld [vmem:[%s3953_s28 + $0x80] sm:$0xff]  ;;  %v515_v35 = vld [vmem:[%s3953_s28 + $0x88] sm:$0xff]  ;;  %v516_v40 = vld [vmem:[%s3953_s28 + $0x90] sm:$0xff] }
  0x25   : > { %3447 = vmatpush3.bf16.msra.mxu0 %v565_v16  ;;  %v518_v36 = vld [vmem:[%s3953_s28 + $0xa0] sm:$0xff]  ;;  %v519_v37 = vld [vmem:[%s3953_s28 + $0xa8] sm:$0xff]  ;;  %v572_v38 = vpack.c.bf16 %v515_v35, %v514_v34  ;;  %v517_v41 = vld [vmem:[%s3953_s28 + $0x98] sm:$0xff] }
  0x26   : > { %3455 = vmatpush3.bf16.msra.mxu1 %v567_v18  ;;  %3460 = vmatprep.subr.bf16.mxu0 %v3866_v8  ;;  %v574_v39 = vpack.c.bf16 %v519_v37, %v518_v36  ;;  %v520_v42 = vld [vmem:[%s3953_s28 + $0xb0] sm:$0xff]  ;;  %v521_v43 = vld [vmem:[%s3953_s28 + $0xb8] sm:$0xff]  ;;  %v573_v44 = vpack.c.bf16 %v517_v41, %v516_v40  ;;  %v522_v46 = vld [vmem:[%s3953_s28 + $0xc0] sm:$0xff] }
  0x27   : > { %3468 = vmatprep.subr.bf16.mxu1 %v3866_v8  ;;  %v575_v45 = vpack.c.bf16 %v521_v43, %v520_v42  ;;  %v523_v47 = vld [vmem:[%s3953_s28 + $0xc8] sm:$0xff]  ;;  %v526_v48 = vld [vmem:[%s3953_s28 + $0xe0] sm:$0xff]  ;;  %v524_v52 = vld [vmem:[%s3953_s28 + $0xd0] sm:$0xff] }
  0x28   : > { %3449 = vmatmul.mubr.msk.bf16.vlgmr.msra.gmra.mrb[0].mxu0 %vm612_vm2, %v4011_v23  ;;  %v527_v49 = vld [vmem:[%s3953_s28 + $0xe8] sm:$0xff]  ;;  %v576_v50 = vpack.c.bf16 %v523_v47, %v522_v46  ;;  %v525_v53 = vld [vmem:[%s3953_s28 + $0xd8] sm:$0xff]  ;;  %v528_v54 = vld [vmem:[%s3953_s28 + $0xf0] sm:$0xff] }
  0x29   : > { %3457 = vmatmul.mubr.msk.bf16.vlgmr.msra.gmra.mrb[0].mxu1 %vm612_vm2, %v4011_v23  ;;  %3461 = vmatpush3.bf16.msra.mxu0 %v568_v24  ;;  %v578_v51 = vpack.c.bf16 %v527_v49, %v526_v48  ;;  %v529_v55 = vld [vmem:[%s3953_s28 + $0xf8] sm:$0xff]  ;;  %v577_v56 = vpack.c.bf16 %v525_v53, %v524_v52  ;;  %v530_v58 = vld [vmem:[%s3953_s28 + $0x100] sm:$0xff]  ;;  %v531_v59 = vld [vmem:[%s3953_s28 + $0x108] sm:$0xff] }
  0x2a   : > { %3469 = vmatpush3.bf16.msra.mxu1 %v570_v25  ;;  %3462 = vmatprep.subr.bf16.mxu0 %v3866_v8  ;;  %v579_v57 = vpack.c.bf16 %v529_v55, %v528_v54  ;;  %v580_v60 = vpack.c.bf16 %v531_v59, %v530_v58  ;;  %v534_v61 = vld [vmem:[%s3953_s28 + $0x120] sm:$0xff]  ;;  %v535_v62 = vld [vmem:[%s3953_s28 + $0x128] sm:$0xff]  ;;  %v532_v0 = vld [vmem:[%s3953_s28 + $0x110] sm:$0xff] }
  0x2b   : > { %3470 = vmatprep.subr.bf16.mxu1 %v3866_v8  ;;  %3464 = vmatprep.mubr.msk.bf16.mxu0 %vm3867_vm1, %v3866_v8  ;;  %v582_v63 = vpack.c.bf16 %v535_v62, %v534_v61  ;;  %v533_v1 = vld [vmem:[%s3953_s28 + $0x118] sm:$0xff]  ;;  %v536_v3 = vld [vmem:[%s3953_s28 + $0x130] sm:$0xff]  ;;  %v538_v6 = vld [vmem:[%s3953_s28 + $0x140] sm:$0xff] }
  0x2c   : > { %3472 = vmatprep.mubr.msk.bf16.mxu1 %vm3867_vm1, %v3866_v8  ;;  %v581_v2 = vpack.c.bf16 %v533_v1, %v532_v0  ;;  %v537_v4 = vld [vmem:[%s3953_s28 + $0x138] sm:$0xff]  ;;  %v539_v7 = vld [vmem:[%s3953_s28 + $0x148] sm:$0xff]  ;;  %v542_v10 = vld [vmem:[%s3953_s28 + $0x160] sm:$0xff] }
  0x2d   : > { %3463 = vmatpush3.bf16.msra.mxu0 %v569_v30  ;;  %v583_v5 = vpack.c.bf16 %v537_v4, %v536_v3  ;;  %v543_v11 = vld [vmem:[%s3953_s28 + $0x168] sm:$0xff]  ;;  %v541_v14 = vld [vmem:[%s3953_s28 + $0x158] sm:$0xff]  ;;  %v3258_v52 = vld [vmem:[%s3959_s13 + $0x5] ss:$0 sm:$0xff] }
  0x2e   : > { %3471 = vmatpush3.bf16.msra.mxu1 %v571_v31  ;;  %3476 = vmatprep.subr.bf16.mxu0 %v3866_v8  ;;  %v586_v12 = vpack.c.bf16 %v543_v11, %v542_v10  ;;  %v545_v17 = vld [vmem:[%s3953_s28 + $0x178] sm:$0xff] }
  0x2f   : > { %3484 = vmatprep.subr.bf16.mxu1 %v3866_v8 }
  0x30   : > { %3465 = vmatmul.mubr.msk.bf16.vlgmr.msra.gmra.mrb[4].mxu0 %vm612_vm2, %v4011_v23 }
  0x31   : > { %3473 = vmatmul.mubr.msk.bf16.vlgmr.msra.gmra.mrb[4].mxu1 %vm612_vm2, %v4011_v23  ;;  %3477 = vmatpush3.bf16.msra.mxu0 %v564_v9  ;;  %v584_v9 = vpack.c.bf16 %v539_v7, %v538_v6  ;;  %v3260_v7 = vld [vmem:[%s3959_s13 + $0x7] ss:$0 sm:$0xff] }
  0x32   : > { %3485 = vmatpush3.bf16.msra.mxu1 %v566_v13  ;;  %3478 = vmatprep.subr.bf16.mxu0 %v3866_v8  ;;  %v540_v13 = vld [vmem:[%s3953_s28 + $0x150] sm:$0xff] }
  0x33   : > { %3486 = vmatprep.subr.bf16.mxu1 %v3866_v8  ;;  %3480 = vmatprep.mubr.msk.bf16.mxu0 %vm3867_vm1, %v3866_v8  ;;  %v585_v15 = vpack.c.bf16 %v541_v14, %v540_v13 }
  0x34   : > { %3488 = vmatprep.mubr.msk.bf16.mxu1 %vm3867_vm1, %v3866_v8 }
  0x35   : > { %3479 = vmatpush3.bf16.msra.mxu0 %v565_v16  ;;  %v544_v16 = vld [vmem:[%s3953_s28 + $0x170] sm:$0xff] }
  0x36   : > { %3487 = vmatpush3.bf16.msra.mxu1 %v567_v18  ;;  %3492 = vmatprep.subr.bf16.mxu0 %v3866_v8  ;;  %v587_v18 = vpack.c.bf16 %v545_v17, %v544_v16 }
  0x37   : > { %3500 = vmatprep.subr.bf16.mxu1 %v3866_v8 }
  0x38   : > { %3481 = vmatmul.mubr.msk.bf16.vlgmr.msra.gmra.mrb[8].mxu0 %vm612_vm2, %v4041_v33 }
  0x39   : > { %3489 = vmatmul.mubr.msk.bf16.vlgmr.msra.gmra.mrb[8].mxu1 %vm612_vm2, %v4041_v33  ;;  %3493 = vmatpush3.bf16.msra.mxu0 %v568_v24 }
  0x3a   : > { %3501 = vmatpush3.bf16.msra.mxu1 %v570_v25  ;;  %3494 = vmatprep.subr.bf16.mxu0 %v3866_v8 }
  0x3b   : > { %3502 = vmatprep.subr.bf16.mxu1 %v3866_v8  ;;  %3496 = vmatprep.mubr.msk.bf16.mxu0 %vm3867_vm1, %v3866_v8 }
  0x3c   : > { %3504 = vmatprep.mubr.msk.bf16.mxu1 %vm3867_vm1, %v3866_v8 }
  0x3d   : > { %3495 = vmatpush3.bf16.msra.mxu0 %v569_v30 }
  0x3e   : > { %3503 = vmatpush3.bf16.msra.mxu1 %v571_v31  ;;  %3508 = vmatprep.subr.bf16.mxu0 %v3866_v8 }
  0x3f   : > { %3516 = vmatprep.subr.bf16.mxu1 %v3866_v8 }
  0x40   : > { %3497 = vmatmul.mubr.msk.bf16.vlgmr.msra.gmra.mrb[12].mxu0 %vm612_vm2, %v4041_v33 }
  0x41   : > { %3505 = vmatmul.mubr.msk.bf16.vlgmr.msra.gmra.mrb[12].mxu1 %vm612_vm2, %v4041_v33  ;;  %3509 = vmatpush3.bf16.msra.mxu0 %v572_v38 }
  0x42   : > { %3517 = vmatpush3.bf16.msra.mxu1 %v574_v39  ;;  %3510 = vmatprep.subr.bf16.mxu0 %v3866_v8 }
  0x43   : > { %3518 = vmatprep.subr.bf16.mxu1 %v3866_v8  ;;  %3512 = vmatprep.mubr.msk.bf16.mxu0 %vm3867_vm1, %v3866_v8 }
  0x44   : > { %3520 = vmatprep.mubr.msk.bf16.mxu1 %vm3867_vm1, %v3866_v8 }
  0x45   : > { %3511 = vmatpush3.bf16.msra.mxu0 %v573_v44 }
  0x46   : > { %3519 = vmatpush3.bf16.msra.mxu1 %v575_v45  ;;  %3524 = vmatprep.subr.bf16.mxu0 %v3866_v8 }
  0x47   : > { %3532 = vmatprep.subr.bf16.mxu1 %v3866_v8 }
  0x48   : > { %3513 = vmatmul.mubr.msk.bf16.vlgmr.msra.gmra.mrb[16].mxu0 %vm612_vm2, %v4011_v23 }
  0x49   : > { %3521 = vmatmul.mubr.msk.bf16.vlgmr.msra.gmra.mrb[16].mxu1 %vm612_vm2, %v4011_v23  ;;  %3525 = vmatpush3.bf16.msra.mxu0 %v576_v50 }
  0x4a   : > { %3533 = vmatpush3.bf16.msra.mxu1 %v578_v51  ;;  %3526 = vmatprep.subr.bf16.mxu0 %v3866_v8 }
  0x4b   : > { %3534 = vmatprep.subr.bf16.mxu1 %v3866_v8  ;;  %3528 = vmatprep.mubr.msk.bf16.mxu0 %vm3867_vm1, %v3866_v8 }
  0x4c   : > { %3536 = vmatprep.mubr.msk.bf16.mxu1 %vm3867_vm1, %v3866_v8 }
  0x4d   : > { %3527 = vmatpush3.bf16.msra.mxu0 %v577_v56 }
  0x4e   : > { %3535 = vmatpush3.bf16.msra.mxu1 %v579_v57  ;;  %3540 = vmatprep.subr.bf16.mxu0 %v3866_v8 }
  0x4f   : > { %3548 = vmatprep.subr.bf16.mxu1 %v3866_v8 }
  0x50   : > { %3529 = vmatmul.mubr.msk.bf16.vlgmr.msra.gmra.mrb[20].mxu0 %vm612_vm2, %v4011_v23 }
  0x51   : > { %3537 = vmatmul.mubr.msk.bf16.vlgmr.msra.gmra.mrb[20].mxu1 %vm612_vm2, %v4011_v23  ;;  %3541 = vmatpush3.bf16.msra.mxu0 %v572_v38 }
  0x52   : > { %3549 = vmatpush3.bf16.msra.mxu1 %v574_v39  ;;  %3542 = vmatprep.subr.bf16.mxu0 %v3866_v8 }
  0x53   : > { %3550 = vmatprep.subr.bf16.mxu1 %v3866_v8  ;;  %3544 = vmatprep.mubr.msk.bf16.mxu0 %vm3867_vm1, %v3866_v8 }
  0x54   : > { %3552 = vmatprep.mubr.msk.bf16.mxu1 %vm3867_vm1, %v3866_v8 }
  0x55   : > { %3543 = vmatpush3.bf16.msra.mxu0 %v573_v44 }
  0x56   : > { %3551 = vmatpush3.bf16.msra.mxu1 %v575_v45  ;;  %3556 = vmatprep.subr.bf16.mxu0 %v3866_v8 }
  0x57   : > { %3564 = vmatprep.subr.bf16.mxu1 %v3866_v8 }
  0x58   : > { %3545 = vmatmul.mubr.msk.bf16.vlgmr.msra.gmra.mrb[24].mxu0 %vm612_vm2, %v4041_v33 }
  0x59   : > { %3553 = vmatmul.mubr.msk.bf16.vlgmr.msra.gmra.mrb[24].mxu1 %vm612_vm2, %v4041_v33  ;;  %3557 = vmatpush3.bf16.msra.mxu0 %v576_v50 }
  0x5a   : > { %3565 = vmatpush3.bf16.msra.mxu1 %v578_v51  ;;  %3558 = vmatprep.subr.bf16.mxu0 %v3866_v8  ;;  %v3257_v51 = vld [vmem:[%s3959_s13 + $0x4] ss:$0 sm:$0xff] }
  0x5b   : > { %3566 = vmatprep.subr.bf16.mxu1 %v3866_v8  ;;  %3560 = vmatprep.mubr.msk.bf16.mxu0 %vm3867_vm1, %v3866_v8 }
  0x5c   : > { %3568 = vmatprep.mubr.msk.bf16.mxu1 %vm3867_vm1, %v3866_v8 }
  0x5d   : > { %3559 = vmatpush3.bf16.msra.mxu0 %v577_v56 }
  0x5e   : > { %3567 = vmatpush3.bf16.msra.mxu1 %v579_v57  ;;  %3572 = vmatprep.subr.bf16.mxu0 %v3866_v8 }
  0x5f   : > { %3580 = vmatprep.subr.bf16.mxu1 %v3866_v8 }
  0x60   : > { %3561 = vmatmul.mubr.msk.bf16.vlgmr.msra.gmra.mrb[28].mxu0 %vm612_vm2, %v4041_v33 }
  0x61   : > { %3569 = vmatmul.mubr.msk.bf16.vlgmr.msra.gmra.mrb[28].mxu1 %vm612_vm2, %v4041_v33  ;;  %3573 = vmatpush3.bf16.msra.mxu0 %v580_v60 }
  0x62   : > { %3574 = vmatprep.subr.bf16.mxu0 %v3866_v8  ;;  %3576 = vmatprep.mubr.msk.bf16.mxu0 %vm3867_vm1, %v3866_v8 }
  0x63   : > { %3584 = vmatprep.mubr.msk.bf16.mxu1 %vm3867_vm1, %v3866_v8  ;;  %3581 = vmatpush3.bf16.msra.mxu1 %v582_v63 }
  0x64   : > { %3582 = vmatprep.subr.bf16.mxu1 %v3866_v8 }
  0x65   : > { %3575 = vmatpush3.bf16.msra.mxu0 %v581_v2 }
  0x66   : > { %3588 = vmatprep.subr.bf16.mxu0 %v3866_v8 }
  0x67   : > { %3583 = vmatpush3.bf16.msra.mxu1 %v583_v5 }
  0x68   : > { %3577 = vmatmul.mubr.msk.bf16.vlgmr.msra.gmra.mrb[32].mxu0 %vm612_vm2, %v4011_v23  ;;  %3596 = vmatprep.subr.bf16.mxu1 %v3866_v8 }
  0x69   : > { %3589 = vmatpush3.bf16.msra.mxu0 %v584_v9  ;;  %3592 = vmatprep.mubr.msk.bf16.mxu0 %vm3867_vm1, %v3866_v8 }
  0x6a   : > { %3585 = vmatmul.mubr.msk.bf16.vlgmr.msra.gmra.mrb[32].mxu1 %vm612_vm2, %v4011_v23  ;;  %3590 = vmatprep.subr.bf16.mxu0 %v3866_v8 }
  0x6b   : > { %3597 = vmatpush3.bf16.msra.mxu1 %v586_v12  ;;  %3600 = vmatprep.mubr.msk.bf16.mxu1 %vm3867_vm1, %v3866_v8 }
  0x6c   : > { %3598 = vmatprep.subr.bf16.mxu1 %v3866_v8 }
  0x6d   : > { %3591 = vmatpush3.bf16.msra.mxu0 %v585_v15 }
  0x6e   : > { %3604 = vmatprep.subr.bf16.mxu0 %v3866_v8 }
  0x6f   : > { %3599 = vmatpush3.bf16.msra.mxu1 %v587_v18 }
  0x70   : > { %3593 = vmatmul.mubr.msk.bf16.vlgmr.msra.gmra.mrb[36].mxu0 %vm612_vm2, %v4011_v23  ;;  %3612 = vmatprep.subr.bf16.mxu1 %v3866_v8 }
  0x71   : > { %3605 = vmatpush3.bf16.msra.mxu0 %v580_v60  ;;  %3608 = vmatprep.mubr.msk.bf16.mxu0 %vm3867_vm1, %v3866_v8 }
  0x72   : > { %3601 = vmatmul.mubr.msk.bf16.vlgmr.msra.gmra.mrb[36].mxu1 %vm612_vm2, %v4011_v23  ;;  %3606 = vmatprep.subr.bf16.mxu0 %v3866_v8 }
  0x73   : > { %3613 = vmatpush3.bf16.msra.mxu1 %v582_v63  ;;  %3616 = vmatprep.mubr.msk.bf16.mxu1 %vm3867_vm1, %v3866_v8  ;;  %v3245_v63 = vld [vmem:[%s3959_s13] ss:$0 sm:$0xff] }
  0x74   : > { %3614 = vmatprep.subr.bf16.mxu1 %v3866_v8 }
  0x75   : > { %3607 = vmatpush3.bf16.msra.mxu0 %v581_v2  ;;  %v3246_v2 = vld [vmem:[%s3959_s13 + $0x1] ss:$0 sm:$0xff] }
  0x76   : > { %3620 = vmatprep.subr.bf16.mxu0 %v3866_v8 }
  0x77   : > { %3615 = vmatpush3.bf16.msra.mxu1 %v583_v5  ;;  %v3259_v5 = vld [vmem:[%s3959_s13 + $0x6] ss:$0 sm:$0xff] }
  0x78   : > { %3609 = vmatmul.mubr.msk.bf16.vlgmr.msra.gmra.mrb[40].mxu0 %vm612_vm2, %v4041_v33  ;;  %3628 = vmatprep.subr.bf16.mxu1 %v3866_v8 }
  0x79   : > { %3621 = vmatpush3.bf16.msra.mxu0 %v584_v9  ;;  %3624 = vmatprep.mubr.msk.bf16.mxu0 %vm3867_vm1, %v3866_v8 }
  0x7a   : > { %3617 = vmatmul.mubr.msk.bf16.vlgmr.msra.gmra.mrb[40].mxu1 %vm612_vm2, %v4041_v33  ;;  %3622 = vmatprep.subr.bf16.mxu0 %v3866_v8 }
  0x7b   : > { %3629 = vmatpush3.bf16.msra.mxu1 %v586_v12  ;;  %3632 = vmatprep.mubr.msk.bf16.mxu1 %vm3867_vm1, %v3866_v8 }
  0x7c   : > { %3630 = vmatprep.subr.bf16.mxu1 %v3866_v8 }
  0x7d   : > { %3623 = vmatpush3.bf16.msra.mxu0 %v585_v15 }
  0x7e   : > { %3636 = vmatprep.subr.bf16.mxu0 %v3866_v8 }
  0x7f   : > { %3631 = vmatpush3.bf16.msra.mxu1 %v587_v18 }
  0x80   : > { %3625 = vmatmul.mubr.msk.bf16.vlgmr.msra.gmra.mrb[44].mxu0 %vm612_vm2, %v4041_v33  ;;  %3642 = vmatprep.subr.bf16.mxu1 %v3866_v8 }
  0x81   : > { %3638 = vmatprep.mubr.msk.bf16.mxu0 %vm3867_vm1, %v3866_v8 }
  0x82   : > { %3633 = vmatmul.mubr.msk.bf16.vlgmr.msra.gmra.mrb[44].mxu1 %vm612_vm2, %v4041_v33 }
  0x83   : > { %3644 = vmatprep.mubr.msk.bf16.mxu1 %vm3867_vm1, %v3866_v8 }
  0xfb   : > { %v650_v19 = vpop.f32.mrb[0].mxu0 }
  0xfc   : > { %v3450_v20 = vpop.f32.mrb[1].mxu0  ;;  %v690_v21 = vpop.f32.mrb[0].mxu1  ;;  %v651_v6 = vadd.f32 %v3245_v63, %v650_v19 }
  0xfd   : > { %v653_v22 = vpop.f32.mrb[2].mxu0  ;;  %v3458_v23 = vpop.f32.mrb[1].mxu1  ;;  %v691_v9 = vadd.f32 %v3246_v2, %v690_v21 }
  0xfe   : > { %v3451_v24 = vpop.f32.mrb[3].mxu0  ;;  %v693_v25 = vpop.f32.mrb[2].mxu1  ;;  %v1627_v17 = vpack.c.bf16 %v651_v6, %v651_v6  ;;  %v3247_v23 = vld [vmem:[%s3959_s13 + $0x2] ss:$0 sm:$0xff]  ;;  %v3270_v6 = vld [vmem:[%s3959_s13 + $0x9] ss:$0 sm:$0xff] }
  0xff   : > { %v3459_v26 = vpop.f32.mrb[3].mxu1  ;;  %v1628_v22 = vpack.c.bf16 %v691_v9, %v691_v9 }
 0x100   : > { %v3248_v26 = vld [vmem:[%s3959_s13 + $0x3] ss:$0 sm:$0xff] }
 0x103   : > { %v4193_v27 = vpop.f32.mrb[4].mxu0 }
 0x104   : > { %v3466_v28 = vpop.f32.mrb[5].mxu0  ;;  %v4195_v29 = vpop.f32.mrb[4].mxu1 }
 0x105   : > { %v733_v30 = vpop.f32.mrb[6].mxu0  ;;  %v3474_v31 = vpop.f32.mrb[5].mxu1 }
 0x106   : > { %v3467_v32 = vpop.f32.mrb[7].mxu0  ;;  %v773_v33 = vpop.f32.mrb[6].mxu1  ;;  %v731_v30 = vadd.f32 %v3247_v23, %v4193_v27  ;;  %v771_v31 = vadd.f32 %v3248_v26, %v4195_v29 }
 0x107   : > { %v3475_v34 = vpop.f32.mrb[7].mxu1 }
 0x10b   : > { %v4197_v35 = vpop.f32.mrb[8].mxu0 }
 0x10c   : > { %v3482_v36 = vpop.f32.mrb[9].mxu0  ;;  %v4199_v37 = vpop.f32.mrb[8].mxu1 }
 0x10d   : > { %v816_v38 = vpop.f32.mrb[10].mxu0  ;;  %v3490_v39 = vpop.f32.mrb[9].mxu1 }
 0x10e   : > { %v3483_v40 = vpop.f32.mrb[11].mxu0  ;;  %v856_v41 = vpop.f32.mrb[10].mxu1 }
 0x10f   : > { %v3491_v42 = vpop.f32.mrb[11].mxu1  ;;  %v1629_v40 = vpack.c.bf16 %v731_v30, %v731_v30 }
 0x113   : > { %v4201_v43 = vpop.f32.mrb[12].mxu0 }
 0x114   : > { %v3498_v44 = vpop.f32.mrb[13].mxu0  ;;  %v4203_v45 = vpop.f32.mrb[12].mxu1 }
 0x115   : > { %v896_v46 = vpop.f32.mrb[14].mxu0  ;;  %v3506_v47 = vpop.f32.mrb[13].mxu1 }
 0x116   : > { %v3499_v48 = vpop.f32.mrb[15].mxu0  ;;  %v936_v49 = vpop.f32.mrb[14].mxu1  ;;  %v1630_v46 = vpack.c.bf16 %v771_v31, %v771_v31 }
 0x117   : > { %v3507_v50 = vpop.f32.mrb[15].mxu1 }
 0x118   : > { %v814_v50 = vadd.f32 %v3245_v63, %v4197_v35 }
 0x11b   : > { %v997_v53 = vpop.f32.mrb[16].mxu0 }
 0x11c   : > { %v998_v54 = vadd.f32 %v3257_v51, %v997_v53  ;;  %v1037_v55 = vpop.f32.mrb[16].mxu1  ;;  %v3514_v56 = vpop.f32.mrb[17].mxu0 }
 0x11d   : > { %v1038_v57 = vadd.f32 %v3258_v52, %v1037_v55  ;;  %v1000_v58 = vpop.f32.mrb[18].mxu0  ;;  %v3522_v59 = vpop.f32.mrb[17].mxu1 }
 0x11e   : > { %v1635_v60 = vpack.c.bf16 %v998_v54, %v998_v54  ;;  %v3515_v61 = vpop.f32.mrb[19].mxu0  ;;  %v1040_v62 = vpop.f32.mrb[18].mxu1  ;;  %v1631_v58 = vpack.c.bf16 %v814_v50, %v814_v50 }
 0x11f   : > { %v1636_v0 = vpack.c.bf16 %v1038_v57, %v1038_v57  ;;  %v3523_v1 = vpop.f32.mrb[19].mxu1 }
 0x120   : > { %v1660_v3 = vsel %vm1655_vm3, %v1635_v60, 0 }
 0x121   : > { %v1706_v4 = vsel %vm1655_vm3, %v1636_v0, 0  ;;  %3637 = vmatpush3.bf16.xpose.msra.mxu0 %v1660_v3  ;;  %v934_v3 = vadd.f32 %v3248_v26, %v4203_v45 }
 0x122   : > { %3643 = vmatpush3.bf16.xpose.msra.mxu1 %v1706_v4  ;;  %3648 = vmatprep.subr.bf16.mxu0 %v3866_v8 }
 0x123   : > { %v1077_v10 = vpop.f32.mrb[20].mxu0  ;;  %3654 = vmatprep.subr.bf16.mxu1 %v3866_v8 }
 0x124   : > { %v1078_v11 = vadd.f32 %v3259_v5, %v1077_v10  ;;  %v1117_v12 = vpop.f32.mrb[20].mxu1  ;;  %v3530_v13 = vpop.f32.mrb[21].mxu0 }
 0x125   : > { %v1118_v14 = vadd.f32 %v3260_v7, %v1117_v12  ;;  %v1080_v15 = vpop.f32.mrb[22].mxu0  ;;  %v3538_v16 = vpop.f32.mrb[21].mxu1 }
 0x126   : > { %v1637_v18 = vpack.c.bf16 %v1078_v11, %v1078_v11  ;;  %v3531_v20 = vpop.f32.mrb[23].mxu0  ;;  %v1120_v19 = vpop.f32.mrb[22].mxu1 }
 0x127   : > { %v1638_v24 = vpack.c.bf16 %v1118_v14, %v1118_v14  ;;  %v3539_v25 = vpop.f32.mrb[23].mxu1 }
 0x128   : > { %v1752_v21 = vsel %vm1655_vm3, %v1637_v18, 0  ;;  %3639 = vmatmul.mubr.msk.bf16.vlgmr.msra.gmra.mrb[48].mxu0 %vm1655_vm3, %v1627_v17 }
 0x129   : > { %v1798_v28 = vsel %vm1655_vm3, %v1638_v24, 0  ;;  %3645 = vmatmul.mubr.msk.bf16.vlgmr.msra.gmra.mrb[48].mxu1 %vm1655_vm3, %v1628_v22  ;;  %3649 = vmatpush3.bf16.xpose.msra.mxu0 %v1752_v21 }
 0x12a   : > { %3655 = vmatpush3.bf16.xpose.msra.mxu1 %v1798_v28  ;;  %3650 = vmatprep.mubr.msk.bf16.mxu0 %vm3867_vm1, %v3866_v8 }
 0x12b   : > { %v1157_v32 = vpop.f32.mrb[24].mxu0  ;;  %3656 = vmatprep.mubr.msk.bf16.mxu1 %vm3867_vm1, %v3866_v8  ;;  %3660 = vmatprep.subr.bf16.mxu0 %v3866_v8 }
 0x12c   : > { %v1158_v33 = vadd.f32 %v3257_v51, %v1157_v32  ;;  %v1197_v34 = vpop.f32.mrb[24].mxu1  ;;  %v3546_v36 = vpop.f32.mrb[25].mxu0  ;;  %3666 = vmatprep.subr.bf16.mxu1 %v3866_v8  ;;  %v854_v51 = vadd.f32 %v3246_v2, %v4199_v37  ;;  %v894_v2 = vadd.f32 %v3247_v23, %v4201_v43  ;;  %v3269_v43 = vld [vmem:[%s3959_s13 + $0x8] ss:$0 sm:$0xff] }
 0x12d   : > { %v1198_v38 = vadd.f32 %v3258_v52, %v1197_v34  ;;  %v1160_v39 = vpop.f32.mrb[26].mxu0  ;;  %v3554_v27 = vpop.f32.mrb[25].mxu1 }
 0x12e   : > { %v1639_v41 = vpack.c.bf16 %v1158_v33, %v1158_v33  ;;  %v3547_v42 = vpop.f32.mrb[27].mxu0  ;;  %v1200_v44 = vpop.f32.mrb[26].mxu1  ;;  %v1632_v62 = vpack.c.bf16 %v854_v51, %v854_v51  ;;  %v1633_v4 = vpack.c.bf16 %v894_v2, %v894_v2  ;;  %v3281_v51 = vld [vmem:[%s4486_s1] ss:$0 sm:$0xff] }
 0x12f   : > { %v1640_v29 = vpack.c.bf16 %v1198_v38, %v1198_v38  ;;  %v3555_v47 = vpop.f32.mrb[27].mxu1 }
 0x130   : > { %v1844_v48 = vsel %vm1655_vm3, %v1639_v41, 0  ;;  %3651 = vmatmul.mubr.msk.bf16.vlgmr.msra.gmra.mrb[52].mxu0 %vm1655_vm3, %v1629_v40 }
 0x131   : > { %v1890_v49 = vsel %vm1655_vm3, %v1640_v29, 0  ;;  %3657 = vmatmul.mubr.msk.bf16.vlgmr.msra.gmra.mrb[52].mxu1 %vm1655_vm3, %v1630_v46  ;;  %3661 = vmatpush3.bf16.xpose.msra.mxu0 %v1844_v48 }
 0x132   : > { %3667 = vmatpush3.bf16.xpose.msra.mxu1 %v1890_v49  ;;  %3662 = vmatprep.mubr.msk.bf16.mxu0 %vm3867_vm1, %v3866_v8 }
 0x133   : > { %v1237_v52 = vpop.f32.mrb[28].mxu0  ;;  %3668 = vmatprep.mubr.msk.bf16.mxu1 %vm3867_vm1, %v3866_v8  ;;  %3672 = vmatprep.subr.bf16.mxu0 %v3866_v8 }
 0x134   : > { %v1238_v53 = vadd.f32 %v3259_v5, %v1237_v52  ;;  %v1277_v54 = vpop.f32.mrb[28].mxu1  ;;  %v3562_v55 = vpop.f32.mrb[29].mxu0  ;;  %3678 = vmatprep.subr.bf16.mxu1 %v3866_v8  ;;  %v1634_v5 = vpack.c.bf16 %v934_v3, %v934_v3 }
 0x135   : > { %v1278_v56 = vadd.f32 %v3260_v7, %v1277_v54  ;;  %v1240_v57 = vpop.f32.mrb[30].mxu0  ;;  %v3570_v35 = vpop.f32.mrb[29].mxu1 }
 0x136   : > { %v1641_v59 = vpack.c.bf16 %v1238_v53, %v1238_v53  ;;  %v3563_v60 = vpop.f32.mrb[31].mxu0  ;;  %v1280_v61 = vpop.f32.mrb[30].mxu1 }
 0x137   : > { %v1642_v37 = vpack.c.bf16 %v1278_v56, %v1278_v56  ;;  %v3571_v63 = vpop.f32.mrb[31].mxu1 }
 0x138   : > { %v1936_v0 = vsel %vm1655_vm3, %v1641_v59, 0  ;;  %3663 = vmatmul.mubr.msk.bf16.vlgmr.msra.gmra.mrb[56].mxu0 %vm1655_vm3, %v1631_v58 }
 0x139   : > { %v1982_v1 = vsel %vm1655_vm3, %v1642_v37, 0  ;;  %3669 = vmatmul.mubr.msk.bf16.vlgmr.msra.gmra.mrb[56].mxu1 %vm1655_vm3, %v1632_v62  ;;  %3673 = vmatpush3.bf16.xpose.msra.mxu0 %v1936_v0 }
 0x13a   : > { %3679 = vmatpush3.bf16.xpose.msra.mxu1 %v1982_v1  ;;  %3674 = vmatprep.mubr.msk.bf16.mxu0 %vm3867_vm1, %v3866_v8 }
 0x13b   : > { %3680 = vmatprep.mubr.msk.bf16.mxu1 %vm3867_vm1, %v3866_v8  ;;  %3684 = vmatprep.subr.bf16.mxu0 %v3866_v8  ;;  %v1341_v45 = vpop.f32.mrb[32].mxu0 }
 0x13c   : > { %3690 = vmatprep.subr.bf16.mxu1 %v3866_v8  ;;  %v1342_v7 = vadd.f32 %v3269_v43, %v1341_v45  ;;  %v3578_v9 = vpop.f32.mrb[33].mxu0 }
 0x13d   : > { %v1344_v10 = vpop.f32.mrb[34].mxu0  ;;  %v1381_v11 = vpop.f32.mrb[32].mxu1 }
 0x13e   : > { %v2120_v12 = vpack.c.bf16 %v1342_v7, %v1342_v7  ;;  %v3579_v13 = vpop.f32.mrb[35].mxu0  ;;  %v1382_v14 = vadd.f32 %v3270_v6, %v1381_v11  ;;  %v3586_v15 = vpop.f32.mrb[33].mxu1  ;;  %v3282_v7 = vld [vmem:[%s4486_s1 + $0x1] ss:$0 sm:$0xff] }
 0x13f   : > { %v1384_v16 = vpop.f32.mrb[34].mxu1 }
 0x140   : > { %3675 = vmatmul.mubr.msk.bf16.vlgmr.msra.gmra.mrb[60].mxu0 %vm1655_vm3, %v1633_v4  ;;  %v2133_v17 = vsel %vm2131_vm4, %v2120_v12, 0  ;;  %v2121_v18 = vpack.c.bf16 %v1382_v14, %v1382_v14  ;;  %v3587_v20 = vpop.f32.mrb[35].mxu1 }
 0x141   : > { %3681 = vmatmul.mubr.msk.bf16.vlgmr.msra.gmra.mrb[60].mxu1 %vm1655_vm3, %v1634_v5  ;;  %3686 = vmatprep.mubr.msk.bf16.mxu0 %vm3867_vm1, %v3866_v8 }
 0x142   : > { %3692 = vmatprep.mubr.msk.bf16.mxu1 %vm3867_vm1, %v3866_v8  ;;  %3685 = vmatpush3.bf16.msra.mxu0 %v2133_v17  ;;  %v2179_v19 = vsel %vm2131_vm4, %v2121_v18, 0 }
 0x143   : > { %3696 = vmatprep.subr.bf16.mxu0 %v3866_v8  ;;  %v4264_v22 = vpop.f32.mrb[36].mxu0  ;;  %3691 = vmatpush3.bf16.msra.mxu1 %v2179_v19 }
 0x144   : > { %v3594_v23 = vpop.f32.mrb[37].mxu0  ;;  %3702 = vmatprep.subr.bf16.mxu1 %v3866_v8 }
 0x145   : > { %v1424_v24 = vpop.f32.mrb[38].mxu0  ;;  %v4267_v25 = vpop.f32.mrb[36].mxu1 }
 0x146   : > { %v3595_v26 = vpop.f32.mrb[39].mxu0  ;;  %v3602_v21 = vpop.f32.mrb[37].mxu1 }
 0x147   : > { %v1464_v28 = vpop.f32.mrb[38].mxu1 }
 0x148   : > { %v3603_v30 = vpop.f32.mrb[39].mxu1 }
 0x14b   : > { %v1501_v31 = vpop.f32.mrb[40].mxu0 }
 0x14c   : > { %v4269_v32 = vadd.f32 %v3269_v43, %v1501_v31  ;;  %v3610_v33 = vpop.f32.mrb[41].mxu0 }
 0x14d   : > { %v1504_v34 = vpop.f32.mrb[42].mxu0  ;;  %v1541_v36 = vpop.f32.mrb[40].mxu1 }
 0x14e   : > { %v3611_v38 = vpop.f32.mrb[43].mxu0  ;;  %v4271_v39 = vadd.f32 %v3270_v6, %v1541_v36  ;;  %v3618_v27 = vpop.f32.mrb[41].mxu1 }
 0x14f   : > { %v1544_v40 = vpop.f32.mrb[42].mxu1 }
 0x150   : > { %v3619_v41 = vpop.f32.mrb[43].mxu1 }
 0x153   : > { %v4273_v42 = vpop.f32.mrb[44].mxu0 }
 0x154   : > { %v3626_v44 = vpop.f32.mrb[45].mxu0 }
 0x155   : > { %v1584_v46 = vpop.f32.mrb[46].mxu0  ;;  %v4275_v29 = vpop.f32.mrb[44].mxu1 }
 0x156   : > { %v3627_v47 = vpop.f32.mrb[47].mxu0  ;;  %v3634_v48 = vpop.f32.mrb[45].mxu1 }
 0x157   : > { %v1624_v49 = vpop.f32.mrb[46].mxu1 }
 0x158   : > { %v3635_v50 = vpop.f32.mrb[47].mxu1 }
 0x1fb   : > { %v1696_v52 = vpop.f32.mrb[48].mxu0 }
 0x1fc   : > { %v1697_v53 = vadd.f32 %v3281_v51, %v1696_v52  ;;  %v1742_v54 = vpop.f32.mrb[48].mxu1  ;;  %v3640_v55 = vpop.f32.mrb[49].mxu0 }
 0x1fd   : > { %v3646_v56 = vpop.f32.mrb[49].mxu1  ;;  %v1699_v57 = vpop.f32.mrb[50].mxu0  ;;  %v1743_v35 = vadd.f32 %v3281_v51, %v1742_v54 }
 0x1fe   : > { %v1745_v58 = vpop.f32.mrb[50].mxu1  ;;  %v3641_v59 = vpop.f32.mrb[51].mxu0  ;;  %v2024_v60 = vsel %vm1655_vm3, %v1697_v53, -inf }
 0x1ff   : > { %v3647_v61 = vpop.f32.mrb[51].mxu1  ;;  %2025 = vmax.xlane.f32.xlu0 %v2024_v60  ;;  %v2027_v62 = vsel %vm1655_vm3, %v1743_v35, -inf }
 0x203   : > { %2028 = vmax.xlane.f32.xlu0 %v2027_v62  ;;  %v1788_v37 = vpop.f32.mrb[52].mxu0 }
 0x204   : > { %v1834_v63 = vpop.f32.mrb[52].mxu1  ;;  %v1789_v0 = vadd.f32 %v3281_v51, %v1788_v37  ;;  %v3652_v1 = vpop.f32.mrb[53].mxu0 }
 0x205   : > { %v3658_v2 = vpop.f32.mrb[53].mxu1  ;;  %v1791_v3 = vpop.f32.mrb[54].mxu0  ;;  %v1835_v4 = vadd.f32 %v3281_v51, %v1834_v63 }
 0x206   : > { %v1837_v5 = vpop.f32.mrb[54].mxu1  ;;  %v3653_v43 = vpop.f32.mrb[55].mxu0  ;;  %v2030_v45 = vsel %vm1655_vm3, %v1789_v0, -inf }
 0x207   : > { %v3659_v6 = vpop.f32.mrb[55].mxu1  ;;  %2031 = vmax.xlane.f32.xlu1 %v2030_v45  ;;  %v2033_v9 = vsel %vm1655_vm3, %v1835_v4, -inf }
 0x20b   : > { %2034 = vmax.xlane.f32.xlu1 %v2033_v9  ;;  %v1880_v10 = vpop.f32.mrb[56].mxu0 }
 0x20c   : > { %v1926_v11 = vpop.f32.mrb[56].mxu1  ;;  %v1881_v12 = vadd.f32 %v3282_v7, %v1880_v10  ;;  %v3664_v13 = vpop.f32.mrb[57].mxu0 }
 0x20d   : > { %v1927_v14 = vadd.f32 %v3282_v7, %v1926_v11  ;;  %v3670_v15 = vpop.f32.mrb[57].mxu1  ;;  %v1883_v16 = vpop.f32.mrb[58].mxu0 }
 0x20e   : > { %v1929_v17 = vpop.f32.mrb[58].mxu1  ;;  %v3665_v18 = vpop.f32.mrb[59].mxu0  ;;  %v2036_v20 = vsel %vm1655_vm3, %v1881_v12, -inf }
 0x20f   : > { %v3671_v19 = vpop.f32.mrb[59].mxu1  ;;  %v2039_v23 = vsel %vm1655_vm3, %v1927_v14, -inf  ;;  %2037 = vmax.xlane.f32.xlu0 %v2036_v20  ;;  %v3271_v20 = vld [vmem:[%s3959_s13 + $0xa] ss:$0 sm:$0xff] }
 0x210   : > { %2040 = vmax.xlane.f32.xlu1 %v2039_v23  ;;  %v1422_v19 = vadd.f32 %v3271_v20, %v4264_v22 }
 0x213   : > { %v1972_v24 = vpop.f32.mrb[60].mxu0 }
 0x214   : > { %v1973_v26 = vadd.f32 %v3282_v7, %v1972_v24  ;;  %v2018_v21 = vpop.f32.mrb[60].mxu1  ;;  %v3676_v28 = vpop.f32.mrb[61].mxu0  ;;  %v3272_v24 = vld [vmem:[%s3959_s13 + $0xb] ss:$0 sm:$0xff] }
 0x215   : > { %v2019_v30 = vadd.f32 %v3282_v7, %v2018_v21  ;;  %v3682_v31 = vpop.f32.mrb[61].mxu1  ;;  %v1975_v33 = vpop.f32.mrb[62].mxu0  ;;  %v2122_v21 = vpack.c.bf16 %v1422_v19, %v1422_v19  ;;  %v1462_v28 = vadd.f32 %v3272_v24, %v4267_v25 }
 0x216   : > { %v2021_v34 = vpop.f32.mrb[62].mxu1  ;;  %v3677_v36 = vpop.f32.mrb[63].mxu0  ;;  %v2042_v38 = vsel %vm1655_vm3, %v1973_v26, -inf }
 0x217   : > { %v3683_v27 = vpop.f32.mrb[63].mxu1  ;;  %v2045_v40 = vsel %vm1655_vm3, %v2019_v30, -inf  ;;  %2043 = vmax.xlane.f32.xlu0 %v2042_v38  ;;  %v2225_v36 = vsel %vm2131_vm4, %v2122_v21, 0  ;;  %v2123_v38 = vpack.c.bf16 %v1462_v28, %v1462_v28 }
 0x218   : > { %2046 = vmax.xlane.f32.xlu1 %v2045_v40 }
 0x28c   : > { %v2026_v41 = vpop.xlane.xlu0 %2025 }
 0x28d   : > { %v2048_v44 = vsub.f32 %v1697_v53, %v2026_v41 }
 0x28f   : > { %v2056_v46 = vmul.f32 1.442695, %v2048_v44  ;;  %v2271_v44 = vsel %vm2131_vm4, %v2123_v38, 0 }
 0x290   : > { %v2029_v47 = vpop.xlane.xlu0 %2028 }
 0x291   : > { %3812 = vpow2.f32 %v2056_v46  ;;  %v2049_v48 = vsub.f32 %v1743_v35, %v2029_v47  ;;  %v2124_v46 = vpack.c.bf16 %v4269_v32, %v4269_v32 }
 0x293   : > { %v2058_v49 = vmul.f32 1.442695, %v2049_v48 }
 0x294   : > { %v2032_v50 = vpop.xlane.xlu1 %2031 }
 0x295   : > { %3814 = vpow2.f32 %v2058_v49  ;;  %v2050_v51 = vsub.f32 %v1789_v0, %v2032_v50  ;;  %v2317_v50 = vsel %vm2131_vm4, %v2124_v46, 0 }
 0x297   : > { %v2060_v52 = vmul.f32 1.442695, %v2050_v51  ;;  %v2125_v51 = vpack.c.bf16 %v4271_v39, %v4271_v39 }
 0x298   : > { %v2035_v54 = vpop.xlane.xlu1 %2034 }
 0x299   : > { %3816 = vpow2.f32 %v2060_v52  ;;  %v2051_v55 = vsub.f32 %v1835_v4, %v2035_v54  ;;  %v1582_v52 = vadd.f32 %v3271_v20, %v4273_v42  ;;  %v2363_v39 = vsel %vm2131_vm4, %v2125_v51, 0 }
 0x29b   : > { %v3813_v56 = vpop.eup %3812  ;;  %v2062_v57 = vmul.f32 1.442695, %v2051_v55  ;;  %v2126_v42 = vpack.c.bf16 %v1582_v52, %v1582_v52 }
 0x29c   : > { %v2038_v58 = vpop.xlane.xlu0 %2037  ;;  %v2072_v59 = vsel %vm1655_vm3, %v3813_v56, 0.0 }
 0x29d   : > { %3818 = vpow2.f32 %v2062_v57  ;;  %v2041_v60 = vpop.xlane.xlu1 %2040  ;;  %v2052_v53 = vsub.f32 %v1881_v12, %v2038_v58  ;;  %2073 = vadd.xlane.f32.xlu0 %v2072_v59  ;;  %v1622_v59 = vadd.f32 %v3272_v24, %v4275_v29 }
 0x29e   : > { %v2053_v61 = vsub.f32 %v1927_v14, %v2041_v60 }
 0x29f   : > { %v3815_v62 = vpop.eup %3814  ;;  %v2064_v35 = vmul.f32 1.442695, %v2052_v53 }
 0x2a0   : > { %v2066_v37 = vmul.f32 1.442695, %v2053_v61  ;;  %v2075_v63 = vsel %vm1655_vm3, %v3815_v62, 0.0 }
 0x2a1   : > { %3820 = vpow2.f32 %v2064_v35  ;;  %2076 = vadd.xlane.f32.xlu1 %v2075_v63  ;;  %v2409_v35 = vsel %vm2131_vm4, %v2126_v42, 0 }
 0x2a2   : > { %3822 = vpow2.f32 %v2066_v37  ;;  %v2127_v37 = vpack.c.bf16 %v1622_v59, %v1622_v59 }
 0x2a3   : > { %v3817_v0 = vpop.eup %3816 }
 0x2a4   : > { %v2044_v1 = vpop.xlane.xlu0 %2043  ;;  %v2078_v2 = vsel %vm1655_vm3, %v3817_v0, 0.0 }
 0x2a5   : > { %v2047_v3 = vpop.xlane.xlu1 %2046  ;;  %v2054_v4 = vsub.f32 %v1973_v26, %v2044_v1  ;;  %2079 = vadd.xlane.f32.xlu0 %v2078_v2  ;;  %v2455_v2 = vsel %vm2131_vm4, %v2127_v37, 0 }
 0x2a6   : > { %v2055_v5 = vsub.f32 %v2019_v30, %v2047_v3 }
 0x2a7   : > { %v3819_v43 = vpop.eup %3818  ;;  %v2068_v45 = vmul.f32 1.442695, %v2054_v4 }
 0x2a8   : > { %v2070_v6 = vmul.f32 1.442695, %v2055_v5  ;;  %v2081_v7 = vsel %vm1655_vm3, %v3819_v43, 0.0 }
 0x2a9   : > { %3824 = vpow2.f32 %v2068_v45  ;;  %2082 = vadd.xlane.f32.xlu1 %v2081_v7 }
 0x2aa   : > { %3826 = vpow2.f32 %v2070_v6  ;;  %v559_v6 = vld [vmem:[%s3948_s25 + $0x8] sm:$0xff] }
 0x2ab   : > { %v4295_v9 = vpop.eup %3820  ;;  %v2498_v7 = vpack.c.bf16 %v559_v6, %v559_v6 }
 0x2ac   : > { %v4297_v10 = vpop.eup %3822  ;;  %v2084_v11 = vsel %vm1655_vm3, %v4295_v9, 0.0 }
 0x2ad   : > { %v2087_v12 = vsel %vm1655_vm3, %v4297_v10, 0.0  ;;  %2085 = vadd.xlane.f32.xlu0 %v2084_v11 }
 0x2ae   : > { %2088 = vadd.xlane.f32.xlu1 %v2087_v12  ;;  %v561_v12 = vld [vmem:[%s3948_s25 + $0x18] sm:$0xff] }
 0x2b3   : > { %v4303_v13 = vpop.eup %3824 }
 0x2b4   : > { %v4305_v14 = vpop.eup %3826  ;;  %v2090_v15 = vsel %vm1655_vm3, %v4303_v13, 0.0 }
 0x2b5   : > { %v2093_v16 = vsel %vm1655_vm3, %v4305_v14, 0.0  ;;  %2091 = vadd.xlane.f32.xlu0 %v2090_v15 }
 0x2b6   : > { %2094 = vadd.xlane.f32.xlu1 %v2093_v16 }
 0x32a   : > { %v2074_v17 = vpop.xlane.xlu0 %2073 }
 0x32b   : > { %3828 = vrcp.f32 %v2074_v17  ;;  %v2500_v17 = vpack.c.bf16 %v561_v12, %v561_v12 }
 0x32e   : > { %v2077_v18 = vpop.xlane.xlu1 %2076 }
 0x32f   : > { %3830 = vrcp.f32 %v2077_v18 }
 0x332   : > { %v2080_v23 = vpop.xlane.xlu0 %2079 }
 0x333   : > { %3832 = vrcp.f32 %v2080_v23 }
 0x335   : > { %v3829_v26 = vpop.eup %3828 }
 0x336   : > { %v2104_v30 = vmul.f32 %v3829_v26, %v3813_v56  ;;  %v2083_v31 = vpop.xlane.xlu1 %2082  ;;  %v2651_v26 = vsel %vm2131_vm4, %v2500_v17, 0 }
 0x337   : > { %3834 = vrcp.f32 %v2083_v31 }
 0x338   : > { %v2112_v33 = vpack.c.bf16 %v2104_v30, %v2104_v30 }
 0x339   : > { %v3831_v34 = vpop.eup %3830 }
 0x33a   : > { %v2105_v27 = vmul.f32 %v3831_v34, %v3815_v62  ;;  %3687 = vmatmul.mubr.msk.bf16.vlgmr.msra.gmra.mrb[64].mxu0 %vm1655_vm3, %v2112_v33  ;;  %v2086_v40 = vpop.xlane.xlu0 %2085  ;;  %v558_v62 = vld [vmem:[%s3948_s25] sm:$0xff] }
 0x33b   : > { %v2089_v22 = vpop.xlane.xlu1 %2088  ;;  %3697 = vmatpush3.bf16.msra.mxu0 %v2225_v36  ;;  %3836 = vrcp.f32 %v2086_v40  ;;  %3698 = vmatprep.mubr.msk.bf16.mxu0 %vm3867_vm1, %v3866_v8  ;;  %v2497_v63 = vpack.c.bf16 %v558_v62, %v558_v62  ;;  %v2879_v62 = vlaneseq }
 0x33c   : > { %3838 = vrcp.f32 %v2089_v22  ;;  %v2113_v25 = vpack.c.bf16 %v2105_v27, %v2105_v27  ;;  %3708 = vmatprep.subr.bf16.mxu0 %v3866_v8 }
 0x33d   : > { %v3833_v41 = vpop.eup %3832 }
 0x33e   : > { %v2106_v47 = vmul.f32 %v3833_v41, %v3817_v0  ;;  %3693 = vmatmul.mubr.msk.bf16.vlgmr.msra.gmra.mrb[64].mxu1 %vm1655_vm3, %v2113_v25 }
 0x33f   : > { %3703 = vmatpush3.bf16.msra.mxu1 %v2271_v44  ;;  %3704 = vmatprep.mubr.msk.bf16.mxu1 %vm3867_vm1, %v3866_v8 }
 0x340   : > { %v2114_v48 = vpack.c.bf16 %v2106_v47, %v2106_v47  ;;  %3714 = vmatprep.subr.bf16.mxu1 %v3866_v8 }
 0x341   : > { %v3835_v49 = vpop.eup %3834 }
 0x342   : > { %v2107_v54 = vmul.f32 %v3835_v49, %v3819_v43  ;;  %3699 = vmatmul.mubr.msk.bf16.vlgmr.msra.gmra.mrb[68].mxu0 %vm1655_vm3, %v2114_v48  ;;  %v2092_v32 = vpop.xlane.xlu0 %2091  ;;  %v2513_v43 = vsel %vm2131_vm4, %v2497_v63, 0 }
 0x343   : > { %v2095_v55 = vpop.xlane.xlu1 %2094  ;;  %3709 = vmatpush3.bf16.msra.mxu0 %v2317_v50  ;;  %3840 = vrcp.f32 %v2092_v32  ;;  %3710 = vmatprep.mubr.msk.bf16.mxu0 %vm3867_vm1, %v3866_v8 }
 0x344   : > { %3842 = vrcp.f32 %v2095_v55  ;;  %v2115_v56 = vpack.c.bf16 %v2107_v54, %v2107_v54  ;;  %3720 = vmatprep.subr.bf16.mxu0 %v3866_v8 }
 0x345   : > { %v3837_v57 = vpop.eup %3836 }
 0x346   : > { %v3839_v58 = vpop.eup %3838  ;;  %v2108_v60 = vmul.f32 %v3837_v57, %v4295_v9  ;;  %3705 = vmatmul.mubr.msk.bf16.vlgmr.msra.gmra.mrb[68].mxu1 %vm1655_vm3, %v2115_v56  ;;  %v2559_v9 = vsel %vm2131_vm4, %v2498_v7, 0 }
 0x347   : > { %3715 = vmatpush3.bf16.msra.mxu1 %v2363_v39  ;;  %3716 = vmatprep.mubr.msk.bf16.mxu1 %vm3867_vm1, %v3866_v8  ;;  %v2109_v53 = vmul.f32 %v3839_v58, %v4297_v10  ;;  %v560_v10 = vld [vmem:[%s3948_s25 + $0x10] sm:$0xff] }
 0x348   : > { %v2116_v61 = vpack.c.bf16 %v2108_v60, %v2108_v60  ;;  %3726 = vmatprep.subr.bf16.mxu1 %v3866_v8  ;;  %v2499_v11 = vpack.c.bf16 %v560_v10, %v560_v10  ;;  %v4408_v10 = vld [vmem:[%s3964_s16] sm:$0x3f] }
 0x349   : > { %v2117_v29 = vpack.c.bf16 %v2109_v53, %v2109_v53 }
 0x34a   : > { %3711 = vmatmul.mubr.msk.bf16.vlgmr.msra.gmra.mrb[72].mxu0 %vm1655_vm3, %v2116_v61  ;;  %v2605_v16 = vsel %vm2131_vm4, %v2499_v11, 0 }
 0x34b   : > { %3721 = vmatpush3.bf16.msra.mxu0 %v2409_v35  ;;  %3722 = vmatprep.mubr.msk.bf16.mxu0 %vm3867_vm1, %v3866_v8 }
 0x34c   : > { %3732 = vmatprep.subr.bf16.mxu0 %v3866_v8 }
 0x34d   : > { %v3841_v0 = vpop.eup %3840 }
 0x34e   : > { %v3843_v1 = vpop.eup %3842  ;;  %v2110_v3 = vmul.f32 %v3841_v0, %v4303_v13  ;;  %3717 = vmatmul.mubr.msk.bf16.vlgmr.msra.gmra.mrb[72].mxu1 %vm1655_vm3, %v2117_v29  ;;  %v4401_v0 = vshrl.u32 %v2879_v62, 7 }
 0x34f   : > { %3727 = vmatpush3.bf16.msra.mxu1 %v2455_v2  ;;  %3728 = vmatprep.mubr.msk.bf16.mxu1 %vm3867_vm1, %v3866_v8  ;;  %v2111_v4 = vmul.f32 %v3843_v1, %v4305_v14 }
 0x350   : > { %v2118_v5 = vpack.c.bf16 %v2110_v3, %v2110_v3  ;;  %3738 = vmatprep.subr.bf16.mxu1 %v3866_v8  ;;  %v2881_v6 = vsub.s32 0, %v4401_v0 }
 0x351   : > { %v2119_v45 = vpack.c.bf16 %v2111_v4, %v2111_v4 }
 0x352   : > { %3723 = vmatmul.mubr.msk.bf16.vlgmr.msra.gmra.mrb[76].mxu0 %vm1655_vm3, %v2118_v5 }
 0x353   : > { %3733 = vmatpush3.bf16.msra.mxu0 %v2513_v43  ;;  %3734 = vmatprep.mubr.msk.bf16.mxu0 %vm3867_vm1, %v3866_v8 }
 0x354   : > { %3744 = vmatprep.subr.bf16.mxu0 %v3866_v8 }
 0x356   : > { %3729 = vmatmul.mubr.msk.bf16.vlgmr.msra.gmra.mrb[76].mxu1 %vm1655_vm3, %v2119_v45 }
 0x357   : > { %3740 = vmatprep.mubr.msk.bf16.mxu1 %vm3867_vm1, %v3866_v8  ;;  %3739 = vmatpush3.bf16.msra.mxu1 %v2559_v9 }
 0x358   : > { %3750 = vmatprep.subr.bf16.mxu1 %v3866_v8 }
 0x40d   : > { %v2169_v13 = vpop.f32.mrb[64].mxu0 }
 0x40e   : > { %v2501_v14 = vpack.c.bf16 %v2169_v13, %v2169_v13  ;;  %v3688_v15 = vpop.f32.mrb[65].mxu0 }
 0x40f   : > { %v2172_v18 = vpop.f32.mrb[66].mxu0  ;;  %v2882_v15 = vrot.slane %v4408_v10, %v2881_v6 }
 0x410   : > { %v3689_v20 = vpop.f32.mrb[67].mxu0  ;;  %3735 = vmatmul.mubr.msk.bf16.vlgmr.msra.gmra.mrb[80].mxu0 %vm1655_vm3, %v2501_v14 }
 0x411   : > { %v2215_v19 = vpop.f32.mrb[64].mxu1  ;;  %3745 = vmatpush3.bf16.msra.mxu0 %v2605_v16  ;;  %3746 = vmatprep.mubr.msk.bf16.mxu0 %vm3867_vm1, %v3866_v8 }
 0x412   : > { %v2502_v23 = vpack.c.bf16 %v2215_v19, %v2215_v19  ;;  %v3694_v24 = vpop.f32.mrb[65].mxu1  ;;  %3756 = vmatprep.subr.bf16.mxu0 %v3866_v8 }
 0x413   : > { %v2218_v21 = vpop.f32.mrb[66].mxu1 }
 0x414   : > { %v3695_v28 = vpop.f32.mrb[67].mxu1  ;;  %3741 = vmatmul.mubr.msk.bf16.vlgmr.msra.gmra.mrb[80].mxu1 %vm1655_vm3, %v2502_v23 }
 0x415   : > { %v2261_v30 = vpop.f32.mrb[68].mxu0  ;;  %3751 = vmatpush3.bf16.msra.mxu1 %v2651_v26  ;;  %3752 = vmatprep.mubr.msk.bf16.mxu1 %vm3867_vm1, %v3866_v8  ;;  %v3852_v28 = vld [vmem:[#allocation2] sm:$0xff] }
 0x416   : > { %v2503_v31 = vpack.c.bf16 %v2261_v30, %v2261_v30  ;;  %v3700_v33 = vpop.f32.mrb[69].mxu0  ;;  %3762 = vmatprep.subr.bf16.mxu1 %v3866_v8 }
 0x417   : > { %v2264_v34 = vpop.f32.mrb[70].mxu0 }
 0x418   : > { %v3701_v36 = vpop.f32.mrb[71].mxu0  ;;  %3747 = vmatmul.mubr.msk.bf16.vlgmr.msra.gmra.mrb[84].mxu0 %vm1655_vm3, %v2503_v31 }
 0x419   : > { %v2307_v38 = vpop.f32.mrb[68].mxu1  ;;  %3757 = vmatpush3.bf16.msra.mxu0 %v2513_v43  ;;  %3758 = vmatprep.mubr.msk.bf16.mxu0 %vm3867_vm1, %v3866_v8 }
 0x41a   : > { %v2504_v27 = vpack.c.bf16 %v2307_v38, %v2307_v38  ;;  %v3706_v40 = vpop.f32.mrb[69].mxu1  ;;  %3768 = vmatprep.subr.bf16.mxu0 %v3866_v8 }
 0x41b   : > { %v2310_v22 = vpop.f32.mrb[70].mxu1 }
 0x41c   : > { %v3707_v25 = vpop.f32.mrb[71].mxu1  ;;  %3753 = vmatmul.mubr.msk.bf16.vlgmr.msra.gmra.mrb[84].mxu1 %vm1655_vm3, %v2504_v27 }
 0x41d   : > { %v2353_v41 = vpop.f32.mrb[72].mxu0  ;;  %3763 = vmatpush3.bf16.msra.mxu1 %v2559_v9  ;;  %3764 = vmatprep.mubr.msk.bf16.mxu1 %vm3867_vm1, %v3866_v8 }
 0x41e   : > { %v2505_v44 = vpack.c.bf16 %v2353_v41, %v2353_v41  ;;  %v3712_v46 = vpop.f32.mrb[73].mxu0  ;;  %3774 = vmatprep.subr.bf16.mxu1 %v3866_v8 }
 0x41f   : > { %v2356_v47 = vpop.f32.mrb[74].mxu0 }
 0x420   : > { %v3713_v48 = vpop.f32.mrb[75].mxu0  ;;  %3759 = vmatmul.mubr.msk.bf16.vlgmr.msra.gmra.mrb[88].mxu0 %vm1655_vm3, %v2505_v44 }
 0x421   : > { %v2399_v49 = vpop.f32.mrb[72].mxu1  ;;  %3769 = vmatpush3.bf16.msra.mxu0 %v2605_v16  ;;  %3770 = vmatprep.mubr.msk.bf16.mxu0 %vm3867_vm1, %v3866_v8 }
 0x422   : > { %v2506_v50 = vpack.c.bf16 %v2399_v49, %v2399_v49  ;;  %v3718_v51 = vpop.f32.mrb[73].mxu1  ;;  %3780 = vmatprep.subr.bf16.mxu0 %v3866_v8 }
 0x423   : > { %v2402_v52 = vpop.f32.mrb[74].mxu1 }
 0x424   : > { %v3719_v54 = vpop.f32.mrb[75].mxu1  ;;  %3765 = vmatmul.mubr.msk.bf16.vlgmr.msra.gmra.mrb[88].mxu1 %vm1655_vm3, %v2506_v50 }
 0x425   : > { %v2445_v32 = vpop.f32.mrb[76].mxu0  ;;  %3775 = vmatpush3.bf16.msra.mxu1 %v2651_v26  ;;  %3776 = vmatprep.mubr.msk.bf16.mxu1 %vm3867_vm1, %v3866_v8 }
 0x426   : > { %v2507_v55 = vpack.c.bf16 %v2445_v32, %v2445_v32  ;;  %v3724_v56 = vpop.f32.mrb[77].mxu0  ;;  %3788 = vmatprep.subr.bf16.mxu1 %v3866_v8 }
 0x427   : > { %v2448_v57 = vpop.f32.mrb[78].mxu0 }
 0x428   : > { %v3725_v58 = vpop.f32.mrb[79].mxu0  ;;  %3771 = vmatmul.mubr.msk.bf16.vlgmr.msra.gmra.mrb[92].mxu0 %vm1655_vm3, %v2507_v55  ;;  %v3853_v57 = vld [vmem:[#allocation2 + $0x8] sm:$0xff] }
 0x429   : > { %v2491_v39 = vpop.f32.mrb[76].mxu1  ;;  %3784 = vmatprep.mubr.msk.bf16.mxu0 %vm3867_vm1, %v3866_v8 }
 0x42a   : > { %v2508_v42 = vpack.c.bf16 %v2491_v39, %v2491_v39  ;;  %v3730_v59 = vpop.f32.mrb[77].mxu1 }
 0x42b   : > { %v2494_v60 = vpop.f32.mrb[78].mxu1 }
 0x42c   : > { %v3731_v53 = vpop.f32.mrb[79].mxu1  ;;  %3777 = vmatmul.mubr.msk.bf16.vlgmr.msra.gmra.mrb[92].mxu1 %vm1655_vm3, %v2508_v42 }
 0x42d   : > { %3796 = vmatprep.mubr.msk.bf16.mxu1 %vm3867_vm1, %v3866_v8 }
 0x4e3   : > { %v2549_v61 = vpop.f32.mrb[80].mxu0 }
 0x4e4   : > { %v3736_v35 = vpop.f32.mrb[81].mxu0  ;;  %v2865_v1 = vsel %vm612_vm2, %v2549_v61, 0.0 }
 0x4e5   : > { %v2552_v37 = vpop.f32.mrb[82].mxu0 }
 0x4e6   : > { %v3737_v29 = vpop.f32.mrb[83].mxu0 }
 0x4e7   : > { %v2595_v63 = vpop.f32.mrb[80].mxu1 }
 0x4e8   : > { %v2866_v2 = vsel %vm612_vm2, %v2595_v63, 0.0  ;;  %v3742_v3 = vpop.f32.mrb[81].mxu1 }
 0x4e9   : > { %v2867_v4 = vadd.f32 %v2866_v2, %v2865_v1  ;;  %v2598_v5 = vpop.f32.mrb[82].mxu1  ;;  %v2926_v1 = vld [vmem:[%s3969_s24] sm:$0xff]  ;;  %v2927_v2 = vld [vmem:[%s3969_s24 + $0x8] sm:$0xff] }
 0x4ea   : > { %v3743_v43 = vpop.f32.mrb[83].mxu1  ;;  %v2931_v3 = vpack.c.bf16 %v2927_v2, %v2926_v1  ;;  %v2929_v5 = vld [vmem:[%s3969_s24 + $0x18] sm:$0xff] }
 0x4eb   : > { %v2641_v45 = vpop.f32.mrb[84].mxu0 }
 0x4ec   : > { %v2868_v7 = vsel %vm612_vm2, %v2641_v45, 0.0  ;;  %v3748_v9 = vpop.f32.mrb[85].mxu0  ;;  %3781 = vmatpush3.bf16.msra.mxu0 %v2931_v3  ;;  %v2986_v45 = vld [vmem:[%s3979_s22] sm:$0xff] }
 0x4ed   : > { %v2869_v11 = vadd.f32 %v2868_v7, %v2867_v4  ;;  %v2644_v12 = vpop.f32.mrb[86].mxu0  ;;  %v2928_v4 = vld [vmem:[%s3969_s24 + $0x10] sm:$0xff]  ;;  %3782 = vmatprep.subr.bf16.mxu0 %v3866_v8  ;;  %v2987_v7 = vld [vmem:[%s3979_s22 + $0x8] sm:$0xff] }
 0x4ee   : > { %v3749_v13 = vpop.f32.mrb[87].mxu0  ;;  %v2932_v43 = vpack.c.bf16 %v2929_v5, %v2928_v4  ;;  %v2988_v9 = vld [vmem:[%s3979_s22 + $0x10] sm:$0xff]  ;;  %v2989_v12 = vld [vmem:[%s3979_s22 + $0x18] sm:$0xff] }
 0x4ef   : > { %v2687_v14 = vpop.f32.mrb[84].mxu1  ;;  %v2996_v13 = vpack.c.bf16 %v2989_v12, %v2988_v9 }
 0x4f0   : > { %v2870_v16 = vsel %vm612_vm2, %v2687_v14, 0.0  ;;  %v3754_v17 = vpop.f32.mrb[85].mxu1  ;;  %3783 = vmatpush3.bf16.msra.mxu0 %v2932_v43 }
 0x4f1   : > { %v2871_v18 = vadd.f32 %v2870_v16, %v2869_v11  ;;  %v2690_v20 = vpop.f32.mrb[86].mxu1  ;;  %v2995_v11 = vpack.c.bf16 %v2987_v7, %v2986_v45 }
 0x4f2   : > { %v3755_v19 = vpop.f32.mrb[87].mxu1 }
 0x4f3   : > { %v2883_v23 = vadd.f32 %v2882_v15, %v2871_v18  ;;  %v2730_v24 = vpop.f32.mrb[88].mxu0  ;;  %3789 = vmatpush3.bf16.msra.mxu1 %v2995_v11  ;;  %v2916_v19 = vsub.s32 1, %v4401_v0 }
 0x4f4   : > { %v3760_v26 = vpop.f32.mrb[89].mxu0  ;;  %v2872_v36 = vsel %vm612_vm2, %v2730_v24, 0.0  ;;  %3790 = vmatprep.subr.bf16.mxu1 %v3866_v8 }
 0x4f5   : > { %v2733_v21 = vpop.f32.mrb[90].mxu0  ;;  %v2885_v30 = vadd.f32 %v3852_v28, %v2883_v23  ;;  %v2917_v24 = vrot.slane %v4408_v10, %v2916_v19 }
 0x4f6   : > { %v3761_v31 = vpop.f32.mrb[91].mxu0  ;;  %v2922_v21 = vsub.s32 2, %v4401_v0 }
 0x4f7   : > { %v2773_v33 = vpop.f32.mrb[88].mxu1  ;;  %v2887_v34 = vsel %vm612_vm2, %v2885_v30, 0.0  ;;  %3791 = vmatpush3.bf16.msra.mxu1 %v2996_v13 }
 0x4f8   : > { %v2873_v38 = vsel %vm612_vm2, %v2773_v33, 0.0  ;;  %v3766_v27 = vpop.f32.mrb[89].mxu1  ;;  %2888 = vadd.xlane.f32.xlu0 %v2887_v34  ;;  %3792 = vmatprep.subr.bf16.mxu1 %v3866_v8  ;;  %v2923_v33 = vrot.slane %v4408_v10, %v2922_v21 }
 0x4f9   : > { %v2874_v40 = vadd.f32 %v2873_v38, %v2872_v36  ;;  %v2776_v22 = vpop.f32.mrb[90].mxu1 }
 0x4fa   : > { %v3767_v25 = vpop.f32.mrb[91].mxu1  ;;  %v2991_v22 = vld [vmem:[%s3979_s22 + $0x28] sm:$0xff] }
 0x4fb   : > { %v2816_v41 = vpop.f32.mrb[92].mxu0 }
 0x4fc   : > { %v2875_v44 = vsel %vm612_vm2, %v2816_v41, 0.0  ;;  %v3772_v46 = vpop.f32.mrb[93].mxu0  ;;  %v2992_v41 = vld [vmem:[%s3979_s22 + $0x30] sm:$0xff] }
 0x4fd   : > { %v2876_v47 = vadd.f32 %v2875_v44, %v2874_v40  ;;  %v2819_v48 = vpop.f32.mrb[94].mxu0  ;;  %v2990_v40 = vld [vmem:[%s3979_s22 + $0x20] sm:$0xff]  ;;  %v2993_v44 = vld [vmem:[%s3979_s22 + $0x38] sm:$0xff] }
 0x4fe   : > { %v3773_v49 = vpop.f32.mrb[95].mxu0  ;;  %v2997_v25 = vpack.c.bf16 %v2991_v22, %v2990_v40  ;;  %v2998_v46 = vpack.c.bf16 %v2993_v44, %v2992_v41 }
 0x4ff   : > { %v2859_v50 = vpop.f32.mrb[92].mxu1 }
 0x500   : > { %v2877_v51 = vsel %vm612_vm2, %v2859_v50, 0.0  ;;  %v3778_v52 = vpop.f32.mrb[93].mxu1  ;;  %3793 = vmatpush3.bf16.msra.mxu1 %v2997_v25 }
 0x501   : > { %v2878_v54 = vadd.f32 %v2877_v51, %v2876_v47  ;;  %v2862_v32 = vpop.f32.mrb[94].mxu1  ;;  %3794 = vmatprep.subr.bf16.mxu1 %v3866_v8  ;;  %v3307_v47 = vld [vmem:[%s474_s20] ss:$0 sm:$0xff]  ;;  %v3001_v8 = vsub.s32 3, %v4401_v0 }
 0x502   : > { %v3779_v55 = vpop.f32.mrb[95].mxu1 }
 0x503   : > { %v2884_v56 = vadd.f32 %v2882_v15, %v2878_v54 }
 0x504   : > { %3795 = vmatpush3.bf16.msra.mxu1 %v2998_v46 }
 0x505   : > { %v2886_v58 = vadd.f32 %v3853_v57, %v2884_v56  ;;  %v3002_v57 = vrot.slane %v4408_v10, %v3001_v8 }
 0x507   : > { %v2890_v39 = vsel %vm612_vm2, %v2886_v58, 0.0 }
 0x508   : > { %2891 = vadd.xlane.f32.xlu1 %v2890_v39 }
 0x585   : > { %v2889_v42 = vpop.xlane.xlu0 %2888 }
 0x586   : > { %v2894_v59 = vmul.f32 0.03125, %v2889_v42 }
 0x588   : > { %v2896_v60 = vsub.f32 %v2885_v30, %v2894_v59 }
 0x58a   : > { %v2898_v53 = vmul.f32 %v2896_v60, %v2896_v60 }
 0x58c   : > { %v2900_v61 = vsel %vm612_vm2, %v2898_v53, 0.0 }
 0x58d   : > { %2901 = vadd.xlane.f32.xlu0 %v2900_v61 }
 0x595   : > { %v2892_v62 = vpop.xlane.xlu1 %2891 }
 0x596   : > { %v2895_v35 = vmul.f32 0.03125, %v2892_v62 }
 0x598   : > { %v2897_v37 = vsub.f32 %v2886_v58, %v2895_v35 }
 0x59a   : > { %v2899_v29 = vmul.f32 %v2897_v37, %v2897_v37 }
 0x59c   : > { %v2903_v63 = vsel %vm612_vm2, %v2899_v29, 0.0 }
 0x59d   : > { %2904 = vadd.xlane.f32.xlu1 %v2903_v63 }
 0x61a   : > { %v2902_v14 = vpop.xlane.xlu0 %2901 }
 0x61b   : > { %v2906_v15 = vmul.f32 0.03125, %v2902_v14 }
 0x61d   : > { %v2908_v16 = vadd.f32 1e-05, %v2906_v15 }
 0x61f   : > { %3844 = vrsqrt.f32 %v2908_v16  ;;  %v3078_v16 = vsub.s32 4, %v4401_v0 }
 0x629   : > { %v3845_v23 = vpop.eup %3844 }
 0x62a   : > { %v2905_v17 = vpop.xlane.xlu1 %2904  ;;  %v2912_v26 = vmul.f32 %v3845_v23, %v2896_v60 }
 0x62b   : > { %v2907_v18 = vmul.f32 0.03125, %v2905_v17  ;;  %v3084_v17 = vsub.s32 5, %v4401_v0 }
 0x62c   : > { %v2918_v30 = vmul.f32 %v2917_v24, %v2912_v26 }
 0x62d   : > { %v2909_v20 = vadd.f32 1e-05, %v2907_v18  ;;  %v3079_v18 = vrot.slane %v4408_v10, %v3078_v16  ;;  %v3085_v23 = vrot.slane %v4408_v10, %v3084_v17 }
 0x62e   : > { %v2924_v36 = vadd.f32 %v2923_v33, %v2918_v30 }
 0x62f   : > { %3846 = vrsqrt.f32 %v2909_v20 }
 0x639   : > { %v3847_v28 = vpop.eup %3846 }
 0x63a   : > { %v2913_v31 = vmul.f32 %v3847_v28, %v2897_v37 }
 0x63c   : > { %v2919_v34 = vmul.f32 %v2917_v24, %v2913_v31 }
 0x63e   : > { %v2925_v38 = vadd.f32 %v2923_v33, %v2919_v34 }
 0x640   : > { %v2930_v27 = vpack.c.bf16 %v2925_v38, %v2924_v36 }
 0x642   : > { %3785 = vmatmul.mubr.msk.bf16.vlgmr.msra.gmra.mrb[96].mxu0 %vm612_vm2, %v2930_v27 }
 0x715   : > { %v2977_v48 = vpop.f32.mrb[96].mxu0 }
 0x716   : > { %v2978_v49 = vadd.f32 %v3307_v47, %v2977_v48  ;;  %v3786_v50 = vpop.f32.mrb[97].mxu0 }
 0x717   : > { %v2980_v51 = vpop.f32.mrb[98].mxu0 }
 0x718   : > { %v2981_v52 = vadd.f32 %v3307_v47, %v2980_v51  ;;  %v3787_v54 = vpop.f32.mrb[99].mxu0  ;;  %v2984_v32 = vmax.f32 %v2978_v49, 0.0 }
 0x71a   : > { %v2985_v55 = vmax.f32 %v2981_v52, 0.0 }
 0x71c   : > { %v2994_v56 = vpack.c.bf16 %v2985_v55, %v2984_v32  ;;  %v3094_v32 = vld [vmem:[%s4495_s10] sm:$0x3] (!%p3310_p5) }
 0x71d   : > { %v3124_v55 = vrot.slane (!%p3310_p5), %v3094_v32, %v2881_v6 }
 0x71e   : > { %3797 = vmatmul.mubr.msk.bf16.vlgmr.msra.gmra.mrb[96].mxu1 %vm3003_vm5, %v2994_v56 }
 0x7f1   : > { %v3041_v58 = vpop.f32.mrb[96].mxu1 }
 0x7f2   : > { %v3042_v39 = vadd.f32 %v3041_v58, %v3002_v57  ;;  %v3798_v42 = vpop.f32.mrb[97].mxu1 }
 0x7f3   : > { %v3044_v59 = vpop.f32.mrb[98].mxu1 }
 0x7f4   : > { %v3045_v60 = vadd.f32 %v3044_v59, %v3002_v57  ;;  %v3799_v53 = vpop.f32.mrb[99].mxu1  ;;  %v3048_v61 = vadd.f32 %v3042_v39, %v2924_v36  ;;  %v3130_v57 = vrot.slane (!%p3310_p5), %v3094_v32, %v2916_v19 }
 0x7f6   : > { %v3050_v62 = vsel %vm612_vm2, %v3048_v61, 0.0  ;;  %v3049_v35 = vadd.f32 %v3045_v60, %v2925_v38 }
 0x7f7   : > { %3051 = vadd.xlane.f32.xlu0 %v3050_v62 }
 0x7f8   : > { %v3053_v37 = vsel %vm612_vm2, %v3049_v35, 0.0 }
 0x7f9   : > { %3054 = vadd.xlane.f32.xlu1 %v3053_v37 }
 0x884   : > { %v3052_v29 = vpop.xlane.xlu0 %3051 }
 0x885   : > { %v3056_v63 = vmul.f32 0.03125, %v3052_v29 }
 0x886   : > { %v3055_v1 = vpop.xlane.xlu1 %3054 }
 0x887   : > { %v3058_v2 = vsub.f32 %v3048_v61, %v3056_v63  ;;  %v3057_v3 = vmul.f32 0.03125, %v3055_v1 }
 0x889   : > { %v3059_v4 = vsub.f32 %v3049_v35, %v3057_v3  ;;  %v3060_v5 = vmul.f32 %v3058_v2, %v3058_v2 }
 0x88b   : > { %v3062_v43 = vsel %vm612_vm2, %v3060_v5, 0.0  ;;  %v3061_v45 = vmul.f32 %v3059_v4, %v3059_v4 }
 0x88c   : > { %3063 = vadd.xlane.f32.xlu0 %v3062_v43 }
 0x88d   : > { %v3065_v7 = vsel %vm612_vm2, %v3061_v45, 0.0 }
 0x88e   : > { %3066 = vadd.xlane.f32.xlu1 %v3065_v7 }
 0x919   : > { %v3064_v9 = vpop.xlane.xlu0 %3063 }
 0x91a   : > { %v3068_v11 = vmul.f32 0.03125, %v3064_v9 }
 0x91b   : > { %v3067_v12 = vpop.xlane.xlu1 %3066 }
 0x91c   : > { %v3070_v13 = vadd.f32 1e-05, %v3068_v11  ;;  %v3069_v14 = vmul.f32 0.03125, %v3067_v12 }
 0x91e   : > { %3848 = vrsqrt.f32 %v3070_v13  ;;  %v3071_v15 = vadd.f32 1e-05, %v3069_v14 }
 0x920   : > { %3850 = vrsqrt.f32 %v3071_v15 }
 0x928   : > { %v3849_v20 = vpop.eup %3848 }
 0x929   : > { %v3074_v24 = vmul.f32 %v3849_v20, %v3058_v2 }
 0x92a   : > { %v3851_v26 = vpop.eup %3850 }
 0x92b   : > { %v3080_v21 = vmul.f32 %v3079_v18, %v3074_v24  ;;  %v3075_v28 = vmul.f32 %v3851_v26, %v3059_v4  ;;  %3093 = sbr.rel (%p3310_p5) target bundleno = 2669 (0xa6d), region = 72 }
 0x92d   : > { %v3086_v30 = vadd.f32 %v3085_v23, %v3080_v21  ;;  %v3081_v31 = vmul.f32 %v3079_v18, %v3075_v28 }
 0x92f   : > { %3088 = vst.msk [vmem:[#allocation2] sm:$0xff] %vm612_vm2, %v3086_v30  ;;  %v3087_v33 = vadd.f32 %v3085_v23, %v3081_v31  ;;  %v3095_v34 = vsel (!%p3310_p5), %vm612_vm2, %v3086_v30, 0.0 }
 0x930   : > { %3096 = vadd.xlane.f32.xlu0 (!%p3310_p5), %v3095_v34 }
 0x931   : > { %3089 = vst.msk [vmem:[#allocation2 + $0x8] sm:$0xff] %vm612_vm2, %v3087_v33  ;;  %v3098_v36 = vsel (!%p3310_p5), %vm612_vm2, %v3087_v33, 0.0 }
 0x934   : > { %3099 = vadd.xlane.f32.xlu0 %v3098_v36 }
 0x9bd   : > { %v3097_v10 = vpop.xlane.xlu0 %3096 }
 0x9be   : > { %v3101_v38 = vmul.f32 0.03125, %v3097_v10 }
 0x9c0   : > { %v3103_v27 = vsub.f32 %v3086_v30, %v3101_v38 }
 0x9c1   : > { %v3100_v40 = vpop.xlane.xlu0 %3099 }
 0x9c2   : > { %v3102_v22 = vmul.f32 0.03125, %v3100_v40  ;;  %v3105_v25 = vmul.f32 %v3103_v27, %v3103_v27 }
 0x9c4   : > { %v3104_v41 = vsub.f32 %v3087_v33, %v3102_v22  ;;  %v3107_v44 = vsel %vm612_vm2, %v3105_v25, 0.0 }
 0x9c5   : > { %3108 = vadd.xlane.f32.xlu1 %v3107_v44 }
 0x9c6   : > { %v3106_v46 = vmul.f32 %v3104_v41, %v3104_v41 }
 0x9c8   : > { %v3110_v47 = vsel %vm612_vm2, %v3106_v46, 0.0 }
 0x9c9   : > { %3111 = vadd.xlane.f32.xlu1 %v3110_v47 }
 0xa52   : > { %v3109_v48 = vpop.xlane.xlu1 %3108 }
 0xa53   : > { %v3113_v49 = vmul.f32 0.03125, %v3109_v48 }
 0xa55   : > { %v3115_v50 = vadd.f32 1e-05, %v3113_v49 }
 0xa56   : > { %v3112_v51 = vpop.xlane.xlu1 %3111 }
 0xa57   : > { %3854 = vrsqrt.f32 %v3115_v50  ;;  %v3114_v52 = vmul.f32 0.03125, %v3112_v51 }
 0xa59   : > { %v3116_v54 = vadd.f32 1e-05, %v3114_v52 }
 0xa5b   : > { %3856 = vrsqrt.f32 %v3116_v54 }
 0xa61   : > { %v3855_v56 = vpop.eup %3854 }
 0xa62   : > { %v3119_v8 = vmul.f32 %v3855_v56, %v3103_v27 }
 0xa64   : > { %v3125_v58 = vmul.f32 %v3124_v55, %v3119_v8 }
 0xa65   : > { %v3857_v39 = vpop.eup %3856 }
 0xa66   : > { %v3131_v42 = vadd.f32 %v3130_v57, %v3125_v58  ;;  %v3120_v59 = vmul.f32 %v3857_v39, %v3104_v41 }
 0xa68   : > { %3133 = vst.msk [vmem:[%s4505_s23] sm:$0xff] %vm612_vm2, %v3131_v42  ;;  %v3126_v60 = vmul.f32 %v3124_v55, %v3120_v59 }
 0xa6a   : > { %v3132_v53 = vadd.f32 %v3130_v57, %v3126_v60 }
 0xa6c   : > { %3134 = vst.msk [vmem:[%s4505_s23 + $0x8] sm:$0xff] %vm612_vm2, %v3132_v53 }
 0xa6d PF: > { %s4506_s20 = sld [smem:[#allocation3_spill]] }
 0xa73   : > { %s21_s17 = sadd.s32 1, %s4506_s20  }
 0xa74   : > { %p18_p6 = scmp.ge.s32.totalorder %s21_s17, 4  }
 0xa76   :  { %20 = sbr.rel (!%p18_p6) target bundleno = 4 (0x4), region = 116 }

// kernel: transformer_trans_model_forward.3
= control target key start
LH: loop header
LB: loop body
LE: loop exit
PB: predicated region body
PF: predicated region fallthrough
CT: control target
= control target key end

     0   :  { %s7232_s21 = smov 0   ;;  %s8249_s0 = inlined_call_operand.vmem [shape: f32[2,8,32], index: 0, kind: input, shape index: {}]   ;;  %s8250_s1 = inlined_call_operand.vmem [shape: f32[2,8,32], index: 1, kind: input, shape index: {}]   ;;  %s8251_s2 = inlined_call_operand.vmem [shape: f32[1,8,32], index: 2, kind: input, shape index: {}]   ;;  %s8252_s3 = inlined_call_operand.vmem [shape: f32[2,12,32,8], index: 3, kind: input, shape index: {}]   ;;  %s8253_s4 = inlined_call_operand.vmem [shape: f32[2,12,1,8], index: 4, kind: input, shape index: {}]   ;;  %s8254_s5 = inlined_call_operand.vmem [shape: f32[2,4,8,32], index: 5, kind: input, shape index: {}]   ;;  %s8255_s6 = inlined_call_operand.vmem [shape: f32[2,12,32,8], index: 6, kind: input, shape index: {}]   ;;  %s8256_s7 = inlined_call_operand.vmem [shape: f32[2,12,1,8], index: 7, kind: input, shape index: {}]   ;;  %s8257_s8 = inlined_call_operand.vmem [shape: f32[2,4,8,32], index: 8, kind: input, shape index: {}]   ;;  %s8258_s9 = inlined_call_operand.vmem [shape: f32[2,32,64], index: 9, kind: input, shape index: {}]   ;;  %s8259_s10 = inlined_call_operand.vmem [shape: f32[2,1,64], index: 10, kind: input, shape index: {}]   ;;  %s8260_s11 = inlined_call_operand.vmem [shape: f32[2,64,32], index: 11, kind: input, shape index: {}]   ;;  %s8261_s12 = inlined_call_operand.vmem [shape: f32[2,9,32], index: 12, kind: input, shape index: {}]   ;;  %s8262_s13 = inlined_call_operand.vmem [shape: f32[2,32], index: 13, kind: input, shape index: {}]   ;;  %s8263_s14 = inlined_call_operand.vmem [shape: f32[32,128], index: 14, kind: input, shape index: {}]   ;;  %s8264_s15 = inlined_call_operand.vmem [shape: f32[1,128], index: 15, kind: input, shape index: {}]   ;;  %s8265_s16 = inlined_call_operand.vmem [shape: f32[2,8,128], index: 16, kind: output, shape index: {}]  }
   0x1   :  { %8270 = sst [smem:[#allocation4_spill]] %s8249_s0 }
   0x2   :  { %8271 = sst [smem:[#allocation5_spill]] %s8252_s3 }
   0x3   :  { %8272 = sst [smem:[#allocation6_spill]] %s8253_s4 }
   0x4   :  { %8273 = sst [smem:[#allocation7_spill]] %s8254_s5 }
   0x5   :  { %8274 = sst [smem:[#allocation8_spill]] %s8255_s6 }
   0x6   :  { %8275 = sst [smem:[#allocation9_spill]] %s8262_s13 }
   0x7   :  { %8276 = sst [smem:[#allocation10_spill]] %s8263_s14 }
   0x8   :  { %8277 = sst [smem:[#allocation11_spill]] %s8264_s15 }
   0x9   :  { %8278 = sst [smem:[#allocation12_spill]] %s8265_s16 }
   0xa LB: > { %8279 = sst [smem:[#allocation3_spill]] %s7141_s21  ;;  %s7238_s22 = sadd.s32 4294967295, %s7141_s21   ;;  %s7141_s21 = sphi %s7232_s21, %s26_s21  }
   0xb   : > { %p5939_p0 = scmp.ge.s32.totalorder %s7141_s21, 1  ;;  %p543_p1 = scmp.lt.s32.totalorder %s7141_s21, 3 }
   0xd   : > { %p544_p2 = pnand %p5939_p0, %p543_p1 }
   0xe   : > { %p629_p3 = scmp.lt.s32.totalorder (!%p544_p2), %s7238_s22, 1  ;;  %s8280_s5 = sld [smem:[#allocation7_spill]] (!%p544_p2) }
   0xf   : > { %547 = sbr.rel (%p544_p2) target bundleno = 4438 (0x1156), region = 84  ;;  %s8281_s3 = sld [smem:[#allocation5_spill]] (!%p544_p2) }
  0x10   : > { %s8282_s6 = sld [smem:[#allocation8_spill]] (!%p544_p2)  ;;  %s8283_s4 = sld [smem:[#allocation6_spill]] (!%p544_p2) }
  0x11   : > { %p5952_p4 = scmp.ne.s32.totalorder (!%p544_p2), %s7238_s22, 0 }
  0x16   : > { %s7244_s23 = scalar_select %p629_p3, %s7238_s22, 1 }
  0x17   : > { %s8284_s0 = sld [smem:[#allocation4_spill]] (!%p5952_p4)  ;;  %v682_v1 = vld [vmem:[%s8251_s2] sm:$0xff] (!%p5952_p4)  ;;  %vm685_vm0 = vcmask (!%p5952_p4), 261120  }
  0x18   : > { %s7038_s24 = smul.u32 384, %s7244_s23  ;;  %s6082_s25 = sshll.u32 %s7244_s23, 5 }
  0x19   : > { %s7039_s26 = smul.u32 12, %s7244_s23  ;;  %s7252_s29 = scalar_lea.vmem %s8280_s5, %s6082_s25 }
  0x1a   : > { %s7257_s17 = scalar_lea.vmem %s8281_s3, %s7038_s24  ;;  %s7262_s20 = scalar_lea.vmem %s8282_s6, %s7038_s24 }
  0x1b   : > { %s7267_s15 = scalar_lea.vmem %s8283_s4, %s7039_s26  ;;  %s7272_s27 = scalar_lea.vmem %s8256_s7, %s7039_s26 }
  0x1c   : > { %s7277_s30 = scalar_lea.vmem %s8257_s8, %s6082_s25  ;;  %s7282_s24 = scalar_lea.vmem %s8258_s9, %s6082_s25 }
  0x1d   : > { %s664_s16 = scalar_lea.vmem %s8259_s10, %s7244_s23  ;;  %s6085_s21 = sshll.u32 %s7244_s23, 6  ;;  %v680_v0 = vld [vmem:[%s8284_s0] sm:$0xff] (!%p5952_p4)  ;;  %v681_v2 = vld [vmem:[%s8284_s0 + $0x8] sm:$0xff] (!%p5952_p4) }
  0x1e   : > { %s7292_s13 = scalar_lea.vmem %s8260_s11, %s6085_s21  ;;  %s6086_s14 = sshll.u32 %s7244_s23, 4  ;;  %v683_v3 = vadd.f32 (!%p5952_p4), %v682_v1, %v680_v0  ;;  %v684_v4 = vadd.f32 (!%p5952_p4), %v682_v1, %v681_v2 }
  0x1f   : > { %s7298_s28 = scalar_lea.vmem %s8261_s12, %s6086_s14  ;;  %679 = sbr.rel (%p5952_p4) target bundleno = 38 (0x26), region = 88 }
  0x20   : > { %686 = vst.msk [vmem:[#allocation2] sm:$0xff] (!%p5952_p4), %vm685_vm0, %v683_v3  ;;  %687 = vst.msk [vmem:[#allocation2 + $0x8] sm:$0xff] (!%p5952_p4), %vm685_vm0, %v684_v4 }
  0x26 PF: > { %v700_v5 = vld [vmem:[%s7257_s17] sm:$0xff]  ;;  %v701_v6 = vld [vmem:[%s7257_s17 + $0x8] sm:$0xff]  ;;  %v7143_v8 = vmov 0.0   ;;  %v702_v11 = vld [vmem:[%s7257_s17 + $0x10] sm:$0xff]  ;;  %vm7144_vm1 = vmmov 0   ;;  %vm814_vm2 = vcmask 261120  }
  0x27   : > { %v704_v7 = vld [vmem:[%s7257_s17 + $0x20] sm:$0xff]  ;;  %6338 = vmatprep.subr.bf16.mxu0 %v7143_v8  ;;  %6346 = vmatprep.subr.bf16.mxu1 %v7143_v8  ;;  %v766_v9 = vpack.c.bf16 %v701_v6, %v700_v5  ;;  %v705_v10 = vld [vmem:[%s7257_s17 + $0x28] sm:$0xff]  ;;  %v703_v12 = vld [vmem:[%s7257_s17 + $0x18] sm:$0xff]  ;;  %vm1845_vm3 = vcmask 64512   ;;  %vm2321_vm4 = vcmask 1043456   ;;  %vm5613_vm6 = vcmask 523264  }
  0x28   : > { %v768_v13 = vpack.c.bf16 %v705_v10, %v704_v7  ;;  %v706_v14 = vld [vmem:[%s7257_s17 + $0x30] sm:$0xff]  ;;  %v707_v15 = vld [vmem:[%s7257_s17 + $0x38] sm:$0xff]  ;;  %6342 = vmatprep.mubr.msk.bf16.mxu0 %vm7144_vm1, %v7143_v8  ;;  %6350 = vmatprep.mubr.msk.bf16.mxu1 %vm7144_vm1, %v7143_v8  ;;  %v767_v16 = vpack.c.bf16 %v703_v12, %v702_v11  ;;  %v688_v17 = vld [vmem:[#allocation2] sm:$0xff]  ;;  %p6077_p5 = scmp.ne.s32.totalorder %s7238_s22, 1 }
  0x29   : > { %6339 = vmatpush3.bf16.msra.mxu0 %v766_v9  ;;  %v769_v18 = vpack.c.bf16 %v707_v15, %v706_v14  ;;  %v708_v19 = vld [vmem:[%s7257_s17 + $0x40] sm:$0xff]  ;;  %v709_v20 = vld [vmem:[%s7257_s17 + $0x48] sm:$0xff]  ;;  %v7330_v23 = vpack.c.bf16 %v688_v17, %v688_v17  ;;  %v710_v26 = vld [vmem:[%s7257_s17 + $0x50] sm:$0xff]  ;;  %vm7146_vm7 = vmmov (!%p6077_p5), 0   ;;  %s8286_s25 = sld [smem:[#allocation9_spill]] (!%p6077_p5)  ;;  %s8287_s4 = sld [smem:[#allocation11_spill]] (!%p6077_p5) }
  0x2a   : > { %6347 = vmatpush3.bf16.msra.mxu1 %v768_v13  ;;  %6340 = vmatprep.subr.bf16.mxu0 %v7143_v8  ;;  %v712_v21 = vld [vmem:[%s7257_s17 + $0x60] sm:$0xff]  ;;  %v713_v22 = vld [vmem:[%s7257_s17 + $0x68] sm:$0xff]  ;;  %v770_v24 = vpack.c.bf16 %v709_v20, %v708_v19  ;;  %v711_v27 = vld [vmem:[%s7257_s17 + $0x58] sm:$0xff] }
  0x2b   : > { %6348 = vmatprep.subr.bf16.mxu1 %v7143_v8  ;;  %v772_v25 = vpack.c.bf16 %v713_v22, %v712_v21  ;;  %v714_v28 = vld [vmem:[%s7257_s17 + $0x70] sm:$0xff]  ;;  %v715_v29 = vld [vmem:[%s7257_s17 + $0x78] sm:$0xff]  ;;  %v771_v30 = vpack.c.bf16 %v711_v27, %v710_v26  ;;  %v689_v32 = vld [vmem:[#allocation2 + $0x8] sm:$0xff] }
  0x2c   : > { %v773_v31 = vpack.c.bf16 %v715_v29, %v714_v28  ;;  %v7360_v33 = vpack.c.bf16 %v689_v32, %v689_v32  ;;  %v716_v34 = vld [vmem:[%s7257_s17 + $0x80] sm:$0xff]  ;;  %v717_v35 = vld [vmem:[%s7257_s17 + $0x88] sm:$0xff]  ;;  %v718_v40 = vld [vmem:[%s7257_s17 + $0x90] sm:$0xff] }
  0x2d   : > { %6341 = vmatpush3.bf16.msra.mxu0 %v767_v16  ;;  %v720_v36 = vld [vmem:[%s7257_s17 + $0xa0] sm:$0xff]  ;;  %v721_v37 = vld [vmem:[%s7257_s17 + $0xa8] sm:$0xff]  ;;  %v774_v38 = vpack.c.bf16 %v717_v35, %v716_v34  ;;  %v719_v41 = vld [vmem:[%s7257_s17 + $0x98] sm:$0xff] }
  0x2e   : > { %6349 = vmatpush3.bf16.msra.mxu1 %v769_v18  ;;  %6354 = vmatprep.subr.bf16.mxu0 %v7143_v8  ;;  %v776_v39 = vpack.c.bf16 %v721_v37, %v720_v36  ;;  %v722_v42 = vld [vmem:[%s7257_s17 + $0xb0] sm:$0xff]  ;;  %v723_v43 = vld [vmem:[%s7257_s17 + $0xb8] sm:$0xff]  ;;  %v775_v44 = vpack.c.bf16 %v719_v41, %v718_v40  ;;  %v724_v46 = vld [vmem:[%s7257_s17 + $0xc0] sm:$0xff] }
  0x2f   : > { %6362 = vmatprep.subr.bf16.mxu1 %v7143_v8  ;;  %v777_v45 = vpack.c.bf16 %v723_v43, %v722_v42  ;;  %v725_v47 = vld [vmem:[%s7257_s17 + $0xc8] sm:$0xff]  ;;  %v728_v48 = vld [vmem:[%s7257_s17 + $0xe0] sm:$0xff]  ;;  %v726_v52 = vld [vmem:[%s7257_s17 + $0xd0] sm:$0xff] }
  0x30   : > { %6343 = vmatmul.mubr.msk.bf16.vlgmr.msra.gmra.mrb[0].mxu0 %vm814_vm2, %v7330_v23  ;;  %v729_v49 = vld [vmem:[%s7257_s17 + $0xe8] sm:$0xff]  ;;  %v778_v50 = vpack.c.bf16 %v725_v47, %v724_v46  ;;  %v727_v53 = vld [vmem:[%s7257_s17 + $0xd8] sm:$0xff]  ;;  %v730_v54 = vld [vmem:[%s7257_s17 + $0xf0] sm:$0xff] }
  0x31   : > { %6351 = vmatmul.mubr.msk.bf16.vlgmr.msra.gmra.mrb[0].mxu1 %vm814_vm2, %v7330_v23  ;;  %6355 = vmatpush3.bf16.msra.mxu0 %v770_v24  ;;  %v780_v51 = vpack.c.bf16 %v729_v49, %v728_v48  ;;  %v731_v55 = vld [vmem:[%s7257_s17 + $0xf8] sm:$0xff]  ;;  %v779_v56 = vpack.c.bf16 %v727_v53, %v726_v52  ;;  %v732_v58 = vld [vmem:[%s7257_s17 + $0x100] sm:$0xff]  ;;  %v733_v59 = vld [vmem:[%s7257_s17 + $0x108] sm:$0xff] }
  0x32   : > { %6363 = vmatpush3.bf16.msra.mxu1 %v772_v25  ;;  %6356 = vmatprep.subr.bf16.mxu0 %v7143_v8  ;;  %v781_v57 = vpack.c.bf16 %v731_v55, %v730_v54  ;;  %v782_v60 = vpack.c.bf16 %v733_v59, %v732_v58  ;;  %v736_v61 = vld [vmem:[%s7257_s17 + $0x120] sm:$0xff]  ;;  %v737_v62 = vld [vmem:[%s7257_s17 + $0x128] sm:$0xff]  ;;  %v734_v0 = vld [vmem:[%s7257_s17 + $0x110] sm:$0xff] }
  0x33   : > { %6364 = vmatprep.subr.bf16.mxu1 %v7143_v8  ;;  %6358 = vmatprep.mubr.msk.bf16.mxu0 %vm7144_vm1, %v7143_v8  ;;  %v784_v63 = vpack.c.bf16 %v737_v62, %v736_v61  ;;  %v735_v1 = vld [vmem:[%s7257_s17 + $0x118] sm:$0xff]  ;;  %v738_v3 = vld [vmem:[%s7257_s17 + $0x130] sm:$0xff]  ;;  %v740_v6 = vld [vmem:[%s7257_s17 + $0x140] sm:$0xff] }
  0x34   : > { %6366 = vmatprep.mubr.msk.bf16.mxu1 %vm7144_vm1, %v7143_v8  ;;  %v783_v2 = vpack.c.bf16 %v735_v1, %v734_v0  ;;  %v739_v4 = vld [vmem:[%s7257_s17 + $0x138] sm:$0xff]  ;;  %v741_v7 = vld [vmem:[%s7257_s17 + $0x148] sm:$0xff]  ;;  %v744_v10 = vld [vmem:[%s7257_s17 + $0x160] sm:$0xff] }
  0x35   : > { %6357 = vmatpush3.bf16.msra.mxu0 %v771_v30  ;;  %v785_v5 = vpack.c.bf16 %v739_v4, %v738_v3  ;;  %v745_v11 = vld [vmem:[%s7257_s17 + $0x168] sm:$0xff]  ;;  %v743_v14 = vld [vmem:[%s7257_s17 + $0x158] sm:$0xff]  ;;  %v5966_v52 = vld [vmem:[%s7267_s15 + $0x5] ss:$0 sm:$0xff] }
  0x36   : > { %6365 = vmatpush3.bf16.msra.mxu1 %v773_v31  ;;  %6370 = vmatprep.subr.bf16.mxu0 %v7143_v8  ;;  %v788_v12 = vpack.c.bf16 %v745_v11, %v744_v10  ;;  %v747_v17 = vld [vmem:[%s7257_s17 + $0x178] sm:$0xff] }
  0x37   : > { %6378 = vmatprep.subr.bf16.mxu1 %v7143_v8 }
  0x38   : > { %6359 = vmatmul.mubr.msk.bf16.vlgmr.msra.gmra.mrb[4].mxu0 %vm814_vm2, %v7330_v23 }
  0x39   : > { %6367 = vmatmul.mubr.msk.bf16.vlgmr.msra.gmra.mrb[4].mxu1 %vm814_vm2, %v7330_v23  ;;  %6371 = vmatpush3.bf16.msra.mxu0 %v766_v9  ;;  %v786_v9 = vpack.c.bf16 %v741_v7, %v740_v6  ;;  %v5968_v7 = vld [vmem:[%s7267_s15 + $0x7] ss:$0 sm:$0xff] }
  0x3a   : > { %6379 = vmatpush3.bf16.msra.mxu1 %v768_v13  ;;  %6372 = vmatprep.subr.bf16.mxu0 %v7143_v8  ;;  %v742_v13 = vld [vmem:[%s7257_s17 + $0x150] sm:$0xff] }
  0x3b   : > { %6380 = vmatprep.subr.bf16.mxu1 %v7143_v8  ;;  %6374 = vmatprep.mubr.msk.bf16.mxu0 %vm7144_vm1, %v7143_v8  ;;  %v787_v15 = vpack.c.bf16 %v743_v14, %v742_v13 }
  0x3c   : > { %6382 = vmatprep.mubr.msk.bf16.mxu1 %vm7144_vm1, %v7143_v8 }
  0x3d   : > { %6373 = vmatpush3.bf16.msra.mxu0 %v767_v16  ;;  %v746_v16 = vld [vmem:[%s7257_s17 + $0x170] sm:$0xff] }
  0x3e   : > { %6381 = vmatpush3.bf16.msra.mxu1 %v769_v18  ;;  %6386 = vmatprep.subr.bf16.mxu0 %v7143_v8  ;;  %v789_v18 = vpack.c.bf16 %v747_v17, %v746_v16 }
  0x3f   : > { %6394 = vmatprep.subr.bf16.mxu1 %v7143_v8 }
  0x40   : > { %6375 = vmatmul.mubr.msk.bf16.vlgmr.msra.gmra.mrb[8].mxu0 %vm814_vm2, %v7360_v33 }
  0x41   : > { %6383 = vmatmul.mubr.msk.bf16.vlgmr.msra.gmra.mrb[8].mxu1 %vm814_vm2, %v7360_v33  ;;  %6387 = vmatpush3.bf16.msra.mxu0 %v770_v24 }
  0x42   : > { %6395 = vmatpush3.bf16.msra.mxu1 %v772_v25  ;;  %6388 = vmatprep.subr.bf16.mxu0 %v7143_v8 }
  0x43   : > { %6396 = vmatprep.subr.bf16.mxu1 %v7143_v8  ;;  %6390 = vmatprep.mubr.msk.bf16.mxu0 %vm7144_vm1, %v7143_v8 }
  0x44   : > { %6398 = vmatprep.mubr.msk.bf16.mxu1 %vm7144_vm1, %v7143_v8 }
  0x45   : > { %6389 = vmatpush3.bf16.msra.mxu0 %v771_v30 }
  0x46   : > { %6397 = vmatpush3.bf16.msra.mxu1 %v773_v31  ;;  %6402 = vmatprep.subr.bf16.mxu0 %v7143_v8 }
  0x47   : > { %6410 = vmatprep.subr.bf16.mxu1 %v7143_v8 }
  0x48   : > { %6391 = vmatmul.mubr.msk.bf16.vlgmr.msra.gmra.mrb[12].mxu0 %vm814_vm2, %v7360_v33 }
  0x49   : > { %6399 = vmatmul.mubr.msk.bf16.vlgmr.msra.gmra.mrb[12].mxu1 %vm814_vm2, %v7360_v33  ;;  %6403 = vmatpush3.bf16.msra.mxu0 %v774_v38 }
  0x4a   : > { %6411 = vmatpush3.bf16.msra.mxu1 %v776_v39  ;;  %6404 = vmatprep.subr.bf16.mxu0 %v7143_v8 }
  0x4b   : > { %6412 = vmatprep.subr.bf16.mxu1 %v7143_v8  ;;  %6406 = vmatprep.mubr.msk.bf16.mxu0 %vm7144_vm1, %v7143_v8 }
  0x4c   : > { %6414 = vmatprep.mubr.msk.bf16.mxu1 %vm7144_vm1, %v7143_v8 }
  0x4d   : > { %6405 = vmatpush3.bf16.msra.mxu0 %v775_v44 }
  0x4e   : > { %6413 = vmatpush3.bf16.msra.mxu1 %v777_v45  ;;  %6418 = vmatprep.subr.bf16.mxu0 %v7143_v8 }
  0x4f   : > { %6426 = vmatprep.subr.bf16.mxu1 %v7143_v8 }
  0x50   : > { %6407 = vmatmul.mubr.msk.bf16.vlgmr.msra.gmra.mrb[16].mxu0 %vm814_vm2, %v7330_v23 }
  0x51   : > { %6415 = vmatmul.mubr.msk.bf16.vlgmr.msra.gmra.mrb[16].mxu1 %vm814_vm2, %v7330_v23  ;;  %6419 = vmatpush3.bf16.msra.mxu0 %v778_v50 }
  0x52   : > { %6427 = vmatpush3.bf16.msra.mxu1 %v780_v51  ;;  %6420 = vmatprep.subr.bf16.mxu0 %v7143_v8 }
  0x53   : > { %6428 = vmatprep.subr.bf16.mxu1 %v7143_v8  ;;  %6422 = vmatprep.mubr.msk.bf16.mxu0 %vm7144_vm1, %v7143_v8 }
  0x54   : > { %6430 = vmatprep.mubr.msk.bf16.mxu1 %vm7144_vm1, %v7143_v8 }
  0x55   : > { %6421 = vmatpush3.bf16.msra.mxu0 %v779_v56 }
  0x56   : > { %6429 = vmatpush3.bf16.msra.mxu1 %v781_v57  ;;  %6434 = vmatprep.subr.bf16.mxu0 %v7143_v8 }
  0x57   : > { %6442 = vmatprep.subr.bf16.mxu1 %v7143_v8 }
  0x58   : > { %6423 = vmatmul.mubr.msk.bf16.vlgmr.msra.gmra.mrb[20].mxu0 %vm814_vm2, %v7330_v23 }
  0x59   : > { %6431 = vmatmul.mubr.msk.bf16.vlgmr.msra.gmra.mrb[20].mxu1 %vm814_vm2, %v7330_v23  ;;  %6435 = vmatpush3.bf16.msra.mxu0 %v774_v38 }
  0x5a   : > { %6443 = vmatpush3.bf16.msra.mxu1 %v776_v39  ;;  %6436 = vmatprep.subr.bf16.mxu0 %v7143_v8 }
  0x5b   : > { %6444 = vmatprep.subr.bf16.mxu1 %v7143_v8  ;;  %6438 = vmatprep.mubr.msk.bf16.mxu0 %vm7144_vm1, %v7143_v8 }
  0x5c   : > { %6446 = vmatprep.mubr.msk.bf16.mxu1 %vm7144_vm1, %v7143_v8 }
  0x5d   : > { %6437 = vmatpush3.bf16.msra.mxu0 %v775_v44 }
  0x5e   : > { %6445 = vmatpush3.bf16.msra.mxu1 %v777_v45  ;;  %6450 = vmatprep.subr.bf16.mxu0 %v7143_v8 }
  0x5f   : > { %6458 = vmatprep.subr.bf16.mxu1 %v7143_v8 }
  0x60   : > { %6439 = vmatmul.mubr.msk.bf16.vlgmr.msra.gmra.mrb[24].mxu0 %vm814_vm2, %v7360_v33 }
  0x61   : > { %6447 = vmatmul.mubr.msk.bf16.vlgmr.msra.gmra.mrb[24].mxu1 %vm814_vm2, %v7360_v33  ;;  %6451 = vmatpush3.bf16.msra.mxu0 %v778_v50 }
  0x62   : > { %6459 = vmatpush3.bf16.msra.mxu1 %v780_v51  ;;  %6452 = vmatprep.subr.bf16.mxu0 %v7143_v8  ;;  %v5965_v51 = vld [vmem:[%s7267_s15 + $0x4] ss:$0 sm:$0xff] }
  0x63   : > { %6460 = vmatprep.subr.bf16.mxu1 %v7143_v8  ;;  %6454 = vmatprep.mubr.msk.bf16.mxu0 %vm7144_vm1, %v7143_v8 }
  0x64   : > { %6462 = vmatprep.mubr.msk.bf16.mxu1 %vm7144_vm1, %v7143_v8 }
  0x65   : > { %6453 = vmatpush3.bf16.msra.mxu0 %v779_v56 }
  0x66   : > { %6461 = vmatpush3.bf16.msra.mxu1 %v781_v57  ;;  %6466 = vmatprep.subr.bf16.mxu0 %v7143_v8 }
  0x67   : > { %6474 = vmatprep.subr.bf16.mxu1 %v7143_v8 }
  0x68   : > { %6455 = vmatmul.mubr.msk.bf16.vlgmr.msra.gmra.mrb[28].mxu0 %vm814_vm2, %v7360_v33 }
  0x69   : > { %6463 = vmatmul.mubr.msk.bf16.vlgmr.msra.gmra.mrb[28].mxu1 %vm814_vm2, %v7360_v33  ;;  %6467 = vmatpush3.bf16.msra.mxu0 %v782_v60 }
  0x6a   : > { %6468 = vmatprep.subr.bf16.mxu0 %v7143_v8  ;;  %6470 = vmatprep.mubr.msk.bf16.mxu0 %vm7144_vm1, %v7143_v8 }
  0x6b   : > { %6478 = vmatprep.mubr.msk.bf16.mxu1 %vm7144_vm1, %v7143_v8  ;;  %6475 = vmatpush3.bf16.msra.mxu1 %v784_v63 }
  0x6c   : > { %6476 = vmatprep.subr.bf16.mxu1 %v7143_v8 }
  0x6d   : > { %6469 = vmatpush3.bf16.msra.mxu0 %v783_v2 }
  0x6e   : > { %6482 = vmatprep.subr.bf16.mxu0 %v7143_v8 }
  0x6f   : > { %6477 = vmatpush3.bf16.msra.mxu1 %v785_v5 }
  0x70   : > { %6471 = vmatmul.mubr.msk.bf16.vlgmr.msra.gmra.mrb[32].mxu0 %vm814_vm2, %v7330_v23  ;;  %6490 = vmatprep.subr.bf16.mxu1 %v7143_v8 }
  0x71   : > { %6483 = vmatpush3.bf16.msra.mxu0 %v786_v9  ;;  %6486 = vmatprep.mubr.msk.bf16.mxu0 %vm7144_vm1, %v7143_v8 }
  0x72   : > { %6479 = vmatmul.mubr.msk.bf16.vlgmr.msra.gmra.mrb[32].mxu1 %vm814_vm2, %v7330_v23  ;;  %6484 = vmatprep.subr.bf16.mxu0 %v7143_v8 }
  0x73   : > { %6491 = vmatpush3.bf16.msra.mxu1 %v788_v12  ;;  %6494 = vmatprep.mubr.msk.bf16.mxu1 %vm7144_vm1, %v7143_v8 }
  0x74   : > { %6492 = vmatprep.subr.bf16.mxu1 %v7143_v8 }
  0x75   : > { %6485 = vmatpush3.bf16.msra.mxu0 %v787_v15 }
  0x76   : > { %6498 = vmatprep.subr.bf16.mxu0 %v7143_v8 }
  0x77   : > { %6493 = vmatpush3.bf16.msra.mxu1 %v789_v18 }
  0x78   : > { %6487 = vmatmul.mubr.msk.bf16.vlgmr.msra.gmra.mrb[36].mxu0 %vm814_vm2, %v7330_v23  ;;  %6506 = vmatprep.subr.bf16.mxu1 %v7143_v8 }
  0x79   : > { %6499 = vmatpush3.bf16.msra.mxu0 %v782_v60  ;;  %6502 = vmatprep.mubr.msk.bf16.mxu0 %vm7144_vm1, %v7143_v8 }
  0x7a   : > { %6495 = vmatmul.mubr.msk.bf16.vlgmr.msra.gmra.mrb[36].mxu1 %vm814_vm2, %v7330_v23  ;;  %6500 = vmatprep.subr.bf16.mxu0 %v7143_v8 }
  0x7b   : > { %6507 = vmatpush3.bf16.msra.mxu1 %v784_v63  ;;  %6510 = vmatprep.mubr.msk.bf16.mxu1 %vm7144_vm1, %v7143_v8  ;;  %v5953_v63 = vld [vmem:[%s7267_s15] ss:$0 sm:$0xff] }
  0x7c   : > { %6508 = vmatprep.subr.bf16.mxu1 %v7143_v8 }
  0x7d   : > { %6501 = vmatpush3.bf16.msra.mxu0 %v783_v2  ;;  %v5954_v2 = vld [vmem:[%s7267_s15 + $0x1] ss:$0 sm:$0xff] }
  0x7e   : > { %6514 = vmatprep.subr.bf16.mxu0 %v7143_v8 }
  0x7f   : > { %6509 = vmatpush3.bf16.msra.mxu1 %v785_v5  ;;  %v5967_v5 = vld [vmem:[%s7267_s15 + $0x6] ss:$0 sm:$0xff] }
  0x80   : > { %6503 = vmatmul.mubr.msk.bf16.vlgmr.msra.gmra.mrb[40].mxu0 %vm814_vm2, %v7360_v33  ;;  %6522 = vmatprep.subr.bf16.mxu1 %v7143_v8 }
  0x81   : > { %6515 = vmatpush3.bf16.msra.mxu0 %v786_v9  ;;  %6518 = vmatprep.mubr.msk.bf16.mxu0 %vm7144_vm1, %v7143_v8 }
  0x82   : > { %6511 = vmatmul.mubr.msk.bf16.vlgmr.msra.gmra.mrb[40].mxu1 %vm814_vm2, %v7360_v33  ;;  %6516 = vmatprep.subr.bf16.mxu0 %v7143_v8 }
  0x83   : > { %6523 = vmatpush3.bf16.msra.mxu1 %v788_v12  ;;  %6526 = vmatprep.mubr.msk.bf16.mxu1 %vm7144_vm1, %v7143_v8 }
  0x84   : > { %6524 = vmatprep.subr.bf16.mxu1 %v7143_v8 }
  0x85   : > { %6517 = vmatpush3.bf16.msra.mxu0 %v787_v15 }
  0x86   : > { %6530 = vmatprep.subr.bf16.mxu0 %v7143_v8 }
  0x87   : > { %6525 = vmatpush3.bf16.msra.mxu1 %v789_v18 }
  0x88   : > { %6519 = vmatmul.mubr.msk.bf16.vlgmr.msra.gmra.mrb[44].mxu0 %vm814_vm2, %v7360_v33  ;;  %6536 = vmatprep.subr.bf16.mxu1 %v7143_v8 }
  0x89   : > { %6532 = vmatprep.mubr.msk.bf16.mxu0 %vm7144_vm1, %v7143_v8 }
  0x8a   : > { %6527 = vmatmul.mubr.msk.bf16.vlgmr.msra.gmra.mrb[44].mxu1 %vm814_vm2, %v7360_v33 }
  0x8b   : > { %6538 = vmatprep.mubr.msk.bf16.mxu1 %vm7144_vm1, %v7143_v8 }
 0x103   : > { %v852_v19 = vpop.f32.mrb[0].mxu0 }
 0x104   : > { %v6344_v20 = vpop.f32.mrb[1].mxu0  ;;  %v892_v21 = vpop.f32.mrb[0].mxu1  ;;  %v853_v6 = vadd.f32 %v5953_v63, %v852_v19 }
 0x105   : > { %v855_v22 = vpop.f32.mrb[2].mxu0  ;;  %v6352_v23 = vpop.f32.mrb[1].mxu1  ;;  %v893_v9 = vadd.f32 %v5954_v2, %v892_v21 }
 0x106   : > { %v6345_v24 = vpop.f32.mrb[3].mxu0  ;;  %v895_v25 = vpop.f32.mrb[2].mxu1  ;;  %v1829_v17 = vpack.c.bf16 %v853_v6, %v853_v6  ;;  %v5955_v23 = vld [vmem:[%s7267_s15 + $0x2] ss:$0 sm:$0xff]  ;;  %v5978_v6 = vld [vmem:[%s7267_s15 + $0x9] ss:$0 sm:$0xff] }
 0x107   : > { %v6353_v26 = vpop.f32.mrb[3].mxu1  ;;  %v1830_v22 = vpack.c.bf16 %v893_v9, %v893_v9 }
 0x108   : > { %v5956_v26 = vld [vmem:[%s7267_s15 + $0x3] ss:$0 sm:$0xff] }
 0x10b   : > { %v7512_v27 = vpop.f32.mrb[4].mxu0 }
 0x10c   : > { %v6360_v28 = vpop.f32.mrb[5].mxu0  ;;  %v7514_v29 = vpop.f32.mrb[4].mxu1 }
 0x10d   : > { %v935_v30 = vpop.f32.mrb[6].mxu0  ;;  %v6368_v31 = vpop.f32.mrb[5].mxu1 }
 0x10e   : > { %v6361_v32 = vpop.f32.mrb[7].mxu0  ;;  %v975_v33 = vpop.f32.mrb[6].mxu1  ;;  %v933_v30 = vadd.f32 %v5955_v23, %v7512_v27  ;;  %v973_v31 = vadd.f32 %v5956_v26, %v7514_v29 }
 0x10f   : > { %v6369_v34 = vpop.f32.mrb[7].mxu1 }
 0x113   : > { %v7516_v35 = vpop.f32.mrb[8].mxu0 }
 0x114   : > { %v6376_v36 = vpop.f32.mrb[9].mxu0  ;;  %v7518_v37 = vpop.f32.mrb[8].mxu1 }
 0x115   : > { %v1018_v38 = vpop.f32.mrb[10].mxu0  ;;  %v6384_v39 = vpop.f32.mrb[9].mxu1 }
 0x116   : > { %v6377_v40 = vpop.f32.mrb[11].mxu0  ;;  %v1058_v41 = vpop.f32.mrb[10].mxu1 }
 0x117   : > { %v6385_v42 = vpop.f32.mrb[11].mxu1  ;;  %v1831_v40 = vpack.c.bf16 %v933_v30, %v933_v30 }
 0x11b   : > { %v7520_v43 = vpop.f32.mrb[12].mxu0 }
 0x11c   : > { %v6392_v44 = vpop.f32.mrb[13].mxu0  ;;  %v7522_v45 = vpop.f32.mrb[12].mxu1 }
 0x11d   : > { %v1098_v46 = vpop.f32.mrb[14].mxu0  ;;  %v6400_v47 = vpop.f32.mrb[13].mxu1 }
 0x11e   : > { %v6393_v48 = vpop.f32.mrb[15].mxu0  ;;  %v1138_v49 = vpop.f32.mrb[14].mxu1  ;;  %v1832_v46 = vpack.c.bf16 %v973_v31, %v973_v31 }
 0x11f   : > { %v6401_v50 = vpop.f32.mrb[15].mxu1 }
 0x120   : > { %v1016_v50 = vadd.f32 %v5953_v63, %v7516_v35 }
 0x123   : > { %v1199_v53 = vpop.f32.mrb[16].mxu0 }
 0x124   : > { %v1200_v54 = vadd.f32 %v5965_v51, %v1199_v53  ;;  %v1239_v55 = vpop.f32.mrb[16].mxu1  ;;  %v6408_v56 = vpop.f32.mrb[17].mxu0 }
 0x125   : > { %v1240_v57 = vadd.f32 %v5966_v52, %v1239_v55  ;;  %v1202_v58 = vpop.f32.mrb[18].mxu0  ;;  %v6416_v59 = vpop.f32.mrb[17].mxu1 }
 0x126   : > { %v1837_v60 = vpack.c.bf16 %v1200_v54, %v1200_v54  ;;  %v6409_v61 = vpop.f32.mrb[19].mxu0  ;;  %v1242_v62 = vpop.f32.mrb[18].mxu1  ;;  %v1833_v58 = vpack.c.bf16 %v1016_v50, %v1016_v50 }
 0x127   : > { %v1838_v0 = vpack.c.bf16 %v1240_v57, %v1240_v57  ;;  %v6417_v1 = vpop.f32.mrb[19].mxu1 }
 0x128   : > { %v1850_v3 = vsel %vm1845_vm3, %v1837_v60, 0 }
 0x129   : > { %v1896_v4 = vsel %vm1845_vm3, %v1838_v0, 0  ;;  %6531 = vmatpush3.bf16.xpose.msra.mxu0 %v1850_v3  ;;  %v1136_v3 = vadd.f32 %v5956_v26, %v7522_v45 }
 0x12a   : > { %6537 = vmatpush3.bf16.xpose.msra.mxu1 %v1896_v4  ;;  %6542 = vmatprep.subr.bf16.mxu0 %v7143_v8 }
 0x12b   : > { %v1279_v10 = vpop.f32.mrb[20].mxu0  ;;  %6548 = vmatprep.subr.bf16.mxu1 %v7143_v8 }
 0x12c   : > { %v1280_v11 = vadd.f32 %v5967_v5, %v1279_v10  ;;  %v1319_v12 = vpop.f32.mrb[20].mxu1  ;;  %v6424_v13 = vpop.f32.mrb[21].mxu0 }
 0x12d   : > { %v1320_v14 = vadd.f32 %v5968_v7, %v1319_v12  ;;  %v1282_v15 = vpop.f32.mrb[22].mxu0  ;;  %v6432_v16 = vpop.f32.mrb[21].mxu1 }
 0x12e   : > { %v1839_v18 = vpack.c.bf16 %v1280_v11, %v1280_v11  ;;  %v6425_v20 = vpop.f32.mrb[23].mxu0  ;;  %v1322_v19 = vpop.f32.mrb[22].mxu1 }
 0x12f   : > { %v1840_v24 = vpack.c.bf16 %v1320_v14, %v1320_v14  ;;  %v6433_v25 = vpop.f32.mrb[23].mxu1 }
 0x130   : > { %v1942_v21 = vsel %vm1845_vm3, %v1839_v18, 0  ;;  %6533 = vmatmul.mubr.msk.bf16.vlgmr.msra.gmra.mrb[48].mxu0 %vm1845_vm3, %v1829_v17 }
 0x131   : > { %v1988_v28 = vsel %vm1845_vm3, %v1840_v24, 0  ;;  %6539 = vmatmul.mubr.msk.bf16.vlgmr.msra.gmra.mrb[48].mxu1 %vm1845_vm3, %v1830_v22  ;;  %6543 = vmatpush3.bf16.xpose.msra.mxu0 %v1942_v21 }
 0x132   : > { %6549 = vmatpush3.bf16.xpose.msra.mxu1 %v1988_v28  ;;  %6544 = vmatprep.mubr.msk.bf16.mxu0 %vm7144_vm1, %v7143_v8 }
 0x133   : > { %v1359_v32 = vpop.f32.mrb[24].mxu0  ;;  %6550 = vmatprep.mubr.msk.bf16.mxu1 %vm7144_vm1, %v7143_v8  ;;  %6554 = vmatprep.subr.bf16.mxu0 %v7143_v8 }
 0x134   : > { %v1360_v33 = vadd.f32 %v5965_v51, %v1359_v32  ;;  %v1399_v34 = vpop.f32.mrb[24].mxu1  ;;  %v6440_v36 = vpop.f32.mrb[25].mxu0  ;;  %6560 = vmatprep.subr.bf16.mxu1 %v7143_v8  ;;  %v1056_v51 = vadd.f32 %v5954_v2, %v7518_v37  ;;  %v1096_v2 = vadd.f32 %v5955_v23, %v7520_v43  ;;  %v5977_v43 = vld [vmem:[%s7267_s15 + $0x8] ss:$0 sm:$0xff] }
 0x135   : > { %v1400_v38 = vadd.f32 %v5966_v52, %v1399_v34  ;;  %v1362_v39 = vpop.f32.mrb[26].mxu0  ;;  %v6448_v27 = vpop.f32.mrb[25].mxu1 }
 0x136   : > { %v1841_v41 = vpack.c.bf16 %v1360_v33, %v1360_v33  ;;  %v6441_v42 = vpop.f32.mrb[27].mxu0  ;;  %v1402_v44 = vpop.f32.mrb[26].mxu1  ;;  %v1834_v62 = vpack.c.bf16 %v1056_v51, %v1056_v51  ;;  %v1835_v4 = vpack.c.bf16 %v1096_v2, %v1096_v2  ;;  %v694_v51 = vlaneseq }
 0x137   : > { %v1842_v29 = vpack.c.bf16 %v1400_v38, %v1400_v38  ;;  %v6449_v47 = vpop.f32.mrb[27].mxu1 }
 0x138   : > { %v2034_v48 = vsel %vm1845_vm3, %v1841_v41, 0  ;;  %6545 = vmatmul.mubr.msk.bf16.vlgmr.msra.gmra.mrb[52].mxu0 %vm1845_vm3, %v1831_v40 }
 0x139   : > { %v2080_v49 = vsel %vm1845_vm3, %v1842_v29, 0  ;;  %6551 = vmatmul.mubr.msk.bf16.vlgmr.msra.gmra.mrb[52].mxu1 %vm1845_vm3, %v1832_v46  ;;  %6555 = vmatpush3.bf16.xpose.msra.mxu0 %v2034_v48 }
 0x13a   : > { %6561 = vmatpush3.bf16.xpose.msra.mxu1 %v2080_v49  ;;  %6556 = vmatprep.mubr.msk.bf16.mxu0 %vm7144_vm1, %v7143_v8 }
 0x13b   : > { %v1439_v52 = vpop.f32.mrb[28].mxu0  ;;  %6562 = vmatprep.mubr.msk.bf16.mxu1 %vm7144_vm1, %v7143_v8  ;;  %6566 = vmatprep.subr.bf16.mxu0 %v7143_v8 }
 0x13c   : > { %v1440_v53 = vadd.f32 %v5967_v5, %v1439_v52  ;;  %v1479_v54 = vpop.f32.mrb[28].mxu1  ;;  %v6456_v55 = vpop.f32.mrb[29].mxu0  ;;  %6572 = vmatprep.subr.bf16.mxu1 %v7143_v8  ;;  %v1836_v5 = vpack.c.bf16 %v1136_v3, %v1136_v3  ;;  %v7596_v52 = vshrl.u32 %v694_v51, 7 }
 0x13d   : > { %v1480_v56 = vadd.f32 %v5968_v7, %v1479_v54  ;;  %v1442_v57 = vpop.f32.mrb[30].mxu0  ;;  %v6464_v35 = vpop.f32.mrb[29].mxu1 }
 0x13e   : > { %v1843_v59 = vpack.c.bf16 %v1440_v53, %v1440_v53  ;;  %v6457_v60 = vpop.f32.mrb[31].mxu0  ;;  %v1482_v61 = vpop.f32.mrb[30].mxu1  ;;  %v697_v53 = vand.u32 127, %v694_v51 }
 0x13f   : > { %v1844_v37 = vpack.c.bf16 %v1480_v56, %v1480_v56  ;;  %v6465_v63 = vpop.f32.mrb[31].mxu1 }
 0x140   : > { %v2126_v0 = vsel %vm1845_vm3, %v1843_v59, 0  ;;  %6557 = vmatmul.mubr.msk.bf16.vlgmr.msra.gmra.mrb[56].mxu0 %vm1845_vm3, %v1833_v58  ;;  %vm698_vm5 = vcmp.gt.s32.totalorder %v697_v53, %v7596_v52 }
 0x141   : > { %v2172_v1 = vsel %vm1845_vm3, %v1844_v37, 0  ;;  %6563 = vmatmul.mubr.msk.bf16.vlgmr.msra.gmra.mrb[56].mxu1 %vm1845_vm3, %v1834_v62  ;;  %6567 = vmatpush3.bf16.xpose.msra.mxu0 %v2126_v0  ;;  %v699_v54 = vsel %vm698_vm5, -1e+09, %v7143_v8 }
 0x142   : > { %6573 = vmatpush3.bf16.xpose.msra.mxu1 %v2172_v1  ;;  %6568 = vmatprep.mubr.msk.bf16.mxu0 %vm7144_vm1, %v7143_v8 }
 0x143   : > { %6574 = vmatprep.mubr.msk.bf16.mxu1 %vm7144_vm1, %v7143_v8  ;;  %6578 = vmatprep.subr.bf16.mxu0 %v7143_v8  ;;  %v1543_v45 = vpop.f32.mrb[32].mxu0 }
 0x144   : > { %6584 = vmatprep.subr.bf16.mxu1 %v7143_v8  ;;  %v1544_v7 = vadd.f32 %v5977_v43, %v1543_v45  ;;  %v6472_v9 = vpop.f32.mrb[33].mxu0 }
 0x145   : > { %v1546_v10 = vpop.f32.mrb[34].mxu0  ;;  %v1583_v11 = vpop.f32.mrb[32].mxu1 }
 0x146   : > { %v2310_v12 = vpack.c.bf16 %v1544_v7, %v1544_v7  ;;  %v6473_v13 = vpop.f32.mrb[35].mxu0  ;;  %v1584_v14 = vadd.f32 %v5978_v6, %v1583_v11  ;;  %v6480_v15 = vpop.f32.mrb[33].mxu1 }
 0x147   : > { %v1586_v16 = vpop.f32.mrb[34].mxu1 }
 0x148   : > { %6569 = vmatmul.mubr.msk.bf16.vlgmr.msra.gmra.mrb[60].mxu0 %vm1845_vm3, %v1835_v4  ;;  %v2323_v17 = vsel %vm2321_vm4, %v2310_v12, 0  ;;  %v2311_v18 = vpack.c.bf16 %v1584_v14, %v1584_v14  ;;  %v6481_v20 = vpop.f32.mrb[35].mxu1 }
 0x149   : > { %6575 = vmatmul.mubr.msk.bf16.vlgmr.msra.gmra.mrb[60].mxu1 %vm1845_vm3, %v1836_v5  ;;  %6580 = vmatprep.mubr.msk.bf16.mxu0 %vm7144_vm1, %v7143_v8 }
 0x14a   : > { %6586 = vmatprep.mubr.msk.bf16.mxu1 %vm7144_vm1, %v7143_v8  ;;  %6579 = vmatpush3.bf16.msra.mxu0 %v2323_v17  ;;  %v2369_v19 = vsel %vm2321_vm4, %v2311_v18, 0 }
 0x14b   : > { %6590 = vmatprep.subr.bf16.mxu0 %v7143_v8  ;;  %v7583_v22 = vpop.f32.mrb[36].mxu0  ;;  %6585 = vmatpush3.bf16.msra.mxu1 %v2369_v19 }
 0x14c   : > { %v6488_v23 = vpop.f32.mrb[37].mxu0  ;;  %6596 = vmatprep.subr.bf16.mxu1 %v7143_v8 }
 0x14d   : > { %v1626_v24 = vpop.f32.mrb[38].mxu0  ;;  %v7586_v25 = vpop.f32.mrb[36].mxu1 }
 0x14e   : > { %v6489_v26 = vpop.f32.mrb[39].mxu0  ;;  %v6496_v21 = vpop.f32.mrb[37].mxu1 }
 0x14f   : > { %v1666_v28 = vpop.f32.mrb[38].mxu1 }
 0x150   : > { %v6497_v30 = vpop.f32.mrb[39].mxu1 }
 0x153   : > { %v1703_v31 = vpop.f32.mrb[40].mxu0 }
 0x154   : > { %v7588_v32 = vadd.f32 %v5977_v43, %v1703_v31  ;;  %v6504_v33 = vpop.f32.mrb[41].mxu0 }
 0x155   : > { %v1706_v34 = vpop.f32.mrb[42].mxu0  ;;  %v1743_v36 = vpop.f32.mrb[40].mxu1 }
 0x156   : > { %v6505_v38 = vpop.f32.mrb[43].mxu0  ;;  %v7590_v39 = vadd.f32 %v5978_v6, %v1743_v36  ;;  %v6512_v27 = vpop.f32.mrb[41].mxu1 }
 0x157   : > { %v1746_v40 = vpop.f32.mrb[42].mxu1 }
 0x158   : > { %v6513_v41 = vpop.f32.mrb[43].mxu1 }
 0x15b   : > { %v7592_v42 = vpop.f32.mrb[44].mxu0 }
 0x15c   : > { %v6520_v44 = vpop.f32.mrb[45].mxu0 }
 0x15d   : > { %v1786_v46 = vpop.f32.mrb[46].mxu0  ;;  %v7594_v29 = vpop.f32.mrb[44].mxu1 }
 0x15e   : > { %v6521_v47 = vpop.f32.mrb[47].mxu0  ;;  %v6528_v48 = vpop.f32.mrb[45].mxu1 }
 0x15f   : > { %v1826_v49 = vpop.f32.mrb[46].mxu1 }
 0x160   : > { %v6529_v50 = vpop.f32.mrb[47].mxu1 }
 0x203   : > { %v1886_v55 = vpop.f32.mrb[48].mxu0 }
 0x204   : > { %v1887_v56 = vadd.f32 %v1886_v55, %v699_v54  ;;  %v1932_v57 = vpop.f32.mrb[48].mxu1  ;;  %v6534_v35 = vpop.f32.mrb[49].mxu0 }
 0x205   : > { %v6540_v58 = vpop.f32.mrb[49].mxu1  ;;  %v1889_v59 = vpop.f32.mrb[50].mxu0  ;;  %v1933_v60 = vadd.f32 %v1932_v57, %v699_v54 }
 0x206   : > { %v1935_v61 = vpop.f32.mrb[50].mxu1  ;;  %v6535_v62 = vpop.f32.mrb[51].mxu0  ;;  %v2214_v37 = vsel %vm1845_vm3, %v1887_v56, -inf }
 0x207   : > { %v6541_v63 = vpop.f32.mrb[51].mxu1  ;;  %2215 = vmax.xlane.f32.xlu0 %v2214_v37  ;;  %v2217_v0 = vsel %vm1845_vm3, %v1933_v60, -inf }
 0x20b   : > { %2218 = vmax.xlane.f32.xlu0 %v2217_v0  ;;  %v1978_v1 = vpop.f32.mrb[52].mxu0 }
 0x20c   : > { %v2024_v2 = vpop.f32.mrb[52].mxu1  ;;  %v1979_v3 = vadd.f32 %v1978_v1, %v699_v54  ;;  %v6546_v4 = vpop.f32.mrb[53].mxu0 }
 0x20d   : > { %v6552_v5 = vpop.f32.mrb[53].mxu1  ;;  %v1981_v43 = vpop.f32.mrb[54].mxu0  ;;  %v2025_v45 = vadd.f32 %v2024_v2, %v699_v54 }
 0x20e   : > { %v2027_v6 = vpop.f32.mrb[54].mxu1  ;;  %v6547_v7 = vpop.f32.mrb[55].mxu0  ;;  %v2220_v9 = vsel %vm1845_vm3, %v1979_v3, -inf }
 0x20f   : > { %v6553_v10 = vpop.f32.mrb[55].mxu1  ;;  %2221 = vmax.xlane.f32.xlu1 %v2220_v9  ;;  %v2223_v11 = vsel %vm1845_vm3, %v2025_v45, -inf }
 0x213   : > { %2224 = vmax.xlane.f32.xlu1 %v2223_v11  ;;  %v2070_v12 = vpop.f32.mrb[56].mxu0 }
 0x214   : > { %v2116_v13 = vpop.f32.mrb[56].mxu1  ;;  %v2071_v14 = vadd.f32 %v2070_v12, %v699_v54  ;;  %v6558_v15 = vpop.f32.mrb[57].mxu0 }
 0x215   : > { %v2117_v16 = vadd.f32 %v2116_v13, %v699_v54  ;;  %v6564_v17 = vpop.f32.mrb[57].mxu1  ;;  %v2073_v18 = vpop.f32.mrb[58].mxu0 }
 0x216   : > { %v2119_v20 = vpop.f32.mrb[58].mxu1  ;;  %v6559_v19 = vpop.f32.mrb[59].mxu0  ;;  %v2226_v23 = vsel %vm1845_vm3, %v2071_v14, -inf }
 0x217   : > { %v6565_v24 = vpop.f32.mrb[59].mxu1  ;;  %v2229_v26 = vsel %vm1845_vm3, %v2117_v16, -inf  ;;  %2227 = vmax.xlane.f32.xlu0 %v2226_v23 }
 0x218   : > { %2230 = vmax.xlane.f32.xlu1 %v2229_v26  ;;  %v5979_v24 = vld [vmem:[%s7267_s15 + $0xa] ss:$0 sm:$0xff] }
 0x219   : > { %v1624_v26 = vadd.f32 %v5979_v24, %v7583_v22 }
 0x21b   : > { %v2162_v21 = vpop.f32.mrb[60].mxu0 }
 0x21c   : > { %v2163_v28 = vadd.f32 %v2162_v21, %v699_v54  ;;  %v2208_v30 = vpop.f32.mrb[60].mxu1  ;;  %v6570_v31 = vpop.f32.mrb[61].mxu0 }
 0x21d   : > { %v2209_v33 = vadd.f32 %v2208_v30, %v699_v54  ;;  %v6576_v34 = vpop.f32.mrb[61].mxu1  ;;  %v2165_v36 = vpop.f32.mrb[62].mxu0  ;;  %v2312_v31 = vpack.c.bf16 %v1624_v26, %v1624_v26 }
 0x21e   : > { %v2211_v38 = vpop.f32.mrb[62].mxu1  ;;  %v6571_v27 = vpop.f32.mrb[63].mxu0  ;;  %v2232_v40 = vsel %vm1845_vm3, %v2163_v28, -inf }
 0x21f   : > { %v6577_v41 = vpop.f32.mrb[63].mxu1  ;;  %v2235_v44 = vsel %vm1845_vm3, %v2209_v33, -inf  ;;  %2233 = vmax.xlane.f32.xlu0 %v2232_v40  ;;  %v2415_v40 = vsel %vm2321_vm4, %v2312_v31, 0 }
 0x220   : > { %2236 = vmax.xlane.f32.xlu1 %v2235_v44 }
 0x294   : > { %v2216_v46 = vpop.xlane.xlu0 %2215 }
 0x295   : > { %v2238_v47 = vsub.f32 %v1887_v56, %v2216_v46 }
 0x297   : > { %v2246_v48 = vmul.f32 1.442695, %v2238_v47 }
 0x298   : > { %v2219_v49 = vpop.xlane.xlu0 %2218 }
 0x299   : > { %7052 = vpow2.f32 %v2246_v48  ;;  %v2239_v50 = vsub.f32 %v1933_v60, %v2219_v49  ;;  %v2314_v49 = vpack.c.bf16 %v7588_v32, %v7588_v32 }
 0x29b   : > { %v2248_v51 = vmul.f32 1.442695, %v2239_v50 }
 0x29c   : > { %v2222_v53 = vpop.xlane.xlu1 %2221 }
 0x29d   : > { %7054 = vpow2.f32 %v2248_v51  ;;  %v2240_v54 = vsub.f32 %v1979_v3, %v2222_v53 }
 0x29f   : > { %v2250_v55 = vmul.f32 1.442695, %v2240_v54  ;;  %v2507_v54 = vsel %vm2321_vm4, %v2314_v49, 0 }
 0x2a0   : > { %v2225_v57 = vpop.xlane.xlu1 %2224 }
 0x2a1   : > { %7056 = vpow2.f32 %v2250_v55  ;;  %v2241_v35 = vsub.f32 %v2025_v45, %v2225_v57  ;;  %v2315_v55 = vpack.c.bf16 %v7590_v39, %v7590_v39  ;;  %v1784_v57 = vadd.f32 %v5979_v24, %v7592_v42 }
 0x2a3   : > { %v7053_v58 = vpop.eup %7052  ;;  %v2252_v59 = vmul.f32 1.442695, %v2241_v35  ;;  %v2553_v39 = vsel %vm2321_vm4, %v2315_v55, 0  ;;  %v2316_v42 = vpack.c.bf16 %v1784_v57, %v1784_v57 }
 0x2a4   : > { %v2228_v61 = vpop.xlane.xlu0 %2227  ;;  %v2262_v62 = vsel %vm1845_vm3, %v7053_v58, 0.0 }
 0x2a5   : > { %7058 = vpow2.f32 %v2252_v59  ;;  %v2231_v37 = vpop.xlane.xlu1 %2230  ;;  %v2242_v56 = vsub.f32 %v2071_v14, %v2228_v61  ;;  %2263 = vadd.xlane.f32.xlu0 %v2262_v62 }
 0x2a6   : > { %v2243_v63 = vsub.f32 %v2117_v16, %v2231_v37 }
 0x2a7   : > { %v7055_v0 = vpop.eup %7054  ;;  %v2254_v60 = vmul.f32 1.442695, %v2242_v56 }
 0x2a8   : > { %v2256_v1 = vmul.f32 1.442695, %v2243_v63  ;;  %v2265_v2 = vsel %vm1845_vm3, %v7055_v0, 0.0 }
 0x2a9   : > { %7060 = vpow2.f32 %v2254_v60  ;;  %2266 = vadd.xlane.f32.xlu1 %v2265_v2  ;;  %v760_v60 = vld [vmem:[%s7252_s29] sm:$0xff] }
 0x2aa   : > { %7062 = vpow2.f32 %v2256_v1  ;;  %v2599_v1 = vsel %vm2321_vm4, %v2316_v42, 0 }
 0x2ab   : > { %v7057_v3 = vpop.eup %7056 }
 0x2ac   : > { %v2234_v4 = vpop.xlane.xlu0 %2233  ;;  %v2268_v5 = vsel %vm1845_vm3, %v7057_v3, 0.0 }
 0x2ad   : > { %v2237_v43 = vpop.xlane.xlu1 %2236  ;;  %v2244_v45 = vsub.f32 %v2163_v28, %v2234_v4  ;;  %2269 = vadd.xlane.f32.xlu0 %v2268_v5  ;;  %v5980_v28 = vld [vmem:[%s7267_s15 + $0xb] ss:$0 sm:$0xff] }
 0x2ae   : > { %v2245_v6 = vsub.f32 %v2209_v33, %v2237_v43  ;;  %v1664_v33 = vadd.f32 %v5980_v28, %v7586_v25  ;;  %v1824_v37 = vadd.f32 %v5980_v28, %v7594_v29 }
 0x2af   : > { %v7059_v7 = vpop.eup %7058  ;;  %v2258_v9 = vmul.f32 1.442695, %v2244_v45 }
 0x2b0   : > { %v2260_v10 = vmul.f32 1.442695, %v2245_v6  ;;  %v2271_v11 = vsel %vm1845_vm3, %v7059_v7, 0.0  ;;  %v2313_v41 = vpack.c.bf16 %v1664_v33, %v1664_v33  ;;  %v2317_v2 = vpack.c.bf16 %v1824_v37, %v1824_v37 }
 0x2b1   : > { %7064 = vpow2.f32 %v2258_v9  ;;  %2272 = vadd.xlane.f32.xlu1 %v2271_v11  ;;  %v761_v11 = vld [vmem:[%s7252_s29 + $0x8] sm:$0xff] }
 0x2b2   : > { %7066 = vpow2.f32 %v2260_v10  ;;  %v2461_v48 = vsel %vm2321_vm4, %v2313_v41, 0  ;;  %v2645_v43 = vsel %vm2321_vm4, %v2317_v2, 0 }
 0x2b3   : > { %v7612_v12 = vpop.eup %7060 }
 0x2b4   : > { %v7614_v13 = vpop.eup %7062  ;;  %v2274_v14 = vsel %vm1845_vm3, %v7612_v12, 0.0 }
 0x2b5   : > { %v2277_v15 = vsel %vm1845_vm3, %v7614_v13, 0.0  ;;  %2275 = vadd.xlane.f32.xlu0 %v2274_v14  ;;  %v762_v14 = vld [vmem:[%s7252_s29 + $0x10] sm:$0xff] }
 0x2b6   : > { %2278 = vadd.xlane.f32.xlu1 %v2277_v15  ;;  %v2689_v15 = vpack.c.bf16 %v762_v14, %v762_v14 }
 0x2bb   : > { %v7620_v16 = vpop.eup %7064 }
 0x2bc   : > { %v7622_v17 = vpop.eup %7066  ;;  %v2280_v18 = vsel %vm1845_vm3, %v7620_v16, 0.0 }
 0x2bd   : > { %v2283_v20 = vsel %vm1845_vm3, %v7622_v17, 0.0  ;;  %2281 = vadd.xlane.f32.xlu0 %v2280_v18 }
 0x2be   : > { %2284 = vadd.xlane.f32.xlu1 %v2283_v20 }
 0x332   : > { %v2264_v19 = vpop.xlane.xlu0 %2263 }
 0x333   : > { %7068 = vrcp.f32 %v2264_v19  ;;  %v2795_v19 = vsel %vm2321_vm4, %v2689_v15, 0 }
 0x336   : > { %v2267_v23 = vpop.xlane.xlu1 %2266 }
 0x337   : > { %7070 = vrcp.f32 %v2267_v23 }
 0x33a   : > { %v2270_v21 = vpop.xlane.xlu0 %2269 }
 0x33b   : > { %7072 = vrcp.f32 %v2270_v21 }
 0x33d   : > { %v7069_v30 = vpop.eup %7068 }
 0x33e   : > { %v2294_v34 = vmul.f32 %v7069_v30, %v7053_v58  ;;  %v2273_v36 = vpop.xlane.xlu1 %2272 }
 0x33f   : > { %7074 = vrcp.f32 %v2273_v36 }
 0x340   : > { %v2302_v38 = vpack.c.bf16 %v2294_v34, %v2294_v34 }
 0x341   : > { %v7071_v27 = vpop.eup %7070 }
 0x342   : > { %v2295_v44 = vmul.f32 %v7071_v27, %v7055_v0  ;;  %6581 = vmatmul.mubr.msk.bf16.vlgmr.msra.gmra.mrb[64].mxu0 %vm1845_vm3, %v2302_v38  ;;  %v2276_v46 = vpop.xlane.xlu0 %2275 }
 0x343   : > { %v2279_v22 = vpop.xlane.xlu1 %2278  ;;  %6591 = vmatpush3.bf16.msra.mxu0 %v2415_v40  ;;  %7076 = vrcp.f32 %v2276_v46  ;;  %6592 = vmatprep.mubr.msk.bf16.mxu0 %vm7144_vm1, %v7143_v8 }
 0x344   : > { %7078 = vrcp.f32 %v2279_v22  ;;  %v2303_v25 = vpack.c.bf16 %v2295_v44, %v2295_v44  ;;  %6602 = vmatprep.subr.bf16.mxu0 %v7143_v8 }
 0x345   : > { %v7073_v47 = vpop.eup %7072 }
 0x346   : > { %v2296_v50 = vmul.f32 %v7073_v47, %v7057_v3  ;;  %6587 = vmatmul.mubr.msk.bf16.vlgmr.msra.gmra.mrb[64].mxu1 %vm1845_vm3, %v2303_v25  ;;  %v2687_v3 = vpack.c.bf16 %v760_v60, %v760_v60 }
 0x347   : > { %6597 = vmatpush3.bf16.msra.mxu1 %v2461_v48  ;;  %6598 = vmatprep.mubr.msk.bf16.mxu1 %vm7144_vm1, %v7143_v8 }
 0x348   : > { %v2304_v51 = vpack.c.bf16 %v2296_v50, %v2296_v50  ;;  %6608 = vmatprep.subr.bf16.mxu1 %v7143_v8  ;;  %v2703_v9 = vsel %vm2321_vm4, %v2687_v3, 0 }
 0x349   : > { %v7075_v53 = vpop.eup %7074 }
 0x34a   : > { %v2297_v35 = vmul.f32 %v7075_v53, %v7059_v7  ;;  %6593 = vmatmul.mubr.msk.bf16.vlgmr.msra.gmra.mrb[68].mxu0 %vm1845_vm3, %v2304_v51  ;;  %v2282_v32 = vpop.xlane.xlu0 %2281 }
 0x34b   : > { %v2285_v58 = vpop.xlane.xlu1 %2284  ;;  %6603 = vmatpush3.bf16.msra.mxu0 %v2507_v54  ;;  %7080 = vrcp.f32 %v2282_v32  ;;  %6604 = vmatprep.mubr.msk.bf16.mxu0 %vm7144_vm1, %v7143_v8 }
 0x34c   : > { %7082 = vrcp.f32 %v2285_v58  ;;  %v2305_v59 = vpack.c.bf16 %v2297_v35, %v2297_v35  ;;  %6614 = vmatprep.subr.bf16.mxu0 %v7143_v8 }
 0x34d   : > { %v7077_v61 = vpop.eup %7076 }
 0x34e   : > { %v7079_v62 = vpop.eup %7078  ;;  %v2298_v56 = vmul.f32 %v7077_v61, %v7612_v12  ;;  %6599 = vmatmul.mubr.msk.bf16.vlgmr.msra.gmra.mrb[68].mxu1 %vm1845_vm3, %v2305_v59  ;;  %v2688_v12 = vpack.c.bf16 %v761_v11, %v761_v11 }
 0x34f   : > { %6609 = vmatpush3.bf16.msra.mxu1 %v2553_v39  ;;  %6610 = vmatprep.mubr.msk.bf16.mxu1 %vm7144_vm1, %v7143_v8  ;;  %v2299_v63 = vmul.f32 %v7079_v62, %v7614_v13 }
 0x350   : > { %v2306_v0 = vpack.c.bf16 %v2298_v56, %v2298_v56  ;;  %6620 = vmatprep.subr.bf16.mxu1 %v7143_v8  ;;  %v2749_v13 = vsel %vm2321_vm4, %v2688_v12, 0 }
 0x351   : > { %v2307_v29 = vpack.c.bf16 %v2299_v63, %v2299_v63 }
 0x352   : > { %6605 = vmatmul.mubr.msk.bf16.vlgmr.msra.gmra.mrb[72].mxu0 %vm1845_vm3, %v2306_v0 }
 0x353   : > { %6615 = vmatpush3.bf16.msra.mxu0 %v2599_v1  ;;  %6616 = vmatprep.mubr.msk.bf16.mxu0 %vm7144_vm1, %v7143_v8 }
 0x354   : > { %6626 = vmatprep.subr.bf16.mxu0 %v7143_v8 }
 0x355   : > { %v7081_v4 = vpop.eup %7080 }
 0x356   : > { %v7083_v5 = vpop.eup %7082  ;;  %v2300_v45 = vmul.f32 %v7081_v4, %v7620_v16  ;;  %6611 = vmatmul.mubr.msk.bf16.vlgmr.msra.gmra.mrb[72].mxu1 %vm1845_vm3, %v2307_v29  ;;  %v763_v16 = vld [vmem:[%s7252_s29 + $0x18] sm:$0xff]  ;;  %s8288_s29 = sld [smem:[#allocation12_spill]] (!%p6077_p5) }
 0x357   : > { %6621 = vmatpush3.bf16.msra.mxu1 %v2645_v43  ;;  %6622 = vmatprep.mubr.msk.bf16.mxu1 %vm7144_vm1, %v7143_v8  ;;  %v2301_v6 = vmul.f32 %v7083_v5, %v7622_v17  ;;  %v2690_v23 = vpack.c.bf16 %v763_v16, %v763_v16 }
 0x358   : > { %v2308_v7 = vpack.c.bf16 %v2300_v45, %v2300_v45  ;;  %6632 = vmatprep.subr.bf16.mxu1 %v7143_v8 }
 0x359   : > { %v2309_v10 = vpack.c.bf16 %v2301_v6, %v2301_v6  ;;  %v2841_v31 = vsel %vm2321_vm4, %v2690_v23, 0 }
 0x35a   : > { %6617 = vmatmul.mubr.msk.bf16.vlgmr.msra.gmra.mrb[76].mxu0 %vm1845_vm3, %v2308_v7 }
 0x35b   : > { %6627 = vmatpush3.bf16.msra.mxu0 %v2703_v9  ;;  %6628 = vmatprep.mubr.msk.bf16.mxu0 %vm7144_vm1, %v7143_v8 }
 0x35c   : > { %6638 = vmatprep.subr.bf16.mxu0 %v7143_v8 }
 0x35e   : > { %6623 = vmatmul.mubr.msk.bf16.vlgmr.msra.gmra.mrb[76].mxu1 %vm1845_vm3, %v2309_v10  ;;  %v3071_v10 = vsub.s32 0, %v7596_v52 }
 0x35f   : > { %6634 = vmatprep.mubr.msk.bf16.mxu1 %vm7144_vm1, %v7143_v8  ;;  %6633 = vmatpush3.bf16.msra.mxu1 %v2749_v13 }
 0x360   : > { %6644 = vmatprep.subr.bf16.mxu1 %v7143_v8 }
 0x415   : > { %v2359_v17 = vpop.f32.mrb[64].mxu0 }
 0x416   : > { %v2691_v18 = vpack.c.bf16 %v2359_v17, %v2359_v17  ;;  %v6582_v20 = vpop.f32.mrb[65].mxu0 }
 0x417   : > { %v2362_v24 = vpop.f32.mrb[66].mxu0 }
 0x418   : > { %v6583_v26 = vpop.f32.mrb[67].mxu0  ;;  %6629 = vmatmul.mubr.msk.bf16.vlgmr.msra.gmra.mrb[80].mxu0 %vm1845_vm3, %v2691_v18 }
 0x419   : > { %v2405_v21 = vpop.f32.mrb[64].mxu1  ;;  %6639 = vmatpush3.bf16.msra.mxu0 %v2795_v19  ;;  %6640 = vmatprep.mubr.msk.bf16.mxu0 %vm7144_vm1, %v7143_v8 }
 0x41a   : > { %v2692_v28 = vpack.c.bf16 %v2405_v21, %v2405_v21  ;;  %v6588_v30 = vpop.f32.mrb[65].mxu1  ;;  %6650 = vmatprep.subr.bf16.mxu0 %v7143_v8 }
 0x41b   : > { %v2408_v33 = vpop.f32.mrb[66].mxu1 }
 0x41c   : > { %v6589_v34 = vpop.f32.mrb[67].mxu1  ;;  %6635 = vmatmul.mubr.msk.bf16.vlgmr.msra.gmra.mrb[80].mxu1 %vm1845_vm3, %v2692_v28  ;;  %v7128_v33 = vld [vmem:[#allocation2] sm:$0xff] }
 0x41d   : > { %v2451_v36 = vpop.f32.mrb[68].mxu0  ;;  %6645 = vmatpush3.bf16.msra.mxu1 %v2841_v31  ;;  %6646 = vmatprep.mubr.msk.bf16.mxu1 %vm7144_vm1, %v7143_v8 }
 0x41e   : > { %v2693_v38 = vpack.c.bf16 %v2451_v36, %v2451_v36  ;;  %v6594_v27 = vpop.f32.mrb[69].mxu0  ;;  %6656 = vmatprep.subr.bf16.mxu1 %v7143_v8 }
 0x41f   : > { %v2454_v40 = vpop.f32.mrb[70].mxu0 }
 0x420   : > { %v6595_v41 = vpop.f32.mrb[71].mxu0  ;;  %6641 = vmatmul.mubr.msk.bf16.vlgmr.msra.gmra.mrb[84].mxu0 %vm1845_vm3, %v2693_v38 }
 0x421   : > { %v2497_v44 = vpop.f32.mrb[68].mxu1  ;;  %6651 = vmatpush3.bf16.msra.mxu0 %v2703_v9  ;;  %6652 = vmatprep.mubr.msk.bf16.mxu0 %vm7144_vm1, %v7143_v8 }
 0x422   : > { %v2694_v46 = vpack.c.bf16 %v2497_v44, %v2497_v44  ;;  %v6600_v22 = vpop.f32.mrb[69].mxu1  ;;  %6662 = vmatprep.subr.bf16.mxu0 %v7143_v8 }
 0x423   : > { %v2500_v25 = vpop.f32.mrb[70].mxu1 }
 0x424   : > { %v6601_v47 = vpop.f32.mrb[71].mxu1  ;;  %6647 = vmatmul.mubr.msk.bf16.vlgmr.msra.gmra.mrb[84].mxu1 %vm1845_vm3, %v2694_v46 }
 0x425   : > { %v2543_v48 = vpop.f32.mrb[72].mxu0  ;;  %6657 = vmatpush3.bf16.msra.mxu1 %v2749_v13  ;;  %6658 = vmatprep.mubr.msk.bf16.mxu1 %vm7144_vm1, %v7143_v8  ;;  %v7723_v13 = vld [vmem:[%s7298_s28] sm:$0xff] }
 0x426   : > { %v2695_v49 = vpack.c.bf16 %v2543_v48, %v2543_v48  ;;  %v6606_v50 = vpop.f32.mrb[73].mxu0  ;;  %6668 = vmatprep.subr.bf16.mxu1 %v7143_v8  ;;  %v3072_v18 = vrot.slane %v7723_v13, %v3071_v10 }
 0x427   : > { %v2546_v51 = vpop.f32.mrb[74].mxu0 }
 0x428   : > { %v6607_v53 = vpop.f32.mrb[75].mxu0  ;;  %6653 = vmatmul.mubr.msk.bf16.vlgmr.msra.gmra.mrb[88].mxu0 %vm1845_vm3, %v2695_v49 }
 0x429   : > { %v2589_v54 = vpop.f32.mrb[72].mxu1  ;;  %6663 = vmatpush3.bf16.msra.mxu0 %v2795_v19  ;;  %6664 = vmatprep.mubr.msk.bf16.mxu0 %vm7144_vm1, %v7143_v8 }
 0x42a   : > { %v2696_v55 = vpack.c.bf16 %v2589_v54, %v2589_v54  ;;  %v6612_v57 = vpop.f32.mrb[73].mxu1  ;;  %6674 = vmatprep.subr.bf16.mxu0 %v7143_v8 }
 0x42b   : > { %v2592_v35 = vpop.f32.mrb[74].mxu1 }
 0x42c   : > { %v6613_v32 = vpop.f32.mrb[75].mxu1  ;;  %6659 = vmatmul.mubr.msk.bf16.vlgmr.msra.gmra.mrb[88].mxu1 %vm1845_vm3, %v2696_v55 }
 0x42d   : > { %v2635_v58 = vpop.f32.mrb[76].mxu0  ;;  %6669 = vmatpush3.bf16.msra.mxu1 %v2841_v31  ;;  %6670 = vmatprep.mubr.msk.bf16.mxu1 %vm7144_vm1, %v7143_v8 }
 0x42e   : > { %v2697_v59 = vpack.c.bf16 %v2635_v58, %v2635_v58  ;;  %v6618_v61 = vpop.f32.mrb[77].mxu0  ;;  %6682 = vmatprep.subr.bf16.mxu1 %v7143_v8 }
 0x42f   : > { %v2638_v62 = vpop.f32.mrb[78].mxu0  ;;  %v7129_v61 = vld [vmem:[#allocation2 + $0x8] sm:$0xff] }
 0x430   : > { %v6619_v39 = vpop.f32.mrb[79].mxu0  ;;  %6665 = vmatmul.mubr.msk.bf16.vlgmr.msra.gmra.mrb[92].mxu0 %vm1845_vm3, %v2697_v59 }
 0x431   : > { %v2681_v42 = vpop.f32.mrb[76].mxu1  ;;  %6678 = vmatprep.mubr.msk.bf16.mxu0 %vm7144_vm1, %v7143_v8 }
 0x432   : > { %v2698_v37 = vpack.c.bf16 %v2681_v42, %v2681_v42  ;;  %v6624_v56 = vpop.f32.mrb[77].mxu1 }
 0x433   : > { %v2684_v63 = vpop.f32.mrb[78].mxu1 }
 0x434   : > { %v6625_v0 = vpop.f32.mrb[79].mxu1  ;;  %6671 = vmatmul.mubr.msk.bf16.vlgmr.msra.gmra.mrb[92].mxu1 %vm1845_vm3, %v2698_v37 }
 0x435   : > { %6686 = vmatprep.mubr.msk.bf16.mxu1 %vm7144_vm1, %v7143_v8 }
 0x4eb   : > { %v2739_v60 = vpop.f32.mrb[80].mxu0 }
 0x4ec   : > { %v6630_v1 = vpop.f32.mrb[81].mxu0  ;;  %v3055_v4 = vsel %vm814_vm2, %v2739_v60, 0.0 }
 0x4ed   : > { %v2742_v2 = vpop.f32.mrb[82].mxu0 }
 0x4ee   : > { %v6631_v29 = vpop.f32.mrb[83].mxu0 }
 0x4ef   : > { %v2785_v3 = vpop.f32.mrb[80].mxu1 }
 0x4f0   : > { %v3056_v5 = vsel %vm814_vm2, %v2785_v3, 0.0  ;;  %v6636_v43 = vpop.f32.mrb[81].mxu1 }
 0x4f1   : > { %v3057_v45 = vadd.f32 %v3056_v5, %v3055_v4  ;;  %v2788_v6 = vpop.f32.mrb[82].mxu1  ;;  %v3116_v4 = vld [vmem:[%s7262_s20] sm:$0xff]  ;;  %v3117_v5 = vld [vmem:[%s7262_s20 + $0x8] sm:$0xff] }
 0x4f2   : > { %v6637_v7 = vpop.f32.mrb[83].mxu1  ;;  %v3120_v43 = vld [vmem:[%s7262_s20 + $0x20] sm:$0xff]  ;;  %v3121_v6 = vld [vmem:[%s7262_s20 + $0x28] sm:$0xff] }
 0x4f3   : > { %v2831_v9 = vpop.f32.mrb[84].mxu0  ;;  %v3186_v7 = vpack.c.bf16 %v3121_v6, %v3120_v43  ;;  %v3143_v6 = vld [vmem:[%s7262_s20 + $0xd8] sm:$0xff] }
 0x4f4   : > { %v3058_v11 = vsel %vm814_vm2, %v2831_v9, 0.0  ;;  %v6642_v12 = vpop.f32.mrb[85].mxu0  ;;  %v3118_v9 = vld [vmem:[%s7262_s20 + $0x10] sm:$0xff] }
 0x4f5   : > { %v3059_v14 = vadd.f32 %v3058_v11, %v3057_v45  ;;  %v2834_v15 = vpop.f32.mrb[86].mxu0  ;;  %v3184_v45 = vpack.c.bf16 %v3117_v5, %v3116_v4  ;;  %6683 = vmatpush3.bf16.msra.mxu1 %v3186_v7  ;;  %v3119_v11 = vld [vmem:[%s7262_s20 + $0x18] sm:$0xff]  ;;  %v3122_v12 = vld [vmem:[%s7262_s20 + $0x30] sm:$0xff] }
 0x4f6   : > { %v6643_v16 = vpop.f32.mrb[87].mxu0  ;;  %6684 = vmatprep.subr.bf16.mxu1 %v7143_v8  ;;  %v3123_v15 = vld [vmem:[%s7262_s20 + $0x38] sm:$0xff] }
 0x4f7   : > { %v2877_v17 = vpop.f32.mrb[84].mxu1  ;;  %6675 = vmatpush3.bf16.msra.mxu0 %v3184_v45  ;;  %v3187_v16 = vpack.c.bf16 %v3123_v15, %v3122_v12 }
 0x4f8   : > { %v3060_v20 = vsel %vm814_vm2, %v2877_v17, 0.0  ;;  %v6648_v19 = vpop.f32.mrb[85].mxu1  ;;  %6676 = vmatprep.subr.bf16.mxu0 %v7143_v8 }
 0x4f9   : > { %v3061_v23 = vadd.f32 %v3060_v20, %v3059_v14  ;;  %v2880_v24 = vpop.f32.mrb[86].mxu1  ;;  %v3185_v14 = vpack.c.bf16 %v3119_v11, %v3118_v9  ;;  %6685 = vmatpush3.bf16.msra.mxu1 %v3187_v16  ;;  %v3106_v19 = vsub.s32 1, %v7596_v52  ;;  %v3147_v9 = vld [vmem:[%s7262_s20 + $0xf8] sm:$0xff] }
 0x4fa   : > { %v6649_v26 = vpop.f32.mrb[87].mxu1  ;;  %6698 = vmatprep.subr.bf16.mxu1 %v7143_v8 }
 0x4fb   : > { %v3073_v21 = vadd.f32 %v3072_v18, %v3061_v23  ;;  %v2920_v28 = vpop.f32.mrb[88].mxu0  ;;  %6677 = vmatpush3.bf16.msra.mxu0 %v3185_v14  ;;  %v3112_v23 = vsub.s32 2, %v7596_v52  ;;  %v3107_v24 = vrot.slane %v7723_v13, %v3106_v19 }
 0x4fc   : > { %v6654_v30 = vpop.f32.mrb[89].mxu0  ;;  %v3062_v40 = vsel %vm814_vm2, %v2920_v28, 0.0  ;;  %6690 = vmatprep.subr.bf16.mxu0 %v7143_v8 }
 0x4fd   : > { %v2923_v31 = vpop.f32.mrb[90].mxu0  ;;  %v3075_v34 = vadd.f32 %v7128_v33, %v3073_v21  ;;  %v3113_v30 = vrot.slane %v7723_v13, %v3112_v23  ;;  %v3124_v33 = vld [vmem:[%s7262_s20 + $0x40] sm:$0xff]  ;;  %v3131_v13 = vld [vmem:[%s7262_s20 + $0x78] sm:$0xff]  ;;  %v3153_v23 = vld [vmem:[%s7262_s20 + $0x128] sm:$0xff] }
 0x4fe   : > { %v6655_v36 = vpop.f32.mrb[91].mxu0 }
 0x4ff   : > { %v2963_v38 = vpop.f32.mrb[88].mxu1  ;;  %v3077_v27 = vsel %vm814_vm2, %v3075_v34, 0.0  ;;  %v3125_v36 = vld [vmem:[%s7262_s20 + $0x48] sm:$0xff] }
 0x500   : > { %v3063_v41 = vsel %vm814_vm2, %v2963_v38, 0.0  ;;  %v6660_v44 = vpop.f32.mrb[89].mxu1  ;;  %3078 = vadd.xlane.f32.xlu0 %v3077_v27  ;;  %v3128_v38 = vld [vmem:[%s7262_s20 + $0x60] sm:$0xff]  ;;  %v3129_v27 = vld [vmem:[%s7262_s20 + $0x68] sm:$0xff] }
 0x501   : > { %v3064_v46 = vadd.f32 %v3063_v41, %v3062_v40  ;;  %v2966_v22 = vpop.f32.mrb[90].mxu1  ;;  %v3188_v44 = vpack.c.bf16 %v3125_v36, %v3124_v33  ;;  %v3156_v33 = vld [vmem:[%s7262_s20 + $0x140] sm:$0xff]  ;;  %v3157_v36 = vld [vmem:[%s7262_s20 + $0x148] sm:$0xff] }
 0x502   : > { %v6661_v25 = vpop.f32.mrb[91].mxu1  ;;  %v3126_v22 = vld [vmem:[%s7262_s20 + $0x50] sm:$0xff] }
 0x503   : > { %v3006_v47 = vpop.f32.mrb[92].mxu0 }
 0x504   : > { %v3065_v48 = vsel %vm814_vm2, %v3006_v47, 0.0  ;;  %v6666_v49 = vpop.f32.mrb[93].mxu0  ;;  %v3127_v47 = vld [vmem:[%s7262_s20 + $0x58] sm:$0xff] }
 0x505   : > { %v3066_v50 = vadd.f32 %v3065_v48, %v3064_v46  ;;  %v3009_v51 = vpop.f32.mrb[94].mxu0  ;;  %v3190_v46 = vpack.c.bf16 %v3129_v27, %v3128_v38  ;;  %v3130_v48 = vld [vmem:[%s7262_s20 + $0x70] sm:$0xff]  ;;  %v3189_v49 = vpack.c.bf16 %v3127_v47, %v3126_v22  ;;  %v3204_v38 = vpack.c.bf16 %v3157_v36, %v3156_v33  ;;  %v3160_v27 = vld [vmem:[%s7262_s20 + $0x160] sm:$0xff]  ;;  %v3159_v22 = vld [vmem:[%s7262_s20 + $0x158] sm:$0xff] }
 0x506   : > { %v6667_v53 = vpop.f32.mrb[95].mxu0  ;;  %v3162_v47 = vld [vmem:[%s7262_s20 + $0x170] sm:$0xff]  ;;  %v6014_v36 = vld [vmem:[%s7272_s27 + $0x1] ss:$0 sm:$0xff] }
 0x507   : > { %v3049_v54 = vpop.f32.mrb[92].mxu1 }
 0x508   : > { %v3067_v55 = vsel %vm814_vm2, %v3049_v54, 0.0  ;;  %v6672_v57 = vpop.f32.mrb[93].mxu1 }
 0x509   : > { %v3068_v35 = vadd.f32 %v3067_v55, %v3066_v50  ;;  %v3052_v32 = vpop.f32.mrb[94].mxu1  ;;  %v3191_v50 = vpack.c.bf16 %v3131_v13, %v3130_v48  ;;  %v3163_v48 = vld [vmem:[%s7262_s20 + $0x178] sm:$0xff] }
 0x50a   : > { %v6673_v58 = vpop.f32.mrb[95].mxu1  ;;  %v3133_v32 = vld [vmem:[%s7262_s20 + $0x88] sm:$0xff]  ;;  %v3207_v13 = vpack.c.bf16 %v3163_v48, %v3162_v47 }
 0x50b   : > { %v3074_v59 = vadd.f32 %v3072_v18, %v3068_v35  ;;  %v3132_v35 = vld [vmem:[%s7262_s20 + $0x80] sm:$0xff] }
 0x50c   : > { %v3136_v58 = vld [vmem:[%s7262_s20 + $0xa0] sm:$0xff] }
 0x50d   : > { %v3076_v62 = vadd.f32 %v7129_v61, %v3074_v59  ;;  %v3137_v59 = vld [vmem:[%s7262_s20 + $0xa8] sm:$0xff]  ;;  %v3192_v61 = vpack.c.bf16 %v3133_v32, %v3132_v35 }
 0x50f   : > { %v3080_v39 = vsel %vm814_vm2, %v3076_v62, 0.0 }
 0x510   : > { %3081 = vadd.xlane.f32.xlu1 %v3080_v39  ;;  %v3134_v39 = vld [vmem:[%s7262_s20 + $0x90] sm:$0xff] }
 0x58d   : > { %v3079_v42 = vpop.xlane.xlu0 %3078 }
 0x58e   : > { %v3084_v37 = vmul.f32 0.03125, %v3079_v42  ;;  %v3135_v42 = vld [vmem:[%s7262_s20 + $0x98] sm:$0xff] }
 0x590   : > { %v3086_v56 = vsub.f32 %v3075_v34, %v3084_v37  ;;  %v3138_v37 = vld [vmem:[%s7262_s20 + $0xb0] sm:$0xff] }
 0x592   : > { %v3088_v63 = vmul.f32 %v3086_v56, %v3086_v56 }
 0x594   : > { %v3090_v0 = vsel %vm814_vm2, %v3088_v63, 0.0  ;;  %v3193_v63 = vpack.c.bf16 %v3135_v42, %v3134_v39 }
 0x595   : > { %3091 = vadd.xlane.f32.xlu0 %v3090_v0 }
 0x59d   : > { %v3082_v60 = vpop.xlane.xlu1 %3081 }
 0x59e   : > { %v3085_v1 = vmul.f32 0.03125, %v3082_v60  ;;  %v690_v60 = vld [vmem:[%s8250_s1] sm:$0xff] }
 0x59f   : > { %v7829_v4 = vpack.c.bf16 %v690_v60, %v690_v60 }
 0x5a0   : > { %v7736_v2 = vsub.f32 %v3076_v62, %v3085_v1  ;;  %v3194_v62 = vpack.c.bf16 %v3137_v59, %v3136_v58  ;;  %v3140_v1 = vld [vmem:[%s7262_s20 + $0xc0] sm:$0xff] }
 0x5a2   : > { %v3089_v29 = vmul.f32 %v7736_v2, %v7736_v2 }
 0x5a4   : > { %v3093_v3 = vsel %vm814_vm2, %v3089_v29, 0.0  ;;  %v3144_v29 = vld [vmem:[%s7262_s20 + $0xe0] sm:$0xff] }
 0x5a5   : > { %3094 = vadd.xlane.f32.xlu1 %v3093_v3  ;;  %v3145_v3 = vld [vmem:[%s7262_s20 + $0xe8] sm:$0xff] }
 0x5a6   : > { %v3198_v43 = vpack.c.bf16 %v3145_v3, %v3144_v29 }
 0x622   : > { %v3092_v17 = vpop.xlane.xlu0 %3091 }
 0x623   : > { %v3096_v18 = vmul.f32 0.03125, %v3092_v17  ;;  %v3149_v17 = vld [vmem:[%s7262_s20 + $0x108] sm:$0xff] }
 0x625   : > { %v3098_v20 = vadd.f32 1e-05, %v3096_v18 }
 0x627   : > { %7084 = vrsqrt.f32 %v3098_v20  ;;  %v3152_v20 = vld [vmem:[%s7262_s20 + $0x120] sm:$0xff] }
 0x631   : > { %v7085_v26 = vpop.eup %7084 }
 0x632   : > { %v3102_v21 = vmul.f32 %v7085_v26, %v3086_v56  ;;  %v3095_v28 = vpop.xlane.xlu1 %3094  ;;  %v3139_v56 = vld [vmem:[%s7262_s20 + $0xb8] sm:$0xff]  ;;  %v3150_v26 = vld [vmem:[%s7262_s20 + $0x110] sm:$0xff] }
 0x633   : > { %v3097_v31 = vmul.f32 0.03125, %v3095_v28  ;;  %v3195_v0 = vpack.c.bf16 %v3139_v56, %v3138_v37 }
 0x634   : > { %v3108_v34 = vmul.f32 %v3107_v24, %v3102_v21  ;;  %v3151_v21 = vld [vmem:[%s7262_s20 + $0x118] sm:$0xff] }
 0x635   : > { %v3099_v40 = vadd.f32 1e-05, %v3097_v31  ;;  %v3201_v28 = vpack.c.bf16 %v3151_v21, %v3150_v26  ;;  %v3155_v31 = vld [vmem:[%s7262_s20 + $0x138] sm:$0xff] }
 0x636   : > { %v7763_v41 = vadd.f32 %v3113_v30, %v3108_v34 }
 0x637   : > { %7086 = vrsqrt.f32 %v3099_v40  ;;  %v3161_v40 = vld [vmem:[%s7262_s20 + $0x168] sm:$0xff] }
 0x638   : > { %v3180_v25 = vpack.c.bf16 %v7763_v41, %v7763_v41 }
 0x63a   : > { %6679 = vmatmul.mubr.msk.bf16.vlgmr.msra.gmra.mrb[96].mxu0 %vm814_vm2, %v3180_v25  ;;  %6687 = vmatmul.mubr.msk.bf16.vlgmr.msra.gmra.mrb[96].mxu1 %vm814_vm2, %v3180_v25 }
 0x63b   : > { %6691 = vmatpush3.bf16.msra.mxu0 %v3188_v44  ;;  %6699 = vmatpush3.bf16.msra.mxu1 %v3190_v46 }
 0x63c   : > { %6692 = vmatprep.subr.bf16.mxu0 %v7143_v8  ;;  %6700 = vmatprep.subr.bf16.mxu1 %v7143_v8 }
 0x63d   : > { %6694 = vmatprep.mubr.msk.bf16.mxu0 %vm7144_vm1, %v7143_v8  ;;  %6702 = vmatprep.mubr.msk.bf16.mxu1 %vm7144_vm1, %v7143_v8 }
 0x63f   : > { %6693 = vmatpush3.bf16.msra.mxu0 %v3189_v49  ;;  %6701 = vmatpush3.bf16.msra.mxu1 %v3191_v50 }
 0x640   : > { %6706 = vmatprep.subr.bf16.mxu0 %v7143_v8  ;;  %6714 = vmatprep.subr.bf16.mxu1 %v7143_v8 }
 0x641   : > { %v7087_v51 = vpop.eup %7086 }
 0x642   : > { %v3103_v53 = vmul.f32 %v7087_v51, %v7736_v2  ;;  %6695 = vmatmul.mubr.msk.bf16.vlgmr.msra.gmra.mrb[100].mxu0 %vm814_vm2, %v3180_v25  ;;  %6703 = vmatmul.mubr.msk.bf16.vlgmr.msra.gmra.mrb[100].mxu1 %vm814_vm2, %v3180_v25  ;;  %v3141_v2 = vld [vmem:[%s7262_s20 + $0xc8] sm:$0xff] }
 0x643   : > { %6707 = vmatpush3.bf16.msra.mxu0 %v3184_v45  ;;  %6715 = vmatpush3.bf16.msra.mxu1 %v3186_v7  ;;  %v3196_v5 = vpack.c.bf16 %v3141_v2, %v3140_v1  ;;  %v3142_v45 = vld [vmem:[%s7262_s20 + $0xd0] sm:$0xff] }
 0x644   : > { %v3109_v54 = vmul.f32 %v3107_v24, %v3103_v53  ;;  %6708 = vmatprep.subr.bf16.mxu0 %v7143_v8  ;;  %6716 = vmatprep.subr.bf16.mxu1 %v7143_v8  ;;  %v3146_v7 = vld [vmem:[%s7262_s20 + $0xf0] sm:$0xff]  ;;  %v3197_v11 = vpack.c.bf16 %v3143_v6, %v3142_v45  ;;  %v3202_v24 = vpack.c.bf16 %v3153_v23, %v3152_v20 }
 0x645   : > { %6710 = vmatprep.mubr.msk.bf16.mxu0 %vm7144_vm1, %v7143_v8  ;;  %6718 = vmatprep.mubr.msk.bf16.mxu1 %vm7144_vm1, %v7143_v8  ;;  %v3199_v12 = vpack.c.bf16 %v3147_v9, %v3146_v7 }
 0x646   : > { %v7790_v55 = vadd.f32 %v3113_v30, %v3109_v54  ;;  %v3154_v30 = vld [vmem:[%s7262_s20 + $0x130] sm:$0xff] }
 0x647   : > { %6709 = vmatpush3.bf16.msra.mxu0 %v3185_v14  ;;  %6717 = vmatpush3.bf16.msra.mxu1 %v3187_v16  ;;  %v691_v14 = vld [vmem:[%s8250_s1 + $0x8] sm:$0xff]  ;;  %v3148_v16 = vld [vmem:[%s7262_s20 + $0x100] sm:$0xff]  ;;  %v3203_v34 = vpack.c.bf16 %v3155_v31, %v3154_v30 }
 0x648   : > { %v3181_v57 = vpack.c.bf16 %v7790_v55, %v7790_v55  ;;  %6722 = vmatprep.subr.bf16.mxu0 %v7143_v8  ;;  %6730 = vmatprep.subr.bf16.mxu1 %v7143_v8  ;;  %v7862_v15 = vpack.c.bf16 %v691_v14, %v691_v14  ;;  %v3200_v18 = vpack.c.bf16 %v3149_v17, %v3148_v16  ;;  %v6025_v14 = vld [vmem:[%s7272_s27 + $0x4] ss:$0 sm:$0xff] }
 0x64a   : > { %6711 = vmatmul.mubr.msk.bf16.vlgmr.msra.gmra.mrb[104].mxu0 %vm814_vm2, %v3181_v57  ;;  %6719 = vmatmul.mubr.msk.bf16.vlgmr.msra.gmra.mrb[104].mxu1 %vm814_vm2, %v3181_v57 }
 0x64b   : > { %6723 = vmatpush3.bf16.msra.mxu0 %v3188_v44  ;;  %6731 = vmatpush3.bf16.msra.mxu1 %v3190_v46  ;;  %v3206_v44 = vpack.c.bf16 %v3161_v40, %v3160_v27  ;;  %v3158_v46 = vld [vmem:[%s7262_s20 + $0x150] sm:$0xff]  ;;  %v6027_v40 = vld [vmem:[%s7272_s27 + $0x6] ss:$0 sm:$0xff] }
 0x64c   : > { %6724 = vmatprep.subr.bf16.mxu0 %v7143_v8  ;;  %6732 = vmatprep.subr.bf16.mxu1 %v7143_v8  ;;  %v3205_v25 = vpack.c.bf16 %v3159_v22, %v3158_v46 }
 0x64d   : > { %6726 = vmatprep.mubr.msk.bf16.mxu0 %vm7144_vm1, %v7143_v8  ;;  %6734 = vmatprep.mubr.msk.bf16.mxu1 %vm7144_vm1, %v7143_v8 }
 0x64f   : > { %6725 = vmatpush3.bf16.msra.mxu0 %v3189_v49  ;;  %6733 = vmatpush3.bf16.msra.mxu1 %v3191_v50 }
 0x650   : > { %6738 = vmatprep.subr.bf16.mxu0 %v7143_v8  ;;  %6746 = vmatprep.subr.bf16.mxu1 %v7143_v8 }
 0x652   : > { %6727 = vmatmul.mubr.msk.bf16.vlgmr.msra.gmra.mrb[108].mxu0 %vm814_vm2, %v3181_v57  ;;  %6735 = vmatmul.mubr.msk.bf16.vlgmr.msra.gmra.mrb[108].mxu1 %vm814_vm2, %v3181_v57 }
 0x653   : > { %6739 = vmatpush3.bf16.msra.mxu0 %v3192_v61  ;;  %6747 = vmatpush3.bf16.msra.mxu1 %v3194_v62 }
 0x654   : > { %6740 = vmatprep.subr.bf16.mxu0 %v7143_v8  ;;  %6748 = vmatprep.subr.bf16.mxu1 %v7143_v8 }
 0x655   : > { %6742 = vmatprep.mubr.msk.bf16.mxu0 %vm7144_vm1, %v7143_v8  ;;  %6750 = vmatprep.mubr.msk.bf16.mxu1 %vm7144_vm1, %v7143_v8 }
 0x657   : > { %6741 = vmatpush3.bf16.msra.mxu0 %v3193_v63  ;;  %6749 = vmatpush3.bf16.msra.mxu1 %v3195_v0 }
 0x658   : > { %6754 = vmatprep.subr.bf16.mxu0 %v7143_v8  ;;  %6762 = vmatprep.subr.bf16.mxu1 %v7143_v8 }
 0x65a   : > { %6743 = vmatmul.mubr.msk.bf16.vlgmr.msra.gmra.mrb[112].mxu0 %vm814_vm2, %v7829_v4  ;;  %6751 = vmatmul.mubr.msk.bf16.vlgmr.msra.gmra.mrb[112].mxu1 %vm814_vm2, %v7829_v4 }
 0x65b   : > { %6755 = vmatpush3.bf16.msra.mxu0 %v3196_v5  ;;  %6763 = vmatpush3.bf16.msra.mxu1 %v3198_v43 }
 0x65c   : > { %6756 = vmatprep.subr.bf16.mxu0 %v7143_v8  ;;  %6764 = vmatprep.subr.bf16.mxu1 %v7143_v8 }
 0x65d   : > { %6758 = vmatprep.mubr.msk.bf16.mxu0 %vm7144_vm1, %v7143_v8  ;;  %6766 = vmatprep.mubr.msk.bf16.mxu1 %vm7144_vm1, %v7143_v8 }
 0x65f   : > { %6757 = vmatpush3.bf16.msra.mxu0 %v3197_v11  ;;  %6765 = vmatpush3.bf16.msra.mxu1 %v3199_v12 }
 0x660   : > { %6770 = vmatprep.subr.bf16.mxu0 %v7143_v8  ;;  %6778 = vmatprep.subr.bf16.mxu1 %v7143_v8 }
 0x662   : > { %6759 = vmatmul.mubr.msk.bf16.vlgmr.msra.gmra.mrb[116].mxu0 %vm814_vm2, %v7829_v4  ;;  %6767 = vmatmul.mubr.msk.bf16.vlgmr.msra.gmra.mrb[116].mxu1 %vm814_vm2, %v7829_v4 }
 0x663   : > { %6771 = vmatpush3.bf16.msra.mxu0 %v3192_v61  ;;  %6779 = vmatpush3.bf16.msra.mxu1 %v3194_v62 }
 0x664   : > { %6772 = vmatprep.subr.bf16.mxu0 %v7143_v8  ;;  %6780 = vmatprep.subr.bf16.mxu1 %v7143_v8 }
 0x665   : > { %6774 = vmatprep.mubr.msk.bf16.mxu0 %vm7144_vm1, %v7143_v8  ;;  %6782 = vmatprep.mubr.msk.bf16.mxu1 %vm7144_vm1, %v7143_v8 }
 0x667   : > { %6773 = vmatpush3.bf16.msra.mxu0 %v3193_v63  ;;  %6781 = vmatpush3.bf16.msra.mxu1 %v3195_v0 }
 0x668   : > { %6786 = vmatprep.subr.bf16.mxu0 %v7143_v8  ;;  %6794 = vmatprep.subr.bf16.mxu1 %v7143_v8 }
 0x66a   : > { %6775 = vmatmul.mubr.msk.bf16.vlgmr.msra.gmra.mrb[120].mxu0 %vm814_vm2, %v7862_v15  ;;  %6783 = vmatmul.mubr.msk.bf16.vlgmr.msra.gmra.mrb[120].mxu1 %vm814_vm2, %v7862_v15 }
 0x66b   : > { %6787 = vmatpush3.bf16.msra.mxu0 %v3196_v5  ;;  %6795 = vmatpush3.bf16.msra.mxu1 %v3198_v43 }
 0x66c   : > { %6788 = vmatprep.subr.bf16.mxu0 %v7143_v8  ;;  %6796 = vmatprep.subr.bf16.mxu1 %v7143_v8 }
 0x66d   : > { %6790 = vmatprep.mubr.msk.bf16.mxu0 %vm7144_vm1, %v7143_v8  ;;  %6798 = vmatprep.mubr.msk.bf16.mxu1 %vm7144_vm1, %v7143_v8 }
 0x66f   : > { %6789 = vmatpush3.bf16.msra.mxu0 %v3197_v11  ;;  %6797 = vmatpush3.bf16.msra.mxu1 %v3199_v12 }
 0x670   : > { %6802 = vmatprep.subr.bf16.mxu0 %v7143_v8  ;;  %6810 = vmatprep.subr.bf16.mxu1 %v7143_v8 }
 0x672   : > { %6791 = vmatmul.mubr.msk.bf16.vlgmr.msra.gmra.mrb[124].mxu0 %vm814_vm2, %v7862_v15  ;;  %6799 = vmatmul.mubr.msk.bf16.vlgmr.msra.gmra.mrb[124].mxu1 %vm814_vm2, %v7862_v15 }
 0x673   : > { %6803 = vmatpush3.bf16.msra.mxu0 %v3200_v18  ;;  %6806 = vmatprep.mubr.msk.bf16.mxu0 %vm7144_vm1, %v7143_v8 }
 0x674   : > { %6804 = vmatprep.subr.bf16.mxu0 %v7143_v8  ;;  %6814 = vmatprep.mubr.msk.bf16.mxu1 %vm7144_vm1, %v7143_v8 }
 0x675   : > { %6811 = vmatpush3.bf16.msra.mxu1 %v3202_v24 }
 0x676   : > { %6812 = vmatprep.subr.bf16.mxu1 %v7143_v8 }
 0x677   : > { %6805 = vmatpush3.bf16.msra.mxu0 %v3201_v28 }
 0x678   : > { %6818 = vmatprep.subr.bf16.mxu0 %v7143_v8 }
 0x679   : > { %6813 = vmatpush3.bf16.msra.mxu1 %v3203_v34 }
 0x67a   : > { %6807 = vmatmul.mubr.msk.bf16.vlgmr.msra.gmra.mrb[128].mxu0 %vm814_vm2, %v7829_v4  ;;  %6826 = vmatprep.subr.bf16.mxu1 %v7143_v8 }
 0x67b   : > { %6819 = vmatpush3.bf16.msra.mxu0 %v3204_v38  ;;  %6822 = vmatprep.mubr.msk.bf16.mxu0 %vm7144_vm1, %v7143_v8 }
 0x67c   : > { %6815 = vmatmul.mubr.msk.bf16.vlgmr.msra.gmra.mrb[128].mxu1 %vm814_vm2, %v7829_v4  ;;  %6820 = vmatprep.subr.bf16.mxu0 %v7143_v8 }
 0x67d   : > { %6827 = vmatpush3.bf16.msra.mxu1 %v3206_v44  ;;  %6830 = vmatprep.mubr.msk.bf16.mxu1 %vm7144_vm1, %v7143_v8 }
 0x67e   : > { %6828 = vmatprep.subr.bf16.mxu1 %v7143_v8 }
 0x67f   : > { %6821 = vmatpush3.bf16.msra.mxu0 %v3205_v25 }
 0x680   : > { %6834 = vmatprep.subr.bf16.mxu0 %v7143_v8 }
 0x681   : > { %6829 = vmatpush3.bf16.msra.mxu1 %v3207_v13 }
 0x682   : > { %6823 = vmatmul.mubr.msk.bf16.vlgmr.msra.gmra.mrb[132].mxu0 %vm814_vm2, %v7829_v4  ;;  %6842 = vmatprep.subr.bf16.mxu1 %v7143_v8 }
 0x683   : > { %6835 = vmatpush3.bf16.msra.mxu0 %v3200_v18  ;;  %6838 = vmatprep.mubr.msk.bf16.mxu0 %vm7144_vm1, %v7143_v8 }
 0x684   : > { %6831 = vmatmul.mubr.msk.bf16.vlgmr.msra.gmra.mrb[132].mxu1 %vm814_vm2, %v7829_v4  ;;  %6836 = vmatprep.subr.bf16.mxu0 %v7143_v8 }
 0x685   : > { %6843 = vmatpush3.bf16.msra.mxu1 %v3202_v24  ;;  %6846 = vmatprep.mubr.msk.bf16.mxu1 %vm7144_vm1, %v7143_v8 }
 0x686   : > { %6844 = vmatprep.subr.bf16.mxu1 %v7143_v8 }
 0x687   : > { %6837 = vmatpush3.bf16.msra.mxu0 %v3201_v28 }
 0x688   : > { %6850 = vmatprep.subr.bf16.mxu0 %v7143_v8 }
 0x689   : > { %6845 = vmatpush3.bf16.msra.mxu1 %v3203_v34  ;;  %v6013_v34 = vld [vmem:[%s7272_s27] ss:$0 sm:$0xff] }
 0x68a   : > { %6839 = vmatmul.mubr.msk.bf16.vlgmr.msra.gmra.mrb[136].mxu0 %vm814_vm2, %v7862_v15  ;;  %6858 = vmatprep.subr.bf16.mxu1 %v7143_v8 }
 0x68b   : > { %6851 = vmatpush3.bf16.msra.mxu0 %v3204_v38  ;;  %6854 = vmatprep.mubr.msk.bf16.mxu0 %vm7144_vm1, %v7143_v8 }
 0x68c   : > { %6847 = vmatmul.mubr.msk.bf16.vlgmr.msra.gmra.mrb[136].mxu1 %vm814_vm2, %v7862_v15  ;;  %6852 = vmatprep.subr.bf16.mxu0 %v7143_v8 }
 0x68d   : > { %6859 = vmatpush3.bf16.msra.mxu1 %v3206_v44  ;;  %6862 = vmatprep.mubr.msk.bf16.mxu1 %vm7144_vm1, %v7143_v8  ;;  %v6028_v44 = vld [vmem:[%s7272_s27 + $0x7] ss:$0 sm:$0xff] }
 0x68e   : > { %6860 = vmatprep.subr.bf16.mxu1 %v7143_v8 }
 0x68f   : > { %6853 = vmatpush3.bf16.msra.mxu0 %v3205_v25 }
 0x690   : > { %6866 = vmatprep.subr.bf16.mxu0 %v7143_v8 }
 0x691   : > { %6861 = vmatpush3.bf16.msra.mxu1 %v3207_v13 }
 0x692   : > { %6855 = vmatmul.mubr.msk.bf16.vlgmr.msra.gmra.mrb[140].mxu0 %vm814_vm2, %v7862_v15  ;;  %6872 = vmatprep.subr.bf16.mxu1 %v7143_v8 }
 0x693   : > { %6868 = vmatprep.mubr.msk.bf16.mxu0 %vm7144_vm1, %v7143_v8 }
 0x694   : > { %6863 = vmatmul.mubr.msk.bf16.vlgmr.msra.gmra.mrb[140].mxu1 %vm814_vm2, %v7862_v15  ;;  %v6026_v15 = vld [vmem:[%s7272_s27 + $0x5] ss:$0 sm:$0xff] }
 0x695   : > { %6874 = vmatprep.mubr.msk.bf16.mxu1 %vm7144_vm1, %v7143_v8 }
 0x70d   : > { %v3269_v49 = vpop.f32.mrb[96].mxu0  ;;  %v3309_v50 = vpop.f32.mrb[96].mxu1 }
 0x70e   : > { %v6680_v51 = vpop.f32.mrb[97].mxu0  ;;  %v6688_v53 = vpop.f32.mrb[97].mxu1  ;;  %v3270_v46 = vadd.f32 %v6013_v34, %v3269_v49  ;;  %v3310_v22 = vadd.f32 %v6014_v36, %v3309_v50 }
 0x70f   : > { %v3272_v54 = vpop.f32.mrb[98].mxu0  ;;  %v3312_v57 = vpop.f32.mrb[98].mxu1 }
 0x710   : > { %v6681_v35 = vpop.f32.mrb[99].mxu0  ;;  %v6689_v32 = vpop.f32.mrb[99].mxu1 }
 0x711   : > { %v4252_v35 = vpack.c.bf16 %v3270_v46, %v3270_v46  ;;  %v4253_v32 = vpack.c.bf16 %v3310_v22, %v3310_v22 }
 0x715   : > { %v7950_v58 = vpop.f32.mrb[100].mxu0  ;;  %v7952_v59 = vpop.f32.mrb[100].mxu1 }
 0x716   : > { %v6696_v61 = vpop.f32.mrb[101].mxu0  ;;  %v6704_v62 = vpop.f32.mrb[101].mxu1 }
 0x717   : > { %v3352_v39 = vpop.f32.mrb[102].mxu0  ;;  %v3392_v42 = vpop.f32.mrb[102].mxu1 }
 0x718   : > { %v6697_v37 = vpop.f32.mrb[103].mxu0  ;;  %v6705_v56 = vpop.f32.mrb[103].mxu1  ;;  %v6015_v39 = vld [vmem:[%s7272_s27 + $0x2] ss:$0 sm:$0xff]  ;;  %v6016_v42 = vld [vmem:[%s7272_s27 + $0x3] ss:$0 sm:$0xff] }
 0x71d   : > { %v7954_v63 = vpop.f32.mrb[104].mxu0  ;;  %v7956_v0 = vpop.f32.mrb[104].mxu1 }
 0x71e   : > { %v6712_v60 = vpop.f32.mrb[105].mxu0  ;;  %v6720_v1 = vpop.f32.mrb[105].mxu1 }
 0x71f   : > { %v3435_v2 = vpop.f32.mrb[106].mxu0  ;;  %v3475_v29 = vpop.f32.mrb[106].mxu1  ;;  %v3350_v60 = vadd.f32 %v6015_v39, %v7950_v58  ;;  %v3390_v1 = vadd.f32 %v6016_v42, %v7952_v59 }
 0x720   : > { %v6713_v3 = vpop.f32.mrb[107].mxu0  ;;  %v6721_v4 = vpop.f32.mrb[107].mxu1 }
 0x721   : > { %v4255_v59 = vpack.c.bf16 %v3390_v1, %v3390_v1 }
 0x725   : > { %v7958_v5 = vpop.f32.mrb[108].mxu0  ;;  %v7960_v43 = vpop.f32.mrb[108].mxu1 }
 0x726   : > { %v6728_v45 = vpop.f32.mrb[109].mxu0  ;;  %v6736_v6 = vpop.f32.mrb[109].mxu1 }
 0x727   : > { %v3515_v7 = vpop.f32.mrb[110].mxu0  ;;  %v3555_v9 = vpop.f32.mrb[110].mxu1 }
 0x728   : > { %v6729_v11 = vpop.f32.mrb[111].mxu0  ;;  %v6737_v12 = vpop.f32.mrb[111].mxu1  ;;  %v4254_v9 = vpack.c.bf16 %v3350_v60, %v3350_v60 }
 0x72d   : > { %v3619_v16 = vpop.f32.mrb[112].mxu0  ;;  %v3659_v17 = vpop.f32.mrb[112].mxu1 }
 0x72e   : > { %v3620_v18 = vadd.f32 %v6025_v14, %v3619_v16  ;;  %v3660_v20 = vadd.f32 %v6026_v15, %v3659_v17  ;;  %v6744_v23 = vpop.f32.mrb[113].mxu0  ;;  %v6752_v24 = vpop.f32.mrb[113].mxu1 }
 0x72f   : > { %v3622_v26 = vpop.f32.mrb[114].mxu0  ;;  %v3662_v21 = vpop.f32.mrb[114].mxu1 }
 0x730   : > { %v4260_v28 = vpack.c.bf16 %v3620_v18, %v3620_v18  ;;  %v4261_v30 = vpack.c.bf16 %v3660_v20, %v3660_v20  ;;  %v6745_v31 = vpop.f32.mrb[115].mxu0  ;;  %v6753_v33 = vpop.f32.mrb[115].mxu1 }
 0x732   : > { %v4272_v38 = vsel %vm1845_vm3, %v4260_v28, 0  ;;  %v4318_v27 = vsel %vm1845_vm3, %v4261_v30, 0 }
 0x733   : > { %6867 = vmatpush3.bf16.xpose.msra.mxu0 %v4272_v38  ;;  %6873 = vmatpush3.bf16.xpose.msra.mxu1 %v4318_v27 }
 0x734   : > { %6878 = vmatprep.subr.bf16.mxu0 %v7143_v8  ;;  %6884 = vmatprep.subr.bf16.mxu1 %v7143_v8 }
 0x735   : > { %v3699_v25 = vpop.f32.mrb[116].mxu0  ;;  %v3739_v47 = vpop.f32.mrb[116].mxu1 }
 0x736   : > { %v3700_v48 = vadd.f32 %v6027_v40, %v3699_v25  ;;  %v3740_v13 = vadd.f32 %v6028_v44, %v3739_v47  ;;  %v6760_v51 = vpop.f32.mrb[117].mxu0  ;;  %v6768_v53 = vpop.f32.mrb[117].mxu1 }
 0x737   : > { %v3702_v54 = vpop.f32.mrb[118].mxu0  ;;  %v3742_v57 = vpop.f32.mrb[118].mxu1 }
 0x738   : > { %v4262_v61 = vpack.c.bf16 %v3700_v48, %v3700_v48  ;;  %v4263_v62 = vpack.c.bf16 %v3740_v13, %v3740_v13  ;;  %v6761_v49 = vpop.f32.mrb[119].mxu0  ;;  %v6769_v50 = vpop.f32.mrb[119].mxu1  ;;  %v6038_v48 = vld [vmem:[%s7272_s27 + $0x9] ss:$0 sm:$0xff] }
 0x73a   : > { %v4364_v37 = vsel %vm1845_vm3, %v4262_v61, 0  ;;  %v4410_v56 = vsel %vm1845_vm3, %v4263_v62, 0  ;;  %6869 = vmatmul.mubr.msk.bf16.vlgmr.msra.gmra.mrb[144].mxu0 %vm1845_vm3, %v4252_v35  ;;  %6875 = vmatmul.mubr.msk.bf16.vlgmr.msra.gmra.mrb[144].mxu1 %vm1845_vm3, %v4253_v32 }
 0x73b   : > { %6879 = vmatpush3.bf16.xpose.msra.mxu0 %v4364_v37  ;;  %6885 = vmatpush3.bf16.xpose.msra.mxu1 %v4410_v56 }
 0x73c   : > { %6880 = vmatprep.mubr.msk.bf16.mxu0 %vm7144_vm1, %v7143_v8  ;;  %6886 = vmatprep.mubr.msk.bf16.mxu1 %vm7144_vm1, %v7143_v8 }
 0x73d   : > { %v3782_v2 = vpop.f32.mrb[120].mxu0  ;;  %v3822_v29 = vpop.f32.mrb[120].mxu1  ;;  %6890 = vmatprep.subr.bf16.mxu0 %v7143_v8  ;;  %6896 = vmatprep.subr.bf16.mxu1 %v7143_v8 }
 0x73e   : > { %v3783_v3 = vadd.f32 %v6025_v14, %v3782_v2  ;;  %v3823_v4 = vadd.f32 %v6026_v15, %v3822_v29  ;;  %v6776_v45 = vpop.f32.mrb[121].mxu0  ;;  %v6784_v6 = vpop.f32.mrb[121].mxu1  ;;  %v3433_v14 = vadd.f32 %v6013_v34, %v7954_v63  ;;  %v3473_v15 = vadd.f32 %v6014_v36, %v7956_v0 }
 0x73f   : > { %v3785_v7 = vpop.f32.mrb[122].mxu0  ;;  %v3825_v58 = vpop.f32.mrb[122].mxu1 }
 0x740   : > { %v4264_v11 = vpack.c.bf16 %v3783_v3, %v3783_v3  ;;  %v4265_v12 = vpack.c.bf16 %v3823_v4, %v3823_v4  ;;  %v6777_v16 = vpop.f32.mrb[123].mxu0  ;;  %v6785_v17 = vpop.f32.mrb[123].mxu1  ;;  %v4256_v33 = vpack.c.bf16 %v3433_v14, %v3433_v14  ;;  %v4257_v0 = vpack.c.bf16 %v3473_v15, %v3473_v15 }
 0x742   : > { %v4456_v18 = vsel %vm1845_vm3, %v4264_v11, 0  ;;  %v4502_v20 = vsel %vm1845_vm3, %v4265_v12, 0  ;;  %6881 = vmatmul.mubr.msk.bf16.vlgmr.msra.gmra.mrb[148].mxu0 %vm1845_vm3, %v4254_v9  ;;  %6887 = vmatmul.mubr.msk.bf16.vlgmr.msra.gmra.mrb[148].mxu1 %vm1845_vm3, %v4255_v59 }
 0x743   : > { %6891 = vmatpush3.bf16.xpose.msra.mxu0 %v4456_v18  ;;  %6897 = vmatpush3.bf16.xpose.msra.mxu1 %v4502_v20 }
 0x744   : > { %6892 = vmatprep.mubr.msk.bf16.mxu0 %vm7144_vm1, %v7143_v8  ;;  %6898 = vmatprep.mubr.msk.bf16.mxu1 %vm7144_vm1, %v7143_v8 }
 0x745   : > { %v3862_v23 = vpop.f32.mrb[124].mxu0  ;;  %v3902_v24 = vpop.f32.mrb[124].mxu1  ;;  %6902 = vmatprep.subr.bf16.mxu0 %v7143_v8  ;;  %6908 = vmatprep.subr.bf16.mxu1 %v7143_v8 }
 0x746   : > { %v3863_v26 = vadd.f32 %v6027_v40, %v3862_v23  ;;  %v3903_v21 = vadd.f32 %v6028_v44, %v3902_v24  ;;  %v6792_v28 = vpop.f32.mrb[125].mxu0  ;;  %v6800_v30 = vpop.f32.mrb[125].mxu1  ;;  %v3513_v40 = vadd.f32 %v6015_v39, %v7958_v5  ;;  %v3553_v44 = vadd.f32 %v6016_v42, %v7960_v43  ;;  %v6037_v5 = vld [vmem:[%s7272_s27 + $0x8] ss:$0 sm:$0xff] }
 0x747   : > { %v3865_v31 = vpop.f32.mrb[126].mxu0  ;;  %v3905_v63 = vpop.f32.mrb[126].mxu1 }
 0x748   : > { %v4266_v34 = vpack.c.bf16 %v3863_v26, %v3863_v26  ;;  %v4267_v36 = vpack.c.bf16 %v3903_v21, %v3903_v21  ;;  %v6793_v38 = vpop.f32.mrb[127].mxu0  ;;  %v6801_v27 = vpop.f32.mrb[127].mxu1  ;;  %v4258_v25 = vpack.c.bf16 %v3513_v40, %v3513_v40  ;;  %v4259_v47 = vpack.c.bf16 %v3553_v44, %v3553_v44 }
 0x74a   : > { %v4548_v46 = vsel %vm1845_vm3, %v4266_v34, 0  ;;  %v4594_v22 = vsel %vm1845_vm3, %v4267_v36, 0  ;;  %6893 = vmatmul.mubr.msk.bf16.vlgmr.msra.gmra.mrb[152].mxu0 %vm1845_vm3, %v4256_v33  ;;  %6899 = vmatmul.mubr.msk.bf16.vlgmr.msra.gmra.mrb[152].mxu1 %vm1845_vm3, %v4257_v0 }
 0x74b   : > { %6903 = vmatpush3.bf16.xpose.msra.mxu0 %v4548_v46  ;;  %6909 = vmatpush3.bf16.xpose.msra.mxu1 %v4594_v22 }
 0x74c   : > { %6904 = vmatprep.mubr.msk.bf16.mxu0 %vm7144_vm1, %v7143_v8  ;;  %6910 = vmatprep.mubr.msk.bf16.mxu1 %vm7144_vm1, %v7143_v8 }
 0x74d   : > { %6914 = vmatprep.subr.bf16.mxu0 %v7143_v8  ;;  %6920 = vmatprep.subr.bf16.mxu1 %v7143_v8  ;;  %v3966_v43 = vpop.f32.mrb[128].mxu0 }
 0x74e   : > { %v3967_v13 = vadd.f32 %v6037_v5, %v3966_v43  ;;  %v6808_v51 = vpop.f32.mrb[129].mxu0 }
 0x74f   : > { %v3969_v53 = vpop.f32.mrb[130].mxu0  ;;  %v4006_v54 = vpop.f32.mrb[128].mxu1 }
 0x750   : > { %v4732_v57 = vpack.c.bf16 %v3967_v13, %v3967_v13  ;;  %v4007_v35 = vadd.f32 %v6038_v48, %v4006_v54  ;;  %v6809_v32 = vpop.f32.mrb[131].mxu0  ;;  %v6816_v61 = vpop.f32.mrb[129].mxu1 }
 0x751   : > { %v4009_v62 = vpop.f32.mrb[130].mxu1 }
 0x752   : > { %6905 = vmatmul.mubr.msk.bf16.vlgmr.msra.gmra.mrb[156].mxu0 %vm1845_vm3, %v4258_v25  ;;  %6911 = vmatmul.mubr.msk.bf16.vlgmr.msra.gmra.mrb[156].mxu1 %vm1845_vm3, %v4259_v47  ;;  %v4744_v49 = vsel %vm2321_vm4, %v4732_v57, 0  ;;  %v4733_v50 = vpack.c.bf16 %v4007_v35, %v4007_v35  ;;  %v6817_v39 = vpop.f32.mrb[131].mxu1 }
 0x753   : > { %6916 = vmatprep.mubr.msk.bf16.mxu0 %vm7144_vm1, %v7143_v8  ;;  %6922 = vmatprep.mubr.msk.bf16.mxu1 %vm7144_vm1, %v7143_v8 }
 0x754   : > { %6915 = vmatpush3.bf16.msra.mxu0 %v4744_v49  ;;  %v4790_v42 = vsel %vm2321_vm4, %v4733_v50, 0 }
 0x755   : > { %6926 = vmatprep.subr.bf16.mxu0 %v7143_v8  ;;  %v8021_v37 = vpop.f32.mrb[132].mxu0  ;;  %6921 = vmatpush3.bf16.msra.mxu1 %v4790_v42 }
 0x756   : > { %v6824_v56 = vpop.f32.mrb[133].mxu0  ;;  %6932 = vmatprep.subr.bf16.mxu1 %v7143_v8 }
 0x757   : > { %v4049_v60 = vpop.f32.mrb[134].mxu0  ;;  %v8024_v1 = vpop.f32.mrb[132].mxu1 }
 0x758   : > { %v6825_v2 = vpop.f32.mrb[135].mxu0  ;;  %v6832_v29 = vpop.f32.mrb[133].mxu1 }
 0x759   : > { %v4089_v3 = vpop.f32.mrb[134].mxu1 }
 0x75a   : > { %v6833_v4 = vpop.f32.mrb[135].mxu1 }
 0x75d   : > { %v4126_v45 = vpop.f32.mrb[136].mxu0 }
 0x75e   : > { %v8026_v6 = vadd.f32 %v6037_v5, %v4126_v45  ;;  %v6840_v7 = vpop.f32.mrb[137].mxu0 }
 0x75f   : > { %v4129_v58 = vpop.f32.mrb[138].mxu0  ;;  %v4166_v9 = vpop.f32.mrb[136].mxu1 }
 0x760   : > { %v8028_v59 = vadd.f32 %v6038_v48, %v4166_v9  ;;  %v6841_v11 = vpop.f32.mrb[139].mxu0  ;;  %v6848_v12 = vpop.f32.mrb[137].mxu1 }
 0x761   : > { %v4169_v16 = vpop.f32.mrb[138].mxu1 }
 0x762   : > { %v6849_v17 = vpop.f32.mrb[139].mxu1 }
 0x765   : > { %v8030_v18 = vpop.f32.mrb[140].mxu0 }
 0x766   : > { %v6856_v20 = vpop.f32.mrb[141].mxu0 }
 0x767   : > { %v4209_v14 = vpop.f32.mrb[142].mxu0  ;;  %v8032_v15 = vpop.f32.mrb[140].mxu1 }
 0x768   : > { %v6857_v23 = vpop.f32.mrb[143].mxu0  ;;  %v6864_v24 = vpop.f32.mrb[141].mxu1 }
 0x769   : > { %v4249_v26 = vpop.f32.mrb[142].mxu1 }
 0x76a   : > { %v6865_v21 = vpop.f32.mrb[143].mxu1 }
 0x80d   : > { %v4308_v28 = vpop.f32.mrb[144].mxu0  ;;  %v4354_v30 = vpop.f32.mrb[144].mxu1 }
 0x80e   : > { %v6870_v31 = vpop.f32.mrb[145].mxu0  ;;  %v6876_v63 = vpop.f32.mrb[145].mxu1  ;;  %v4639_v33 = vsel %vm1845_vm3, %v4354_v30, -inf  ;;  %v4636_v0 = vsel %vm1845_vm3, %v4308_v28, -inf }
 0x80f   : > { %4640 = vmax.xlane.f32.xlu1 %v4639_v33  ;;  %v4357_v34 = vpop.f32.mrb[146].mxu1  ;;  %4637 = vmax.xlane.f32.xlu0 %v4636_v0  ;;  %v4311_v36 = vpop.f32.mrb[146].mxu0 }
 0x810   : > { %v6871_v38 = vpop.f32.mrb[147].mxu0  ;;  %v6877_v27 = vpop.f32.mrb[147].mxu1 }
 0x815   : > { %v4400_v46 = vpop.f32.mrb[148].mxu0  ;;  %v4446_v22 = vpop.f32.mrb[148].mxu1 }
 0x816   : > { %v6882_v40 = vpop.f32.mrb[149].mxu0  ;;  %v6888_v44 = vpop.f32.mrb[149].mxu1  ;;  %v4645_v25 = vsel %vm1845_vm3, %v4446_v22, -inf  ;;  %v4642_v47 = vsel %vm1845_vm3, %v4400_v46, -inf }
 0x817   : > { %4646 = vmax.xlane.f32.xlu1 %v4645_v25  ;;  %v4449_v5 = vpop.f32.mrb[150].mxu1  ;;  %4643 = vmax.xlane.f32.xlu0 %v4642_v47  ;;  %v4403_v43 = vpop.f32.mrb[150].mxu0 }
 0x818   : > { %v6883_v48 = vpop.f32.mrb[151].mxu0  ;;  %v6889_v13 = vpop.f32.mrb[151].mxu1 }
 0x81d   : > { %v4492_v51 = vpop.f32.mrb[152].mxu0  ;;  %v4538_v53 = vpop.f32.mrb[152].mxu1 }
 0x81e   : > { %v6894_v54 = vpop.f32.mrb[153].mxu0  ;;  %v6900_v57 = vpop.f32.mrb[153].mxu1  ;;  %v4651_v35 = vsel %vm1845_vm3, %v4538_v53, -inf  ;;  %v4648_v32 = vsel %vm1845_vm3, %v4492_v51, -inf }
 0x81f   : > { %4652 = vmax.xlane.f32.xlu1 %v4651_v35  ;;  %v4541_v61 = vpop.f32.mrb[154].mxu1  ;;  %4649 = vmax.xlane.f32.xlu0 %v4648_v32  ;;  %v4495_v62 = vpop.f32.mrb[154].mxu0 }
 0x820   : > { %v6895_v49 = vpop.f32.mrb[155].mxu0  ;;  %v6901_v50 = vpop.f32.mrb[155].mxu1 }
 0x825   : > { %v4584_v39 = vpop.f32.mrb[156].mxu0  ;;  %v4630_v42 = vpop.f32.mrb[156].mxu1 }
 0x826   : > { %v6906_v56 = vpop.f32.mrb[157].mxu0  ;;  %v6912_v60 = vpop.f32.mrb[157].mxu1  ;;  %v4657_v2 = vsel %vm1845_vm3, %v4630_v42, -inf  ;;  %v4654_v29 = vsel %vm1845_vm3, %v4584_v39, -inf }
 0x827   : > { %4658 = vmax.xlane.f32.xlu1 %v4657_v2  ;;  %v4633_v3 = vpop.f32.mrb[158].mxu1  ;;  %4655 = vmax.xlane.f32.xlu0 %v4654_v29  ;;  %v4587_v4 = vpop.f32.mrb[158].mxu0 }
 0x828   : > { %v6907_v45 = vpop.f32.mrb[159].mxu0  ;;  %v6913_v7 = vpop.f32.mrb[159].mxu1 }
 0x89c   : > { %v4641_v58 = vpop.xlane.xlu1 %4640  ;;  %v4638_v9 = vpop.xlane.xlu0 %4637 }
 0x89d   : > { %v4661_v11 = vsub.f32 %v4354_v30, %v4641_v58  ;;  %v4660_v12 = vsub.f32 %v4308_v28, %v4638_v9 }
 0x89f   : > { %v4670_v16 = vmul.f32 1.442695, %v4661_v11  ;;  %v4668_v17 = vmul.f32 1.442695, %v4660_v12 }
 0x8a1   : > { %7088 = vpow2.f32 %v4670_v16 }
 0x8a2   : > { %7090 = vpow2.f32 %v4668_v17 }
 0x8a4   : > { %v4647_v20 = vpop.xlane.xlu1 %4646  ;;  %v4644_v14 = vpop.xlane.xlu0 %4643 }
 0x8a5   : > { %v4663_v23 = vsub.f32 %v4446_v22, %v4647_v20  ;;  %v4662_v24 = vsub.f32 %v4400_v46, %v4644_v14 }
 0x8a7   : > { %v4674_v26 = vmul.f32 1.442695, %v4663_v23  ;;  %v4672_v21 = vmul.f32 1.442695, %v4662_v24  ;;  %v4737_v23 = vpack.c.bf16 %v8028_v59, %v8028_v59 }
 0x8a9   : > { %7092 = vpow2.f32 %v4674_v26  ;;  %v4736_v26 = vpack.c.bf16 %v8026_v6, %v8026_v6 }
 0x8aa   : > { %7094 = vpow2.f32 %v4672_v21 }
 0x8ab   : > { %v7089_v31 = vpop.eup %7088 }
 0x8ac   : > { %v7091_v63 = vpop.eup %7090  ;;  %v4653_v33 = vpop.xlane.xlu1 %4652  ;;  %v4687_v34 = vsel %vm1845_vm3, %v7089_v31, 0.0 }
 0x8ad   : > { %v4650_v0 = vpop.xlane.xlu0 %4649  ;;  %v4665_v30 = vsub.f32 %v4538_v53, %v4653_v33  ;;  %4688 = vadd.xlane.f32.xlu1 %v4687_v34  ;;  %v4684_v36 = vsel %vm1845_vm3, %v7091_v63, 0.0  ;;  %v4974_v33 = vsel %vm2321_vm4, %v4737_v23, 0 }
 0x8ae   : > { %v4664_v28 = vsub.f32 %v4492_v51, %v4650_v0  ;;  %4685 = vadd.xlane.f32.xlu0 %v4684_v36 }
 0x8af   : > { %v4678_v38 = vmul.f32 1.442695, %v4665_v30  ;;  %v4928_v30 = vsel %vm2321_vm4, %v4736_v26, 0 }
 0x8b0   : > { %v4676_v27 = vmul.f32 1.442695, %v4664_v28 }
 0x8b1   : > { %7096 = vpow2.f32 %v4678_v38 }
 0x8b2   : > { %7098 = vpow2.f32 %v4676_v27 }
 0x8b3   : > { %v7093_v46 = vpop.eup %7092 }
 0x8b4   : > { %v8044_v22 = vpop.eup %7094  ;;  %v4659_v40 = vpop.xlane.xlu1 %4658  ;;  %v4693_v25 = vsel %vm1845_vm3, %v7093_v46, 0.0 }
 0x8b5   : > { %v4656_v44 = vpop.xlane.xlu0 %4655  ;;  %v4667_v47 = vsub.f32 %v4630_v42, %v4659_v40  ;;  %4694 = vadd.xlane.f32.xlu1 %v4693_v25  ;;  %v4690_v43 = vsel %vm1845_vm3, %v8044_v22, 0.0  ;;  %v6039_v42 = vld [vmem:[%s7272_s27 + $0xa] ss:$0 sm:$0xff]  ;;  %v3176_v25 = vld [vmem:[%s7277_s30] sm:$0xff] }
 0x8b6   : > { %v4666_v5 = vsub.f32 %v4584_v39, %v4656_v44  ;;  %4691 = vadd.xlane.f32.xlu0 %v4690_v43  ;;  %v6040_v39 = vld [vmem:[%s7272_s27 + $0xb] ss:$0 sm:$0xff]  ;;  %v4047_v2 = vadd.f32 %v6039_v42, %v8021_v37  ;;  %v4207_v59 = vadd.f32 %v6039_v42, %v8030_v18 }
 0x8b7   : > { %v4682_v48 = vmul.f32 1.442695, %v4667_v47  ;;  %v4087_v56 = vadd.f32 %v6040_v39, %v8024_v1  ;;  %v4247_v0 = vadd.f32 %v6040_v39, %v8032_v15  ;;  %v3177_v40 = vld [vmem:[%s7277_s30 + $0x8] sm:$0xff] }
 0x8b8   : > { %v4680_v13 = vmul.f32 1.442695, %v4666_v5  ;;  %v4734_v58 = vpack.c.bf16 %v4047_v2, %v4047_v2  ;;  %v4738_v38 = vpack.c.bf16 %v4207_v59, %v4207_v59  ;;  %v5109_v5 = vpack.c.bf16 %v3177_v40, %v3177_v40 }
 0x8b9   : > { %7100 = vpow2.f32 %v4682_v48  ;;  %v4735_v45 = vpack.c.bf16 %v4087_v56, %v4087_v56  ;;  %v4739_v18 = vpack.c.bf16 %v4247_v0, %v4247_v0  ;;  %v5108_v48 = vpack.c.bf16 %v3176_v25, %v3176_v25 }
 0x8ba   : > { %7102 = vpow2.f32 %v4680_v13  ;;  %v4836_v1 = vsel %vm2321_vm4, %v4734_v58, 0  ;;  %v5020_v47 = vsel %vm2321_vm4, %v4738_v38, 0 }
 0x8bb   : > { %v8049_v51 = vpop.eup %7096  ;;  %v4882_v16 = vsel %vm2321_vm4, %v4735_v45, 0  ;;  %v5066_v44 = vsel %vm2321_vm4, %v4739_v18, 0 }
 0x8bc   : > { %v8051_v53 = vpop.eup %7098  ;;  %v4699_v54 = vsel %vm1845_vm3, %v8049_v51, 0.0 }
 0x8bd   : > { %4700 = vadd.xlane.f32.xlu1 %v4699_v54  ;;  %v4696_v57 = vsel %vm1845_vm3, %v8051_v53, 0.0 }
 0x8be   : > { %4697 = vadd.xlane.f32.xlu0 %v4696_v57  ;;  %v5170_v57 = vsel %vm2321_vm4, %v5109_v5, 0 }
 0x8c3   : > { %v8057_v35 = vpop.eup %7100 }
 0x8c4   : > { %v8059_v32 = vpop.eup %7102  ;;  %v4705_v61 = vsel %vm1845_vm3, %v8057_v35, 0.0 }
 0x8c5   : > { %4706 = vadd.xlane.f32.xlu1 %v4705_v61  ;;  %v4702_v62 = vsel %vm1845_vm3, %v8059_v32, 0.0 }
 0x8c6   : > { %4703 = vadd.xlane.f32.xlu0 %v4702_v62  ;;  %v5124_v62 = vsel %vm2321_vm4, %v5108_v48, 0 }
 0x93a   : > { %v4689_v49 = vpop.xlane.xlu1 %4688 }
 0x93b   : > { %7104 = vrcp.f32 %v4689_v49  ;;  %v4686_v50 = vpop.xlane.xlu0 %4685 }
 0x93c   : > { %7106 = vrcp.f32 %v4686_v50 }
 0x942   : > { %v4695_v60 = vpop.xlane.xlu1 %4694 }
 0x943   : > { %7108 = vrcp.f32 %v4695_v60  ;;  %v4692_v29 = vpop.xlane.xlu0 %4691 }
 0x944   : > { %7110 = vrcp.f32 %v4692_v29 }
 0x945   : > { %v7105_v3 = vpop.eup %7104 }
 0x946   : > { %v7107_v4 = vpop.eup %7106  ;;  %v4717_v7 = vmul.f32 %v7105_v3, %v7089_v31 }
 0x947   : > { %v4716_v9 = vmul.f32 %v7107_v4, %v7091_v63 }
 0x948   : > { %v4725_v11 = vpack.c.bf16 %v4717_v7, %v4717_v7 }
 0x949   : > { %v4724_v12 = vpack.c.bf16 %v4716_v9, %v4716_v9 }
 0x94a   : > { %6923 = vmatmul.mubr.msk.bf16.vlgmr.msra.gmra.mrb[160].mxu1 %vm1845_vm3, %v4725_v11  ;;  %v4701_v17 = vpop.xlane.xlu1 %4700 }
 0x94b   : > { %6933 = vmatpush3.bf16.msra.mxu1 %v4882_v16  ;;  %7112 = vrcp.f32 %v4701_v17  ;;  %6917 = vmatmul.mubr.msk.bf16.vlgmr.msra.gmra.mrb[160].mxu0 %vm1845_vm3, %v4724_v12  ;;  %v4698_v37 = vpop.xlane.xlu0 %4697 }
 0x94c   : > { %6927 = vmatpush3.bf16.msra.mxu0 %v4836_v1  ;;  %7114 = vrcp.f32 %v4698_v37  ;;  %6928 = vmatprep.mubr.msk.bf16.mxu0 %vm7144_vm1, %v7143_v8 }
 0x94d   : > { %v7109_v20 = vpop.eup %7108  ;;  %6934 = vmatprep.mubr.msk.bf16.mxu1 %vm7144_vm1, %v7143_v8  ;;  %6938 = vmatprep.subr.bf16.mxu0 %v7143_v8 }
 0x94e   : > { %v7111_v14 = vpop.eup %7110  ;;  %v4719_v24 = vmul.f32 %v7109_v20, %v7093_v46  ;;  %6944 = vmatprep.subr.bf16.mxu1 %v7143_v8 }
 0x94f   : > { %v4718_v21 = vmul.f32 %v7111_v14, %v8044_v22 }
 0x950   : > { %v4727_v31 = vpack.c.bf16 %v4719_v24, %v4719_v24 }
 0x951   : > { %v4726_v63 = vpack.c.bf16 %v4718_v21, %v4718_v21 }
 0x952   : > { %6935 = vmatmul.mubr.msk.bf16.vlgmr.msra.gmra.mrb[164].mxu1 %vm1845_vm3, %v4727_v31  ;;  %v4707_v34 = vpop.xlane.xlu1 %4706 }
 0x953   : > { %6945 = vmatpush3.bf16.msra.mxu1 %v4974_v33  ;;  %7116 = vrcp.f32 %v4707_v34  ;;  %6929 = vmatmul.mubr.msk.bf16.vlgmr.msra.gmra.mrb[164].mxu0 %vm1845_vm3, %v4726_v63  ;;  %v4704_v6 = vpop.xlane.xlu0 %4703 }
 0x954   : > { %6939 = vmatpush3.bf16.msra.mxu0 %v4928_v30  ;;  %7118 = vrcp.f32 %v4704_v6  ;;  %6940 = vmatprep.mubr.msk.bf16.mxu0 %vm7144_vm1, %v7143_v8 }
 0x955   : > { %v7113_v15 = vpop.eup %7112  ;;  %6946 = vmatprep.mubr.msk.bf16.mxu1 %vm7144_vm1, %v7143_v8  ;;  %6950 = vmatprep.subr.bf16.mxu0 %v7143_v8 }
 0x956   : > { %v7115_v28 = vpop.eup %7114  ;;  %v4721_v36 = vmul.f32 %v7113_v15, %v8049_v51  ;;  %6956 = vmatprep.subr.bf16.mxu1 %v7143_v8 }
 0x957   : > { %v4720_v27 = vmul.f32 %v7115_v28, %v8051_v53 }
 0x958   : > { %v4729_v46 = vpack.c.bf16 %v4721_v36, %v4721_v36 }
 0x959   : > { %v4728_v22 = vpack.c.bf16 %v4720_v27, %v4720_v27 }
 0x95a   : > { %6947 = vmatmul.mubr.msk.bf16.vlgmr.msra.gmra.mrb[168].mxu1 %vm1845_vm3, %v4729_v46 }
 0x95b   : > { %6941 = vmatmul.mubr.msk.bf16.vlgmr.msra.gmra.mrb[168].mxu0 %vm1845_vm3, %v4728_v22  ;;  %6957 = vmatpush3.bf16.msra.mxu1 %v5066_v44 }
 0x95c   : > { %6951 = vmatpush3.bf16.msra.mxu0 %v5020_v47  ;;  %6952 = vmatprep.mubr.msk.bf16.mxu0 %vm7144_vm1, %v7143_v8 }
 0x95d   : > { %v7117_v43 = vpop.eup %7116  ;;  %6958 = vmatprep.mubr.msk.bf16.mxu1 %vm7144_vm1, %v7143_v8  ;;  %6962 = vmatprep.subr.bf16.mxu0 %v7143_v8 }
 0x95e   : > { %v7119_v13 = vpop.eup %7118  ;;  %v4723_v51 = vmul.f32 %v7117_v43, %v8057_v35  ;;  %6968 = vmatprep.subr.bf16.mxu1 %v7143_v8  ;;  %v3179_v35 = vld [vmem:[%s7277_s30 + $0x18] sm:$0xff] }
 0x95f   : > { %v4722_v53 = vmul.f32 %v7119_v13, %v8059_v32  ;;  %v3178_v32 = vld [vmem:[%s7277_s30 + $0x10] sm:$0xff]  ;;  %v5111_v49 = vpack.c.bf16 %v3179_v35, %v3179_v35  ;;  %s8285_s30 = sld [smem:[#allocation10_spill]] (!%p6077_p5) }
 0x960   : > { %v4731_v54 = vpack.c.bf16 %v4723_v51, %v4723_v51  ;;  %v5110_v50 = vpack.c.bf16 %v3178_v32, %v3178_v32 }
 0x961   : > { %v4730_v61 = vpack.c.bf16 %v4722_v53, %v4722_v53  ;;  %v5262_v2 = vsel %vm2321_vm4, %v5111_v49, 0 }
 0x962   : > { %6959 = vmatmul.mubr.msk.bf16.vlgmr.msra.gmra.mrb[172].mxu1 %vm1845_vm3, %v4731_v54  ;;  %v5216_v45 = vsel %vm2321_vm4, %v5110_v50, 0 }
 0x963   : > { %6953 = vmatmul.mubr.msk.bf16.vlgmr.msra.gmra.mrb[172].mxu0 %vm1845_vm3, %v4730_v61  ;;  %6969 = vmatpush3.bf16.msra.mxu1 %v5170_v57 }
 0x964   : > { %6963 = vmatpush3.bf16.msra.mxu0 %v5124_v62  ;;  %6964 = vmatprep.mubr.msk.bf16.mxu0 %vm7144_vm1, %v7143_v8 }
 0x965   : > { %6970 = vmatprep.mubr.msk.bf16.mxu1 %vm7144_vm1, %v7143_v8  ;;  %6974 = vmatprep.subr.bf16.mxu0 %v7143_v8 }
 0x966   : > { %6980 = vmatprep.subr.bf16.mxu1 %v7143_v8 }
 0xa1d   : > { %v4826_v39 = vpop.f32.mrb[160].mxu1 }
 0xa1e   : > { %v4780_v42 = vpop.f32.mrb[160].mxu0  ;;  %v5113_v56 = vpack.c.bf16 %v4826_v39, %v4826_v39  ;;  %v6924_v60 = vpop.f32.mrb[161].mxu1 }
 0xa1f   : > { %v5112_v29 = vpack.c.bf16 %v4780_v42, %v4780_v42  ;;  %v6918_v3 = vpop.f32.mrb[161].mxu0  ;;  %v4829_v4 = vpop.f32.mrb[162].mxu1  ;;  %v8161_v60 = vld [vmem:[%s7298_s28] sm:$0xff] }
 0xa20   : > { %v4783_v7 = vpop.f32.mrb[162].mxu0  ;;  %v6925_v58 = vpop.f32.mrb[163].mxu1  ;;  %6971 = vmatmul.mubr.msk.bf16.vlgmr.msra.gmra.mrb[176].mxu1 %vm1845_vm3, %v5113_v56 }
 0xa21   : > { %v6919_v9 = vpop.f32.mrb[163].mxu0  ;;  %6965 = vmatmul.mubr.msk.bf16.vlgmr.msra.gmra.mrb[176].mxu0 %vm1845_vm3, %v5112_v29  ;;  %6981 = vmatpush3.bf16.msra.mxu1 %v5262_v2 }
 0xa22   : > { %6975 = vmatpush3.bf16.msra.mxu0 %v5216_v45  ;;  %6976 = vmatprep.mubr.msk.bf16.mxu0 %vm7144_vm1, %v7143_v8 }
 0xa23   : > { %6982 = vmatprep.mubr.msk.bf16.mxu1 %vm7144_vm1, %v7143_v8  ;;  %6986 = vmatprep.subr.bf16.mxu0 %v7143_v8 }
 0xa24   : > { %6992 = vmatprep.subr.bf16.mxu1 %v7143_v8 }
 0xa25   : > { %v4918_v11 = vpop.f32.mrb[164].mxu1 }
 0xa26   : > { %v4872_v12 = vpop.f32.mrb[164].mxu0  ;;  %v5115_v16 = vpack.c.bf16 %v4918_v11, %v4918_v11  ;;  %v6936_v17 = vpop.f32.mrb[165].mxu1 }
 0xa27   : > { %v5114_v1 = vpack.c.bf16 %v4872_v12, %v4872_v12  ;;  %v6930_v37 = vpop.f32.mrb[165].mxu0  ;;  %v4921_v20 = vpop.f32.mrb[166].mxu1 }
 0xa28   : > { %v4875_v14 = vpop.f32.mrb[166].mxu0  ;;  %v6937_v23 = vpop.f32.mrb[167].mxu1  ;;  %6983 = vmatmul.mubr.msk.bf16.vlgmr.msra.gmra.mrb[180].mxu1 %vm1845_vm3, %v5115_v16 }
 0xa29   : > { %v6931_v24 = vpop.f32.mrb[167].mxu0  ;;  %6977 = vmatmul.mubr.msk.bf16.vlgmr.msra.gmra.mrb[180].mxu0 %vm1845_vm3, %v5114_v1  ;;  %6993 = vmatpush3.bf16.msra.mxu1 %v5170_v57 }
 0xa2a   : > { %6987 = vmatpush3.bf16.msra.mxu0 %v5124_v62  ;;  %6988 = vmatprep.mubr.msk.bf16.mxu0 %vm7144_vm1, %v7143_v8  ;;  %v5492_v62 = vsub.s32 3, %v7596_v52 }
 0xa2b   : > { %6994 = vmatprep.mubr.msk.bf16.mxu1 %vm7144_vm1, %v7143_v8  ;;  %6998 = vmatprep.subr.bf16.mxu0 %v7143_v8 }
 0xa2c   : > { %7004 = vmatprep.subr.bf16.mxu1 %v7143_v8 }
 0xa2d   : > { %v5010_v26 = vpop.f32.mrb[168].mxu1 }
 0xa2e   : > { %v4964_v21 = vpop.f32.mrb[168].mxu0  ;;  %v5117_v31 = vpack.c.bf16 %v5010_v26, %v5010_v26  ;;  %v6948_v63 = vpop.f32.mrb[169].mxu1 }
 0xa2f   : > { %v5116_v33 = vpack.c.bf16 %v4964_v21, %v4964_v21  ;;  %v6942_v0 = vpop.f32.mrb[169].mxu0  ;;  %v5013_v34 = vpop.f32.mrb[170].mxu1 }
 0xa30   : > { %v4967_v30 = vpop.f32.mrb[170].mxu0  ;;  %v6949_v59 = vpop.f32.mrb[171].mxu1  ;;  %6995 = vmatmul.mubr.msk.bf16.vlgmr.msra.gmra.mrb[184].mxu1 %vm1845_vm3, %v5117_v31 }
 0xa31   : > { %v6943_v6 = vpop.f32.mrb[171].mxu0  ;;  %6989 = vmatmul.mubr.msk.bf16.vlgmr.msra.gmra.mrb[184].mxu0 %vm1845_vm3, %v5116_v33  ;;  %7005 = vmatpush3.bf16.msra.mxu1 %v5262_v2  ;;  %v5493_v2 = vrot.slane %v8161_v60, %v5492_v62  ;;  %v5596_v62 = vld [vmem:[%s7292_s13] sm:$0xff] }
 0xa32   : > { %6999 = vmatpush3.bf16.msra.mxu0 %v5216_v45  ;;  %7000 = vmatprep.mubr.msk.bf16.mxu0 %vm7144_vm1, %v7143_v8 }
 0xa33   : > { %7006 = vmatprep.mubr.msk.bf16.mxu1 %vm7144_vm1, %v7143_v8  ;;  %7010 = vmatprep.subr.bf16.mxu0 %v7143_v8 }
 0xa34   : > { %7018 = vmatprep.subr.bf16.mxu1 %v7143_v8 }
 0xa35   : > { %v5102_v15 = vpop.f32.mrb[172].mxu1 }
 0xa36   : > { %v5056_v28 = vpop.f32.mrb[172].mxu0  ;;  %v5119_v18 = vpack.c.bf16 %v5102_v15, %v5102_v15  ;;  %v6960_v36 = vpop.f32.mrb[173].mxu1 }
 0xa37   : > { %v5118_v38 = vpack.c.bf16 %v5056_v28, %v5056_v28  ;;  %v6954_v27 = vpop.f32.mrb[173].mxu0  ;;  %v5105_v46 = vpop.f32.mrb[174].mxu1 }
 0xa38   : > { %v5059_v22 = vpop.f32.mrb[174].mxu0  ;;  %v6961_v40 = vpop.f32.mrb[175].mxu1  ;;  %7007 = vmatmul.mubr.msk.bf16.vlgmr.msra.gmra.mrb[188].mxu1 %vm1845_vm3, %v5119_v18 }
 0xa39   : > { %v6955_v44 = vpop.f32.mrb[175].mxu0  ;;  %7001 = vmatmul.mubr.msk.bf16.vlgmr.msra.gmra.mrb[188].mxu0 %vm1845_vm3, %v5118_v38  ;;  %7026 = vmatprep.mubr.msk.bf16.mxu1 %vm7144_vm1, %v7143_v8 }
 0xa3a   : > { %7014 = vmatprep.mubr.msk.bf16.mxu0 %vm7144_vm1, %v7143_v8 }
 0xaf3   : > { %v5206_v25 = vpop.f32.mrb[176].mxu1 }
 0xaf4   : > { %v5160_v47 = vpop.f32.mrb[176].mxu0  ;;  %v5477_v5 = vsel %vm814_vm2, %v5206_v25, 0.0  ;;  %v6972_v43 = vpop.f32.mrb[177].mxu1 }
 0xaf5   : > { %v5476_v48 = vsel %vm814_vm2, %v5160_v47, 0.0  ;;  %v6966_v13 = vpop.f32.mrb[177].mxu0  ;;  %v5209_v51 = vpop.f32.mrb[178].mxu1 }
 0xaf6   : > { %v5478_v53 = vadd.f32 %v5477_v5, %v5476_v48  ;;  %v5163_v54 = vpop.f32.mrb[178].mxu0  ;;  %v6973_v57 = vpop.f32.mrb[179].mxu1  ;;  %v5536_v13 = vld [vmem:[%s7282_s24] sm:$0xff]  ;;  %v5537_v51 = vld [vmem:[%s7282_s24 + $0x8] sm:$0xff] }
 0xaf7   : > { %v6967_v61 = vpop.f32.mrb[179].mxu0  ;;  %v5538_v54 = vld [vmem:[%s7282_s24 + $0x10] sm:$0xff]  ;;  %v5539_v57 = vld [vmem:[%s7282_s24 + $0x18] sm:$0xff] }
 0xaf8   : > { %v5542_v61 = vpack.c.bf16 %v5539_v57, %v5538_v54 }
 0xafb   : > { %v5298_v35 = vpop.f32.mrb[180].mxu1 }
 0xafc   : > { %v5252_v32 = vpop.f32.mrb[180].mxu0  ;;  %v6984_v49 = vpop.f32.mrb[181].mxu1  ;;  %v5481_v4 = vsel %vm814_vm2, %v5298_v35, 0.0  ;;  %v5597_v35 = vld [vmem:[%s7292_s13 + $0x8] sm:$0xff] }
 0xafd   : > { %v5479_v50 = vsel %vm814_vm2, %v5252_v32, 0.0  ;;  %v6978_v39 = vpop.f32.mrb[181].mxu0  ;;  %v5301_v42 = vpop.f32.mrb[182].mxu1  ;;  %v5598_v32 = vld [vmem:[%s7292_s13 + $0x10] sm:$0xff]  ;;  %v5605_v49 = vpack.c.bf16 %v5597_v35, %v5596_v62 }
 0xafe   : > { %v5480_v56 = vadd.f32 %v5479_v50, %v5478_v53  ;;  %v5255_v29 = vpop.f32.mrb[182].mxu0  ;;  %v6985_v3 = vpop.f32.mrb[183].mxu1  ;;  %v5541_v53 = vpack.c.bf16 %v5537_v51, %v5536_v13  ;;  %v5599_v50 = vld [vmem:[%s7292_s13 + $0x18] sm:$0xff] }
 0xaff   : > { %v6979_v45 = vpop.f32.mrb[183].mxu0  ;;  %7019 = vmatpush3.bf16.msra.mxu1 %v5605_v49  ;;  %v5606_v39 = vpack.c.bf16 %v5599_v50, %v5598_v32 }
 0xb00   : > { %v5482_v7 = vadd.f32 %v5481_v4, %v5480_v56  ;;  %7011 = vmatpush3.bf16.msra.mxu0 %v5541_v53  ;;  %7020 = vmatprep.subr.bf16.mxu1 %v7143_v8  ;;  %v5526_v45 = vsub.s32 4, %v7596_v52 }
 0xb01   : > { %7012 = vmatprep.subr.bf16.mxu0 %v7143_v8 }
 0xb02   : > { %v5494_v58 = vadd.f32 %v5493_v2, %v5482_v7 }
 0xb03   : > { %v5384_v9 = vpop.f32.mrb[184].mxu1  ;;  %7021 = vmatpush3.bf16.msra.mxu1 %v5606_v39 }
 0xb04   : > { %v5341_v11 = vpop.f32.mrb[184].mxu0  ;;  %v5484_v12 = vsel %vm814_vm2, %v5384_v9, 0.0  ;;  %v6996_v16 = vpop.f32.mrb[185].mxu1  ;;  %v5496_v17 = vadd.f32 %v5494_v58, %v7763_v41  ;;  %7013 = vmatpush3.bf16.msra.mxu0 %v5542_v61  ;;  %7022 = vmatprep.subr.bf16.mxu1 %v7143_v8  ;;  %v5527_v58 = vrot.slane %v8161_v60, %v5526_v45 }
 0xb05   : > { %v5483_v1 = vsel %vm814_vm2, %v5341_v11, 0.0  ;;  %v6990_v37 = vpop.f32.mrb[185].mxu0  ;;  %v5387_v20 = vpop.f32.mrb[186].mxu1  ;;  %v5532_v11 = vsub.s32 5, %v7596_v52 }
 0xb06   : > { %v5485_v14 = vadd.f32 %v5484_v12, %v5483_v1  ;;  %v5344_v23 = vpop.f32.mrb[186].mxu0  ;;  %v6997_v24 = vpop.f32.mrb[187].mxu1  ;;  %v5498_v26 = vsel %vm814_vm2, %v5496_v17, 0.0 }
 0xb07   : > { %5499 = vadd.xlane.f32.xlu0 %v5498_v26  ;;  %v6991_v21 = vpop.f32.mrb[187].mxu0  ;;  %v5533_v1 = vrot.slane %v8161_v60, %v5532_v11  ;;  %v5600_v24 = vld [vmem:[%s7292_s13 + $0x20] sm:$0xff]  ;;  %v5601_v26 = vld [vmem:[%s7292_s13 + $0x28] sm:$0xff] }
 0xb08   : > { %v5607_v21 = vpack.c.bf16 %v5601_v26, %v5600_v24 }
 0xb0a   : > { %7023 = vmatpush3.bf16.msra.mxu1 %v5607_v21 }
 0xb0b   : > { %v5470_v31 = vpop.f32.mrb[188].mxu1  ;;  %7024 = vmatprep.subr.bf16.mxu1 %v7143_v8  ;;  %v5611_v8 = vsub.s32 6, %v7596_v52 }
 0xb0c   : > { %v5427_v63 = vpop.f32.mrb[188].mxu0  ;;  %v7008_v33 = vpop.f32.mrb[189].mxu1  ;;  %v5488_v15 = vsel %vm814_vm2, %v5470_v31, 0.0  ;;  %v5602_v31 = vld [vmem:[%s7292_s13 + $0x30] sm:$0xff] }
 0xb0d   : > { %v5486_v0 = vsel %vm814_vm2, %v5427_v63, 0.0  ;;  %v7002_v34 = vpop.f32.mrb[189].mxu0  ;;  %v5473_v30 = vpop.f32.mrb[190].mxu1  ;;  %v5603_v63 = vld [vmem:[%s7292_s13 + $0x38] sm:$0xff] }
 0xb0e   : > { %v5487_v59 = vadd.f32 %v5486_v0, %v5485_v14  ;;  %v5430_v41 = vpop.f32.mrb[190].mxu0  ;;  %v7009_v6 = vpop.f32.mrb[191].mxu1  ;;  %v5608_v33 = vpack.c.bf16 %v5603_v63, %v5602_v31  ;;  %v6073_v0 = vld [vmem:[%s664_s16] ss:$0 sm:$0xff] }
 0xb0f   : > { %v7003_v28 = vpop.f32.mrb[191].mxu0 }
 0xb10   : > { %v5489_v18 = vadd.f32 %v5488_v15, %v5487_v59  ;;  %7025 = vmatpush3.bf16.msra.mxu1 %v5608_v33 }
 0xb12   : > { %v5495_v36 = vadd.f32 %v5493_v2, %v5489_v18 }
 0xb14   : > { %v5497_v38 = vadd.f32 %v5495_v36, %v7790_v55 }
 0xb16   : > { %v5501_v27 = vsel %vm814_vm2, %v5497_v38, 0.0 }
 0xb17   : > { %5502 = vadd.xlane.f32.xlu1 %v5501_v27 }
 0xb94   : > { %v5500_v46 = vpop.xlane.xlu0 %5499 }
 0xb95   : > { %v5504_v22 = vmul.f32 0.03125, %v5500_v46 }
 0xb97   : > { %v5506_v40 = vsub.f32 %v5496_v17, %v5504_v22 }
 0xb99   : > { %v5508_v44 = vmul.f32 %v5506_v40, %v5506_v40 }
 0xb9b   : > { %v5510_v25 = vsel %vm814_vm2, %v5508_v44, 0.0 }
 0xb9c   : > { %5511 = vadd.xlane.f32.xlu0 %v5510_v25 }
 0xba4   : > { %v5503_v47 = vpop.xlane.xlu1 %5502 }
 0xba5   : > { %v5505_v5 = vmul.f32 0.03125, %v5503_v47 }
 0xba7   : > { %v5507_v43 = vsub.f32 %v5497_v38, %v5505_v5  ;;  %v5612_v38 = vrot.slane %v8161_v60, %v5611_v8 }
 0xba9   : > { %v5509_v55 = vmul.f32 %v5507_v43, %v5507_v43 }
 0xbab   : > { %v5513_v48 = vsel %vm814_vm2, %v5509_v55, 0.0 }
 0xbac   : > { %5514 = vadd.xlane.f32.xlu1 %v5513_v48 }
 0xc29   : > { %v5512_v42 = vpop.xlane.xlu0 %5511 }
 0xc2a   : > { %v5516_v56 = vmul.f32 0.03125, %v5512_v42 }
 0xc2c   : > { %v5518_v2 = vadd.f32 1e-05, %v5516_v56 }
 0xc2e   : > { %7120 = vrsqrt.f32 %v5518_v2 }
 0xc38   : > { %v7121_v7 = vpop.eup %7120 }
 0xc39   : > { %v5515_v29 = vpop.xlane.xlu1 %5514  ;;  %v5522_v9 = vmul.f32 %v7121_v7, %v5506_v40 }
 0xc3a   : > { %v5517_v3 = vmul.f32 0.03125, %v5515_v29  ;;  %v5688_v29 = vsub.s32 7, %v7596_v52 }
 0xc3b   : > { %v5528_v16 = vmul.f32 %v5527_v58, %v5522_v9 }
 0xc3c   : > { %v5519_v4 = vadd.f32 1e-05, %v5517_v3  ;;  %v5689_v3 = vrot.slane %v8161_v60, %v5688_v29 }
 0xc3d   : > { %v5534_v20 = vadd.f32 %v5533_v1, %v5528_v16 }
 0xc3e   : > { %7122 = vrsqrt.f32 %v5519_v4 }
 0xc48   : > { %v7123_v12 = vpop.eup %7122 }
 0xc49   : > { %v5523_v17 = vmul.f32 %v7123_v12, %v5507_v43 }
 0xc4b   : > { %v5529_v37 = vmul.f32 %v5527_v58, %v5523_v17  ;;  %v6076_v58 = vld [vmem:[%s7298_s28 + $0x8] ss:$0 sm:$0xff] }
 0xc4d   : > { %v5535_v14 = vadd.f32 %v5533_v1, %v5529_v37 }
 0xc4f   : > { %v5540_v23 = vpack.c.bf16 %v5535_v14, %v5534_v20 }
 0xc51   : > { %7015 = vmatmul.mubr.msk.bf16.vlgmr.msra.gmra.mrb[192].mxu0 %vm814_vm2, %v5540_v23 }
 0xd24   : > { %v5587_v34 = vpop.f32.mrb[192].mxu0 }
 0xd25   : > { %v5588_v30 = vadd.f32 %v6073_v0, %v5587_v34  ;;  %v7016_v59 = vpop.f32.mrb[193].mxu0  ;;  %v5744_v34 = vld [vmem:[%s8285_s30 + $0x8] sm:$0xff] (!%p6077_p5) }
 0xd26   : > { %v5590_v41 = vpop.f32.mrb[194].mxu0  ;;  %v7145_v59 = vmov (!%p6077_p5), 0.0  }
 0xd27   : > { %v5591_v6 = vadd.f32 %v6073_v0, %v5590_v41  ;;  %v7017_v15 = vpop.f32.mrb[195].mxu0  ;;  %v5594_v28 = vmax.f32 %v5588_v30, 0.0  ;;  %v5743_v0 = vld [vmem:[%s8285_s30] sm:$0xff] (!%p6077_p5)  ;;  %v5745_v30 = vld [vmem:[%s8285_s30 + $0x10] sm:$0xff] (!%p6077_p5)  ;;  %7030 = vmatprep.subr.bf16.mxu0 (!%p6077_p5), %v7145_v59  ;;  %7034 = vmatprep.mubr.msk.bf16.mxu0 (!%p6077_p5), %vm7146_vm7, %v7145_v59 }
 0xd28   : > { %v5748_v41 = vpack.c.bf16 (!%p6077_p5), %v5744_v34, %v5743_v0 }
 0xd29   : > { %v5595_v18 = vmax.f32 %v5591_v6, 0.0  ;;  %v5746_v6 = vld [vmem:[%s8285_s30 + $0x18] sm:$0xff] (!%p6077_p5) }
 0xd2a   : > { %7031 = vmatpush3.bf16.msra.mxu0 (!%p6077_p5), %v5748_v41  ;;  %v5749_v15 = vpack.c.bf16 (!%p6077_p5), %v5746_v6, %v5745_v30 }
 0xd2b   : > { %v5604_v36 = vpack.c.bf16 %v5595_v18, %v5594_v28  ;;  %7032 = vmatprep.subr.bf16.mxu0 (!%p6077_p5), %v7145_v59 }
 0xd2d   : > { %7027 = vmatmul.mubr.msk.bf16.vlgmr.msra.gmra.mrb[192].mxu1 %vm5613_vm6, %v5604_v36 }
 0xd2e   : > { %7033 = vmatpush3.bf16.msra.mxu0 (!%p6077_p5), %v5749_v15 }
 0xe00   : > { %v5651_v27 = vpop.f32.mrb[192].mxu1 }
 0xe01   : > { %v5652_v46 = vadd.f32 %v5651_v27, %v5612_v38  ;;  %v7028_v22 = vpop.f32.mrb[193].mxu1 }
 0xe02   : > { %v5654_v40 = vpop.f32.mrb[194].mxu1 }
 0xe03   : > { %v5655_v44 = vadd.f32 %v5654_v40, %v5612_v38  ;;  %v7029_v25 = vpop.f32.mrb[195].mxu1  ;;  %v5658_v47 = vadd.f32 %v5652_v46, %v5534_v20  ;;  %v5704_v46 = vld [vmem:[%s8286_s25] sm:$0x3] (!%p6077_p5) }
 0xe05   : > { %v5660_v5 = vsel %vm814_vm2, %v5658_v47, 0.0  ;;  %v5659_v43 = vadd.f32 %v5655_v44, %v5535_v14  ;;  %v5734_v44 = vrot.slane (!%p6077_p5), %v5704_v46, %v3071_v10 }
 0xe06   : > { %5661 = vadd.xlane.f32.xlu0 %v5660_v5 }
 0xe07   : > { %v5663_v55 = vsel %vm814_vm2, %v5659_v43, 0.0 }
 0xe08   : > { %5664 = vadd.xlane.f32.xlu1 %v5663_v55 }
 0xe93   : > { %v5662_v48 = vpop.xlane.xlu0 %5661 }
 0xe94   : > { %v5666_v13 = vmul.f32 0.03125, %v5662_v48 }
 0xe95   : > { %v5665_v51 = vpop.xlane.xlu1 %5664 }
 0xe96   : > { %v5668_v53 = vsub.f32 %v5658_v47, %v5666_v13  ;;  %v5667_v54 = vmul.f32 0.03125, %v5665_v51 }
 0xe98   : > { %v5669_v57 = vsub.f32 %v5659_v43, %v5667_v54  ;;  %v5670_v61 = vmul.f32 %v5668_v53, %v5668_v53  ;;  %v5740_v43 = vrot.slane (!%p6077_p5), %v5704_v46, %v3106_v19 }
 0xe9a   : > { %v5672_v62 = vsel %vm814_vm2, %v5670_v61, 0.0  ;;  %v5671_v35 = vmul.f32 %v5669_v57, %v5669_v57 }
 0xe9b   : > { %5673 = vadd.xlane.f32.xlu0 %v5672_v62 }
 0xe9c   : > { %v5675_v32 = vsel %vm814_vm2, %v5671_v35, 0.0 }
 0xe9d   : > { %5676 = vadd.xlane.f32.xlu1 %v5675_v32 }
 0xf28   : > { %v5674_v49 = vpop.xlane.xlu0 %5673 }
 0xf29   : > { %v5678_v50 = vmul.f32 0.03125, %v5674_v49 }
 0xf2a   : > { %v5677_v39 = vpop.xlane.xlu1 %5676 }
 0xf2b   : > { %v5680_v42 = vadd.f32 1e-05, %v5678_v50  ;;  %v5679_v56 = vmul.f32 0.03125, %v5677_v39 }
 0xf2d   : > { %7124 = vrsqrt.f32 %v5680_v42  ;;  %v5681_v2 = vadd.f32 1e-05, %v5679_v56 }
 0xf2f   : > { %7126 = vrsqrt.f32 %v5681_v2 }
 0xf37   : > { %v7125_v4 = vpop.eup %7124 }
 0xf38   : > { %v5684_v45 = vmul.f32 %v7125_v4, %v5668_v53  ;;  %v6078_v53 = vld [vmem:[%s8287_s4] ss:$0 sm:$0xff] (!%p6077_p5) }
 0xf39   : > { %v7127_v7 = vpop.eup %7126 }
 0xf3a   : > { %v5690_v9 = vmul.f32 %v5689_v3, %v5684_v45  ;;  %v5685_v11 = vmul.f32 %v7127_v7, %v5669_v57  ;;  %5703 = sbr.rel (%p6077_p5) target bundleno = 4438 (0x1156), region = 92 }
 0xf3c   : > { %v5696_v12 = vadd.f32 %v6076_v58, %v5690_v9  ;;  %v5691_v16 = vmul.f32 %v5689_v3, %v5685_v11 }
 0xf3e   : > { %5698 = vst.msk [vmem:[#allocation2] sm:$0xff] %vm814_vm2, %v5696_v12  ;;  %v5697_v17 = vadd.f32 %v6076_v58, %v5691_v16  ;;  %v5705_v1 = vsel (!%p6077_p5), %vm814_vm2, %v5696_v12, 0.0 }
 0xf3f   : > { %5706 = vadd.xlane.f32.xlu0 (!%p6077_p5), %v5705_v1 }
 0xf40   : > { %5699 = vst.msk [vmem:[#allocation2 + $0x8] sm:$0xff] %vm814_vm2, %v5697_v17  ;;  %v5708_v60 = vsel (!%p6077_p5), %vm814_vm2, %v5697_v17, 0.0 }
 0xf43   : > { %5709 = vadd.xlane.f32.xlu0 %v5708_v60 }
 0xfcc   : > { %v5707_v37 = vpop.xlane.xlu0 %5706 }
 0xfcd   : > { %v5711_v20 = vmul.f32 0.03125, %v5707_v37 }
 0xfcf   : > { %v5713_v14 = vsub.f32 %v5696_v12, %v5711_v20 }
 0xfd0   : > { %v5710_v23 = vpop.xlane.xlu0 %5709 }
 0xfd1   : > { %v5712_v24 = vmul.f32 0.03125, %v5710_v23  ;;  %v5715_v26 = vmul.f32 %v5713_v14, %v5713_v14 }
 0xfd3   : > { %v5714_v21 = vsub.f32 %v5697_v17, %v5712_v24  ;;  %v5717_v31 = vsel %vm814_vm2, %v5715_v26, 0.0 }
 0xfd4   : > { %5718 = vadd.xlane.f32.xlu1 %v5717_v31 }
 0xfd5   : > { %v5716_v63 = vmul.f32 %v5714_v21, %v5714_v21 }
 0xfd7   : > { %v5720_v33 = vsel %vm814_vm2, %v5716_v63, 0.0 }
 0xfd8   : > { %5721 = vadd.xlane.f32.xlu1 %v5720_v33 }
0x1061   : > { %v5719_v28 = vpop.xlane.xlu1 %5718 }
0x1062   : > { %v5723_v18 = vmul.f32 0.03125, %v5719_v28 }
0x1064   : > { %v5725_v36 = vadd.f32 1e-05, %v5723_v18 }
0x1065   : > { %v5722_v8 = vpop.xlane.xlu1 %5721 }
0x1066   : > { %7131 = vrsqrt.f32 %v5725_v36  ;;  %v5724_v38 = vmul.f32 0.03125, %v5722_v8 }
0x1068   : > { %v5726_v27 = vadd.f32 1e-05, %v5724_v38 }
0x106a   : > { %7133 = vrsqrt.f32 %v5726_v27 }
0x1070   : > { %v7132_v22 = vpop.eup %7131 }
0x1071   : > { %v5729_v40 = vmul.f32 %v7132_v22, %v5713_v14 }
0x1073   : > { %v5735_v5 = vmul.f32 %v5734_v44, %v5729_v40 }
0x1074   : > { %v7134_v25 = vpop.eup %7133 }
0x1075   : > { %v5730_v47 = vmul.f32 %v7134_v25, %v5714_v21  ;;  %v5741_v48 = vadd.f32 %v5740_v43, %v5735_v5 }
0x1077   : > { %v5736_v55 = vmul.f32 %v5734_v44, %v5730_v47 }
0x1079   : > { %v5742_v13 = vadd.f32 %v5740_v43, %v5736_v55 }
0x107b   : > { %v5747_v51 = vpack.c.bf16 %v5742_v13, %v5741_v48 }
0x107d   : > { %7035 = vmatmul.mubr.msk.bf16.vlgmr.msra.gmra.mrb[0].mxu0 %vm814_vm2, %v5747_v51 }
0x1150   : > { %v5794_v54 = vpop.f32.mrb[0].mxu0 }
0x1151   : > { %v5795_v57 = vadd.f32 %v6078_v53, %v5794_v54  ;;  %v7036_v61 = vpop.f32.mrb[1].mxu0 }
0x1152   : > { %v5797_v10 = vpop.f32.mrb[2].mxu0 }
0x1153   : > { %5801 = vst [vmem:[%s8288_s29] sm:$0xff] %v5795_v57  ;;  %v5798_v52 = vadd.f32 %v6078_v53, %v5797_v10  ;;  %v7037_v19 = vpop.f32.mrb[3].mxu0 }
0x1155   : > { %5802 = vst [vmem:[%s8288_s29 + $0x8] sm:$0xff] %v5798_v52 }
0x1156 PF: > { %s8289_s20 = sld [smem:[#allocation3_spill]] }
0x115c   : > { %s26_s21 = sadd.s32 1, %s8289_s20  }
0x115d   : > { %p23_p6 = scmp.ge.s32.totalorder %s26_s21, 4  }
0x115f   :  { %25 = sbr.rel (!%p23_p6) target bundleno = 10 (0xa), region = 145 }

</bundles_post_ra>
